<compile_context>
chip_gen: v6e
topology: v6e:2x2x1
jax: 0.10.0
libtpu: 0.0.40
codegen_flags: <defaults>
</compile_context>

<pallas_src>
import functools

import jax
import jax.numpy as jnp
from jax.experimental import pallas as pl
from jax.experimental.pallas import tpu as pltpu

INPUT_SIZE = 784
HIDDEN1 = 700
HIDDEN2 = 700
HIDDEN3 = 700
NUM_CLASSES = 10

HID_PAD = 768   # 700 -> next multiple of 128 (lane-dense intermediate activations)
CLS_PAD = 128   # 10  -> 128 (unmasked vst on the final store)


def _round_up(x, m):
    return (x + m - 1) // m * m


def _mlp_kernel(x_ref, w1_ref, b1_ref, w2_ref, b2_ref, w3_ref, b3_ref,
                w4_ref, b4_ref, o_ref):
    # Cast the f32 input tile to bf16 in-register (no wrapper pre-pass needed).
    x = x_ref[...].astype(jnp.bfloat16)
    # fc1 + ReLU   (bf16 operands, f32 accumulation on the MXU)
    h = jnp.dot(x, w1_ref[...], preferred_element_type=jnp.float32) + b1_ref[...]
    h = jnp.maximum(h, 0.0)
    # fc2 (no activation — matches the PyTorch forward)
    h = jnp.dot(h.astype(jnp.bfloat16), w2_ref[...],
                preferred_element_type=jnp.float32) + b2_ref[...]
    # fc3 (no activation)
    h = jnp.dot(h.astype(jnp.bfloat16), w3_ref[...],
                preferred_element_type=jnp.float32) + b3_ref[...]
    # fc4 -> (padded) logits, stored as bf16
    out = jnp.dot(h.astype(jnp.bfloat16), w4_ref[...],
                  preferred_element_type=jnp.float32) + b4_ref[...]
    o_ref[...] = out.astype(o_ref.dtype)


def prepare_params(params):
    """Zero-pad feature dims to 128 multiples; weights -> bf16, biases -> f32 rows."""
    def pad_w(w, rows, cols):
        r, c = w.shape
        return jnp.pad(w, ((0, rows - r), (0, cols - c))).astype(jnp.bfloat16)

    def pad_b(b, cols):
        return jnp.pad(b, (0, cols - b.shape[0])).reshape(1, cols).astype(jnp.float32)

    return dict(
        w1=pad_w(params["w1"], INPUT_SIZE, HID_PAD), b1=pad_b(params["b1"], HID_PAD),
        w2=pad_w(params["w2"], HID_PAD, HID_PAD),    b2=pad_b(params["b2"], HID_PAD),
        w3=pad_w(params["w3"], HID_PAD, HID_PAD),    b3=pad_b(params["b3"], HID_PAD),
        w4=pad_w(params["w4"], HID_PAD, CLS_PAD),    b4=pad_b(params["b4"], CLS_PAD),
    )


def _pick_tile(batch, block_batch):
    """16-row-aligned batch tile; >=2 grid steps when possible (v7x megacore)."""
    two_step = _round_up(-(-batch // 2), 16)          # ceil(B/2) rounded to 16
    return max(16, min(block_batch, two_step))


@functools.partial(jax.jit, static_argnames=("block_batch",))
def mlp_forward(x, prepared, *, block_batch=1024):
    """x: (B, INPUT_SIZE) float32.  prepared: output of prepare_params."""
    B = x.shape[0]
    assert block_batch % 16 == 0
    tm = _pick_tile(B, block_batch)                   # bf16-sublane-aligned tile
    b_pad = _round_up(B, tm)

    xp = x
    if b_pad != B:
        xp = jnp.pad(xp, ((0, b_pad - B), (0, 0)))

    # Weights/biases: untiled, fully VMEM-resident for the whole launch.
    weight_spec = pl.BlockSpec(memory_space=pltpu.MemorySpace.VMEM)

    out_padded = pl.pallas_call(
        _mlp_kernel,
        out_shape=jax.ShapeDtypeStruct((b_pad, CLS_PAD), jnp.bfloat16),
        grid=(b_pad // tm,),
        in_specs=[pl.BlockSpec((tm, INPUT_SIZE), lambda i: (i, 0))]
                 + [weight_spec] * 8,
        out_specs=pl.BlockSpec((tm, CLS_PAD), lambda i: (i, 0)),
        compiler_params=pltpu.CompilerParams(
            dimension_semantics=("parallel",),        # megacore split on v7x
            vmem_limit_bytes=48 << 20),
    )(xp, prepared["w1"], prepared["b1"], prepared["w2"], prepared["b2"],
      prepared["w3"], prepared["b3"], prepared["w4"], prepared["b4"])

    return out_padded[:B, :NUM_CLASSES].astype(jnp.float32)


def init_params(key):
    """Deterministic, PyTorch-Linear-style uniform init (scaled by 1/sqrt(fan_in))."""
    dims = [(INPUT_SIZE, HIDDEN1), (HIDDEN1, HIDDEN2),
            (HIDDEN2, HIDDEN3), (HIDDEN3, NUM_CLASSES)]
    params = {}
    for i, (fan_in, fan_out) in enumerate(dims, start=1):
        key, kw, kb = jax.random.split(key, 3)
        bound = 1.0 / jnp.sqrt(jnp.float32(fan_in))
        # stored as (in, out) == transpose of torch's (out, in)
        params[f"w{i}"] = jax.random.uniform(
            kw, (fan_in, fan_out), jnp.float32, minval=-bound, maxval=bound)
        params[f"b{i}"] = jax.random.uniform(
            kb, (fan_out,), jnp.float32, minval=-bound, maxval=bound)
    return params


def reference_forward_f32(x, params):
    h = jnp.maximum(x @ params["w1"] + params["b1"], 0.0)
    h = h @ params["w2"] + params["b2"]
    h = h @ params["w3"] + params["b3"]
    return h @ params["w4"] + params["b4"]


def reference_forward_bf16(x, params):
    """Same bf16-operand / f32-accumulation / bf16-output math as the kernel."""
    def lin(h, w, b):
        return jnp.dot(h.astype(jnp.bfloat16), w.astype(jnp.bfloat16),
                       preferred_element_type=jnp.float32) + b
    h = jnp.maximum(lin(x, params["w1"], params["b1"]), 0.0)
    h = lin(h, params["w2"], params["b2"])
    h = lin(h, params["w3"], params["b3"])
    out = lin(h, params["w4"], params["b4"])
    return out.astype(jnp.bfloat16).astype(jnp.float32)   # match bf16 store


if __name__ == "__main__":
    key = jax.random.PRNGKey(0)
    key, kx = jax.random.split(key)
    params = init_params(key)
    prepared = prepare_params(params)

    # Small batch path (tm=16, grid=(1,)).
    batch = 8
    x = jax.random.normal(kx, (batch, INPUT_SIZE), jnp.float32)
    out = mlp_forward(x, prepared)
    jax.block_until_ready(out)
    assert out.shape == (batch, NUM_CLASSES), out.shape

    ref_b = reference_forward_bf16(x, params)
    ref_f = reference_forward_f32(x, params)
    assert jnp.allclose(out, ref_b, atol=3e-3, rtol=3e-3), (
        float(jnp.max(jnp.abs(out - ref_b))))
    assert jnp.allclose(out, ref_f, atol=1e-1, rtol=1e-1), (
        float(jnp.max(jnp.abs(out - ref_f))))

    # Multi-tile grid + ragged-batch padding path (B=40 -> tm=16, grid=(3,)).
    key, kx2 = jax.random.split(key)
    x2 = jax.random.normal(kx2, (40, INPUT_SIZE), jnp.float32)
    out2 = mlp_forward(x2, prepared, block_batch=16)
    jax.block_until_ready(out2)
    assert out2.shape == (40, NUM_CLASSES), out2.shape
    ref2 = reference_forward_bf16(x2, params)
    assert jnp.allclose(out2, ref2, atol=3e-3, rtol=3e-3), (
        float(jnp.max(jnp.abs(out2 - ref2))))

    # Larger batch path exercising the >=2-step tile picker (B=96 -> tm=48? no:
    # ceil(96/2)=48 -> 48 is 16-aligned -> grid=(2,), both TCs busy on v7x).
    key, kx3 = jax.random.split(key)
    x3 = jax.random.normal(kx3, (96, INPUT_SIZE), jnp.float32)
    out3 = mlp_forward(x3, prepared)
    jax.block_until_ready(out3)
    assert out3.shape == (96, NUM_CLASSES), out3.shape
    ref3 = reference_forward_bf16(x3, params)
    assert jnp.allclose(out3, ref3, atol=3e-3, rtol=3e-3), (
        float(jnp.max(jnp.abs(out3 - ref3))))

    print("KERNEL_OK")
</pallas_src>

<mosaic_0001>
module attributes {stable_mosaic.version = 11 : i64} {
  func.func @_mlp_kernel(%arg0: i32, %arg1: memref<16x784xf32, #tpu.memory_space<vmem>>, %arg2: memref<784x768xbf16, #tpu.memory_space<vmem>>, %arg3: memref<1x768xf32, #tpu.memory_space<vmem>>, %arg4: memref<768x768xbf16, #tpu.memory_space<vmem>>, %arg5: memref<1x768xf32, #tpu.memory_space<vmem>>, %arg6: memref<768x768xbf16, #tpu.memory_space<vmem>>, %arg7: memref<1x768xf32, #tpu.memory_space<vmem>>, %arg8: memref<768x128xbf16, #tpu.memory_space<vmem>>, %arg9: memref<1x128xf32, #tpu.memory_space<vmem>>, %arg10: memref<16x128xbf16, #tpu.memory_space<vmem>>) attributes {dimension_semantics = [#tpu.dimension_semantics<parallel>], iteration_bounds = array<i64: 1>, scalar_prefetch = 0 : i64, scratch_operands = 0 : i64, tpu.core_type = #tpu.core_type<tc>, window_params = [{transform_indices = @transform_0, window_bounds = array<i64: 16, 784>}, {pipeline_mode = #tpu.pipeline_mode<synchronous>, transform_indices = @transform_1, window_bounds = array<i64: 784, 768>}, {pipeline_mode = #tpu.pipeline_mode<synchronous>, transform_indices = @transform_2, window_bounds = array<i64: 1, 768>}, {pipeline_mode = #tpu.pipeline_mode<synchronous>, transform_indices = @transform_3, window_bounds = array<i64: 768, 768>}, {pipeline_mode = #tpu.pipeline_mode<synchronous>, transform_indices = @transform_4, window_bounds = array<i64: 1, 768>}, {pipeline_mode = #tpu.pipeline_mode<synchronous>, transform_indices = @transform_5, window_bounds = array<i64: 768, 768>}, {pipeline_mode = #tpu.pipeline_mode<synchronous>, transform_indices = @transform_6, window_bounds = array<i64: 1, 768>}, {pipeline_mode = #tpu.pipeline_mode<synchronous>, transform_indices = @transform_7, window_bounds = array<i64: 768, 128>}, {pipeline_mode = #tpu.pipeline_mode<synchronous>, transform_indices = @transform_8, window_bounds = array<i64: 1, 128>}, {transform_indices = @transform_9, window_bounds = array<i64: 16, 128>}]} {
    %c0 = arith.constant 0 : index
    %c0_0 = arith.constant 0 : index
    %0 = vector.load %arg1[%c0, %c0_0] : memref<16x784xf32, #tpu.memory_space<vmem>>, vector<16x784xf32>
    %1 = arith.truncf %0 : vector<16x784xf32> to vector<16x784xbf16>
    %c0_1 = arith.constant 0 : index
    %c0_2 = arith.constant 0 : index
    %2 = vector.load %arg2[%c0_1, %c0_2] : memref<784x768xbf16, #tpu.memory_space<vmem>>, vector<784x768xbf16>
    %cst = arith.constant dense<0.000000e+00> : vector<16x768xf32>
    %3 = tpu.matmul %1, %2, %cst {dimension_numbers = #tpu.dot_dimension_numbers<[1], [0], [0], [1], [0, 0, 1, 1], [], []>} : vector<16x784xbf16>, vector<784x768xbf16>, vector<16x768xf32> -> vector<16x768xf32>
    %c0_3 = arith.constant 0 : index
    %c0_4 = arith.constant 0 : index
    %4 = vector.load %arg3[%c0_3, %c0_4] : memref<1x768xf32, #tpu.memory_space<vmem>>, vector<1x768xf32>
    %5 = vector.broadcast %4 : vector<1x768xf32> to vector<16x768xf32>
    %6 = arith.addf %3, %5 : vector<16x768xf32>
    %cst_5 = arith.constant 0.000000e+00 : f32
    %7 = vector.broadcast %cst_5 : f32 to vector<16x768xf32>
    %8 = arith.maximumf %6, %7 : vector<16x768xf32>
    %9 = arith.truncf %8 : vector<16x768xf32> to vector<16x768xbf16>
    %c0_6 = arith.constant 0 : index
    %c0_7 = arith.constant 0 : index
    %10 = vector.load %arg4[%c0_6, %c0_7] : memref<768x768xbf16, #tpu.memory_space<vmem>>, vector<768x768xbf16>
    %cst_8 = arith.constant dense<0.000000e+00> : vector<16x768xf32>
    %11 = tpu.matmul %9, %10, %cst_8 {dimension_numbers = #tpu.dot_dimension_numbers<[1], [0], [0], [1], [0, 0, 1, 1], [], []>} : vector<16x768xbf16>, vector<768x768xbf16>, vector<16x768xf32> -> vector<16x768xf32>
    %c0_9 = arith.constant 0 : index
    %c0_10 = arith.constant 0 : index
    %12 = vector.load %arg5[%c0_9, %c0_10] : memref<1x768xf32, #tpu.memory_space<vmem>>, vector<1x768xf32>
    %13 = vector.broadcast %12 : vector<1x768xf32> to vector<16x768xf32>
    %14 = arith.addf %11, %13 : vector<16x768xf32>
    %15 = arith.truncf %14 : vector<16x768xf32> to vector<16x768xbf16>
    %c0_11 = arith.constant 0 : index
    %c0_12 = arith.constant 0 : index
    %16 = vector.load %arg6[%c0_11, %c0_12] : memref<768x768xbf16, #tpu.memory_space<vmem>>, vector<768x768xbf16>
    %cst_13 = arith.constant dense<0.000000e+00> : vector<16x768xf32>
    %17 = tpu.matmul %15, %16, %cst_13 {dimension_numbers = #tpu.dot_dimension_numbers<[1], [0], [0], [1], [0, 0, 1, 1], [], []>} : vector<16x768xbf16>, vector<768x768xbf16>, vector<16x768xf32> -> vector<16x768xf32>
    %c0_14 = arith.constant 0 : index
    %c0_15 = arith.constant 0 : index
    %18 = vector.load %arg7[%c0_14, %c0_15] : memref<1x768xf32, #tpu.memory_space<vmem>>, vector<1x768xf32>
    %19 = vector.broadcast %18 : vector<1x768xf32> to vector<16x768xf32>
    %20 = arith.addf %17, %19 : vector<16x768xf32>
    %21 = arith.truncf %20 : vector<16x768xf32> to vector<16x768xbf16>
    %c0_16 = arith.constant 0 : index
    %c0_17 = arith.constant 0 : index
    %22 = vector.load %arg8[%c0_16, %c0_17] : memref<768x128xbf16, #tpu.memory_space<vmem>>, vector<768x128xbf16>
    %cst_18 = arith.constant dense<0.000000e+00> : vector<16x128xf32>
    %23 = tpu.matmul %21, %22, %cst_18 {dimension_numbers = #tpu.dot_dimension_numbers<[1], [0], [0], [1], [0, 0, 1, 1], [], []>} : vector<16x768xbf16>, vector<768x128xbf16>, vector<16x128xf32> -> vector<16x128xf32>
    %c0_19 = arith.constant 0 : index
    %c0_20 = arith.constant 0 : index
    %24 = vector.load %arg9[%c0_19, %c0_20] : memref<1x128xf32, #tpu.memory_space<vmem>>, vector<1x128xf32>
    %25 = vector.broadcast %24 : vector<1x128xf32> to vector<16x128xf32>
    %26 = arith.addf %23, %25 : vector<16x128xf32>
    %27 = arith.truncf %26 : vector<16x128xf32> to vector<16x128xbf16>
    %c0_21 = arith.constant 0 : index
    %c0_22 = arith.constant 0 : index
    %28 = vector.load %arg10[%c0_21, %c0_22] : memref<16x128xbf16, #tpu.memory_space<vmem>>, vector<16x128xbf16>
    tpu.vector_store %arg10[%c0_21, %c0_22], %27 {strides = array<i32>} : memref<16x128xbf16, #tpu.memory_space<vmem>>, vector<16x128xbf16>,
    return
  }
  func.func @transform_0(%arg0: i32) -> (i32, i32) {
    %c0_i32 = arith.constant 0 : i32
    %c0_i32_0 = arith.constant 0 : i32
    return %arg0, %c0_i32 : i32, i32
  }
  func.func @transform_1(%arg0: i32) -> (i32, i32) {
    %c0_i32 = arith.constant 0 : i32
    %c0_i32_0 = arith.constant 0 : i32
    %c0_i32_1 = arith.constant 0 : i32
    return %c0_i32, %c0_i32_0 : i32, i32
  }
  func.func @transform_2(%arg0: i32) -> (i32, i32) {
    %c0_i32 = arith.constant 0 : i32
    %c0_i32_0 = arith.constant 0 : i32
    %c0_i32_1 = arith.constant 0 : i32
    return %c0_i32, %c0_i32_0 : i32, i32
  }
  func.func @transform_3(%arg0: i32) -> (i32, i32) {
    %c0_i32 = arith.constant 0 : i32
    %c0_i32_0 = arith.constant 0 : i32
    %c0_i32_1 = arith.constant 0 : i32
    return %c0_i32, %c0_i32_0 : i32, i32
  }
  func.func @transform_4(%arg0: i32) -> (i32, i32) {
    %c0_i32 = arith.constant 0 : i32
    %c0_i32_0 = arith.constant 0 : i32
    %c0_i32_1 = arith.constant 0 : i32
    return %c0_i32, %c0_i32_0 : i32, i32
  }
  func.func @transform_5(%arg0: i32) -> (i32, i32) {
    %c0_i32 = arith.constant 0 : i32
    %c0_i32_0 = arith.constant 0 : i32
    %c0_i32_1 = arith.constant 0 : i32
    return %c0_i32, %c0_i32_0 : i32, i32
  }
  func.func @transform_6(%arg0: i32) -> (i32, i32) {
    %c0_i32 = arith.constant 0 : i32
    %c0_i32_0 = arith.constant 0 : i32
    %c0_i32_1 = arith.constant 0 : i32
    return %c0_i32, %c0_i32_0 : i32, i32
  }
  func.func @transform_7(%arg0: i32) -> (i32, i32) {
    %c0_i32 = arith.constant 0 : i32
    %c0_i32_0 = arith.constant 0 : i32
    %c0_i32_1 = arith.constant 0 : i32
    return %c0_i32, %c0_i32_0 : i32, i32
  }
  func.func @transform_8(%arg0: i32) -> (i32, i32) {
    %c0_i32 = arith.constant 0 : i32
    %c0_i32_0 = arith.constant 0 : i32
    %c0_i32_1 = arith.constant 0 : i32
    return %c0_i32, %c0_i32_0 : i32, i32
  }
  func.func @transform_9(%arg0: i32) -> (i32, i32) {
    %c0_i32 = arith.constant 0 : i32
    %c0_i32_0 = arith.constant 0 : i32
    return %arg0, %c0_i32 : i32, i32
  }
}

</mosaic_0001>

<bundles_post_ra>
// kernel: mlp_forward.1
= control target key start
LH: loop header
LB: loop body
LE: loop exit
PB: predicated region body
PF: predicated region fallthrough
CT: control target
= control target key end

     0   :  { %14 = vsyncpa [#allocation3], 0  ;;  %s10164_s0 = inlined_call_operand.vmem [shape: f32[16,784], index: 0, kind: input, shape index: {}]   ;;  %s10165_s1 = inlined_call_operand.hbm [shape: bf16[784,768], index: 1, kind: input, shape index: {}]   ;;  %s10166_s2 = inlined_call_operand.hbm [shape: f32[1,768], index: 2, kind: input, shape index: {}]   ;;  %s10167_s3 = inlined_call_operand.hbm [shape: bf16[768,768], index: 3, kind: input, shape index: {}]   ;;  %s10168_s4 = inlined_call_operand.hbm [shape: f32[1,768], index: 4, kind: input, shape index: {}]   ;;  %s10169_s5 = inlined_call_operand.hbm [shape: bf16[768,768], index: 5, kind: input, shape index: {}]   ;;  %s10170_s6 = inlined_call_operand.hbm [shape: f32[1,768], index: 6, kind: input, shape index: {}]   ;;  %s10171_s7 = inlined_call_operand.hbm [shape: bf16[768,128], index: 7, kind: input, shape index: {}]   ;;  %s10172_s8 = inlined_call_operand.hbm [shape: f32[1,128], index: 8, kind: input, shape index: {}]   ;;  %s10173_s9 = inlined_call_operand.vmem [shape: bf16[16,128], index: 9, kind: output, shape index: {}]  }
   0x1   :  { %15 = vsyncpa [#allocation5], 0 }
   0x2   :  { %16 = vsyncpa [#allocation8], 0 }
   0x3   :  { %17 = vsyncpa [#allocation11], 0 }
   0x4   :  { %18 = vsyncpa [#allocation14], 0  ;;  %s9862_s30 = smov [#allocation4]   ;;  %s9863_s11 = smov [#allocation7]  }
   0x5   :  { %s39_s10 = sshll.u32 %s9862_s30, 4  ;;  %s61_s12 = sshll.u32 %s9863_s11, 4  ;;  %s40_s10 = int_to_ptr.vmem [resolvable:$true] %s39_s10  ;;  %s62_s12 = int_to_ptr.vmem [resolvable:$true] %s61_s12 }
   0x6   :  { %s9700_s13 = scalar_lea.vmem %s40_s10, 96  ;;  %p9705_p1 = scmp.lt.s32.totalorder %s40_s10, %s40_s10 }
   0x7   :  { %p9701_p0 = scmp.ne.s32.totalorder %s40_s10, %s9700_s13  ;;  %p9706_p2 = scmp.lt.s32.totalorder %s9700_s13, %s9700_s13 }
   0x9   :  { %p9707_p3 = por %p9706_p2, %p9705_p1 }
   0xb   :  { %p9708_p4 = pnand %p9707_p3, %p9701_p0 }
   0xd   :  { %9711 = shalt.err (!%p9708_p4)
}
   0xe   :  { %42 = dma.hbm_to_vmem [thread:$0]  %s10166_s2, 96, %s40_s10, [#allocation5]  }
   0xf   :  { %s9720_s16 = scalar_lea.vmem %s62_s12, 96  ;;  %p9725_p6 = scmp.lt.s32.totalorder %s62_s12, %s62_s12 }
  0x10   :  { %p9721_p5 = scmp.ne.s32.totalorder %s62_s12, %s9720_s16  ;;  %p9726_p7 = scmp.lt.s32.totalorder %s9720_s16, %s9720_s16 }
  0x12   :  { %p9727_p8 = por %p9726_p7, %p9725_p6 }
  0x14   :  { %p9728_p9 = pnand %p9727_p8, %p9721_p5 }
  0x16   :  { %9731 = shalt.err (!%p9728_p9)
}
  0x17   :  { %64 = dma.hbm_to_vmem [thread:$0]  %s10168_s4, 96, %s62_s12, [#allocation8]  }
  0x18   :  { %s9864_s19 = smov [#allocation10]   ;;  %s9865_s21 = smov [#allocation2]  }
  0x19   :  { %s83_s20 = sshll.u32 %s9864_s19, 4  ;;  %s26_s22 = sshll.u32 %s9865_s21, 4  ;;  %s84_s20 = int_to_ptr.vmem [resolvable:$true] %s83_s20  ;;  %s27_s22 = int_to_ptr.vmem [resolvable:$true] %s26_s22 }
  0x1a   :  { %s9740_s23 = scalar_lea.vmem %s84_s20, 96  ;;  %p9745_p11 = scmp.lt.s32.totalorder %s84_s20, %s84_s20 }
  0x1b   :  { %p9741_p10 = scmp.ne.s32.totalorder %s84_s20, %s9740_s23  ;;  %p9746_p12 = scmp.lt.s32.totalorder %s9740_s23, %s9740_s23 }
  0x1d   :  { %p9747_p13 = por %p9746_p12, %p9745_p11 }
  0x1f   :  { %p9748_p0 = pnand %p9747_p13, %p9741_p10 }
  0x21   :  { %9751 = shalt.err (!%p9748_p0)
}
  0x22   :  { %86 = dma.hbm_to_vmem [thread:$0]  %s10170_s6, 96, %s84_s20, [#allocation11]  }
  0x23   :  { %s9760_s25 = scalar_lea.vmem %s27_s22, 37632  ;;  %p9765_p2 = scmp.lt.s32.totalorder %s27_s22, %s27_s22 }
  0x24   :  { %p9761_p1 = scmp.ne.s32.totalorder %s27_s22, %s9760_s25  ;;  %p9766_p3 = scmp.lt.s32.totalorder %s9760_s25, %s9760_s25 }
  0x26   :  { %p9767_p4 = por %p9766_p3, %p9765_p2 }
  0x28   :  { %p9768_p5 = pnand %p9767_p4, %p9761_p1 }
  0x2a   :  { %9771 = shalt.err (!%p9768_p5)
}
  0x2b   :  { %s9866_s4 = smov 384   ;;  %s9867_s26 = smov 24  }
  0x2c   :  { %32 = dma.hbm_to_vmem [thread:$0]  %s10165_s1, 37632, %s27_s22, [#allocation3], %s9866_s4, %s9866_s4, %s9867_s26  }
  0x2d   :  { %s9868_s29 = smov [#allocation6]   ;;  %s9869_s10 = smov [#allocation9]  }
  0x2e   :  { %s48_s30 = sshll.u32 %s9868_s29, 4  ;;  %s70_s11 = sshll.u32 %s9869_s10, 4  ;;  %s49_s30 = int_to_ptr.vmem [resolvable:$true] %s48_s30  ;;  %s71_s11 = int_to_ptr.vmem [resolvable:$true] %s70_s11 }
  0x2f   :  { %s9780_s6 = scalar_lea.vmem %s49_s30, 36864  ;;  %p9785_p7 = scmp.lt.s32.totalorder %s49_s30, %s49_s30 }
  0x30   :  { %p9781_p6 = scmp.ne.s32.totalorder %s49_s30, %s9780_s6  ;;  %p9786_p8 = scmp.lt.s32.totalorder %s9780_s6, %s9780_s6 }
  0x32   :  { %p9787_p9 = por %p9786_p8, %p9785_p7 }
  0x34   :  { %p9788_p10 = pnand %p9787_p9, %p9781_p6 }
  0x36   :  { %9791 = shalt.err (!%p9788_p10)
}
  0x37   :  { %54 = dma.hbm_to_vmem [thread:$0]  %s10167_s3, 36864, %s49_s30, [#allocation5], %s9866_s4, %s9866_s4, %s9867_s26  }
  0x38   :  { %s9800_s14 = scalar_lea.vmem %s71_s11, 36864  ;;  %p9805_p12 = scmp.lt.s32.totalorder %s71_s11, %s71_s11 }
  0x39   :  { %p9801_p11 = scmp.ne.s32.totalorder %s71_s11, %s9800_s14  ;;  %p9806_p13 = scmp.lt.s32.totalorder %s9800_s14, %s9800_s14 }
  0x3b   :  { %p9807_p0 = por %p9806_p13, %p9805_p12 }
  0x3d   :  { %p9808_p1 = pnand %p9807_p0, %p9801_p11 }
  0x3f   :  { %9811 = shalt.err (!%p9808_p1)
}
  0x40   :  { %76 = dma.hbm_to_vmem [thread:$0]  %s10169_s5, 36864, %s71_s11, [#allocation8], %s9866_s4, %s9866_s4, %s9867_s26  }
  0x41   :  { %s9870_s16 = smov [#allocation12]  }
  0x42   :  { %s92_s17 = sshll.u32 %s9870_s16, 4  ;;  %s93_s17 = int_to_ptr.vmem [resolvable:$true] %s92_s17 }
  0x43   :  { %s9820_s18 = scalar_lea.vmem %s93_s17, 6144  ;;  %p9825_p3 = scmp.lt.s32.totalorder %s93_s17, %s93_s17 }
  0x44   :  { %p9821_p2 = scmp.ne.s32.totalorder %s93_s17, %s9820_s18  ;;  %p9826_p4 = scmp.lt.s32.totalorder %s9820_s18, %s9820_s18 }
  0x46   :  { %p9827_p5 = por %p9826_p4, %p9825_p3 }
  0x48   :  { %p9828_p6 = pnand %p9827_p5, %p9821_p2 }
  0x4a   :  { %9831 = shalt.err (!%p9828_p6)
}
  0x4b   :  { %s9871_s3 = smov 64   ;;  %s9872_s19 = smov 4  }
  0x4c   :  { %98 = dma.hbm_to_vmem [thread:$0]  %s10171_s7, 6144, %s93_s17, [#allocation11], %s9871_s3, %s9871_s3, %s9872_s19  }
  0x4d   :  { %s9873_s22 = smov [#allocation13]  }
  0x4e   :  { %s105_s23 = sshll.u32 %s9873_s22, 4  ;;  %s106_s23 = int_to_ptr.vmem [resolvable:$true] %s105_s23 }
  0x4f   :  { %s9840_s5 = scalar_lea.vmem %s106_s23, 16  ;;  %s9844_s2 = scalar_lea.vmem %s106_s23, 32 }
  0x50   :  { %p9841_p7 = scmp.ne.s32.totalorder %s106_s23, %s9840_s5  ;;  %p9845_p8 = scmp.lt.s32.totalorder %s106_s23, %s106_s23 }
  0x51   :  { %p9846_p9 = scmp.lt.s32.totalorder %s9844_s2, %s9840_s5 }
  0x53   :  { %p9847_p10 = por %p9846_p9, %p9845_p8 }
  0x55   :  { %p9848_p11 = pnand %p9847_p10, %p9841_p7 }
  0x57   :  { %9851 = shalt.err (!%p9848_p11)
}
  0x58   :  { %108 = dma.hbm_to_vmem [thread:$0]  %s10172_s8, 16, %s106_s23, [#allocation14]  }
  0x59   :  { %9852 = dma.done.wait [#allocation3], 37632  }
  0x5a   :  { %9853 = vsyncadd [#allocation3], 4294929664 }
  0x5b   :  { %9854 = dma.done.wait [#allocation5], 36960  }
  0x5c   :  { %9855 = vsyncadd [#allocation5], 4294930336 }
  0x5d   :  { %9856 = dma.done.wait [#allocation8], 36960  }
  0x5e   :  { %9857 = vsyncadd [#allocation8], 4294930336 }
  0x5f   :  { %9858 = dma.done.wait [#allocation11], 6240  }
  0x60   :  { %9859 = vsyncadd [#allocation11], 4294961056 }
  0x61   :  { %9860 = dma.done.wait [#allocation14], 16  }
  0x62   :  { %9861 = vsyncadd [#allocation14], 4294967280  ;;  %v8338_v0 = vld [vmem:[#allocation2 + $0x154] ss:$24 sps:$4 sm:$0xff]   ;;  %v8342_v2 = vld [vmem:[#allocation2 + $0x150] ss:$24 sps:$4 sm:$0xff]  }
  0x63   :  { %v8340_v1 = vld [vmem:[#allocation2 + $0x454] ss:$24 sps:$4 sm:$0xff]   ;;  %1955 = vmatprep.subr.bf16.mxu0 %v8338_v0  ;;  %v8343_v3 = vld [vmem:[#allocation2 + $0x450] ss:$24 sps:$4 sm:$0xff]   ;;  %v8344_v4 = vld [vmem:[#allocation2 + $0x124] ss:$24 sps:$4 sm:$0xff]  }
  0x64   :  { %1998 = vmatprep.subr.bf16.mxu1 %v8340_v1  ;;  %1956 = vmatpush1.bf16.msra.mxu0 %v8342_v2  ;;  %v8346_v5 = vld [vmem:[#allocation2 + $0x424] ss:$24 sps:$4 sm:$0xff]   ;;  %v8348_v6 = vld [vmem:[#allocation2 + $0x120] ss:$24 sps:$4 sm:$0xff]   ;;  %v8350_v8 = vld [vmem:[#allocation2 + $0xf4] ss:$24 sps:$4 sm:$0xff]  }
  0x65   :  { %1999 = vmatpush1.bf16.msra.mxu1 %v8343_v3  ;;  %1957 = vmatprep.subr.bf16.mxu0 %v8344_v4  ;;  %v8349_v7 = vld [vmem:[#allocation2 + $0x420] ss:$24 sps:$4 sm:$0xff]   ;;  %v8352_v9 = vld [vmem:[#allocation2 + $0x3f4] ss:$24 sps:$4 sm:$0xff]   ;;  %v8354_v10 = vld [vmem:[#allocation2 + $0xf0] ss:$24 sps:$4 sm:$0xff]  }
  0x66   :  { %2000 = vmatprep.subr.bf16.mxu1 %v8346_v5  ;;  %v8355_v11 = vld [vmem:[#allocation2 + $0x3f0] ss:$24 sps:$4 sm:$0xff]   ;;  %v8356_v12 = vld [vmem:[#allocation2 + $0xc4] ss:$24 sps:$4 sm:$0xff]   ;;  %v8360_v14 = vld [vmem:[#allocation2 + $0xc0] ss:$24 sps:$4 sm:$0xff]  }
  0x67   :  { %v8358_v13 = vld [vmem:[#allocation2 + $0x3c4] ss:$24 sps:$4 sm:$0xff]   ;;  %v8361_v15 = vld [vmem:[#allocation2 + $0x3c0] ss:$24 sps:$4 sm:$0xff]   ;;  %v8362_v16 = vld [vmem:[#allocation2 + $0x94] ss:$24 sps:$4 sm:$0xff]  }
  0x68   :  { %1958 = vmatpush1.bf16.msra.mxu0 %v8348_v6  ;;  %v8364_v17 = vld [vmem:[#allocation2 + $0x394] ss:$24 sps:$4 sm:$0xff]   ;;  %v8366_v18 = vld [vmem:[#allocation2 + $0x90] ss:$24 sps:$4 sm:$0xff]   ;;  %v8368_v20 = vld [vmem:[#allocation2 + $0x64] ss:$24 sps:$4 sm:$0xff]  }
  0x69   :  { %2001 = vmatpush1.bf16.msra.mxu1 %v8349_v7  ;;  %1959 = vmatprep.subr.bf16.mxu0 %v8350_v8  ;;  %v8367_v19 = vld [vmem:[#allocation2 + $0x390] ss:$24 sps:$4 sm:$0xff]   ;;  %v8370_v21 = vld [vmem:[#allocation2 + $0x364] ss:$24 sps:$4 sm:$0xff]   ;;  %v8372_v22 = vld [vmem:[#allocation2 + $0x60] ss:$24 sps:$4 sm:$0xff]  }
  0x6a   :  { %2002 = vmatprep.subr.bf16.mxu1 %v8352_v9  ;;  %v8373_v23 = vld [vmem:[#allocation2 + $0x360] ss:$24 sps:$4 sm:$0xff]   ;;  %v8374_v24 = vld [vmem:[#allocation2 + $0x34] ss:$24 sps:$4 sm:$0xff]   ;;  %v8378_v26 = vld [vmem:[#allocation2 + $0x30] ss:$24 sps:$4 sm:$0xff]  }
  0x6b   :  { %v8376_v25 = vld [vmem:[#allocation2 + $0x334] ss:$24 sps:$4 sm:$0xff]   ;;  %v8379_v27 = vld [vmem:[#allocation2 + $0x330] ss:$24 sps:$4 sm:$0xff]   ;;  %v8380_v28 = vld [vmem:[#allocation2 + $0x4] ss:$24 sps:$4 sm:$0xff]  }
  0x6c   :  { %1960 = vmatpush1.bf16.msra.mxu0 %v8354_v10  ;;  %v8382_v29 = vld [vmem:[#allocation2 + $0x304] ss:$24 sps:$4 sm:$0xff]   ;;  %v8384_v30 = vld [vmem:[#allocation2] ss:$24 sps:$4 sm:$0xff]   ;;  %v8386_v32 = vld [vmem:[#allocation2 + $0x2d4] ss:$24 sps:$4 sm:$0xff]  }
  0x6d   :  { %2003 = vmatpush1.bf16.msra.mxu1 %v8355_v11  ;;  %1961 = vmatprep.subr.bf16.mxu0 %v8356_v12  ;;  %v8385_v31 = vld [vmem:[#allocation2 + $0x300] ss:$24 sps:$4 sm:$0xff]   ;;  %v8388_v33 = vld [vmem:[#allocation2 + $0x5d4] ss:$24 sps:$4 sm:$0xff]   ;;  %v8390_v34 = vld [vmem:[#allocation2 + $0x2d0] ss:$24 sps:$4 sm:$0xff]  }
  0x6e   :  { %2004 = vmatprep.subr.bf16.mxu1 %v8358_v13  ;;  %v8391_v35 = vld [vmem:[#allocation2 + $0x5d0] ss:$24 sps:$4 sm:$0xff]   ;;  %v8392_v36 = vld [vmem:[#allocation2 + $0x2a4] ss:$24 sps:$4 sm:$0xff]   ;;  %v8396_v38 = vld [vmem:[#allocation2 + $0x2a0] ss:$24 sps:$4 sm:$0xff]  }
  0x6f   :  { %v8394_v37 = vld [vmem:[#allocation2 + $0x5a4] ss:$24 sps:$4 sm:$0xff]   ;;  %v8397_v39 = vld [vmem:[#allocation2 + $0x5a0] ss:$24 sps:$4 sm:$0xff]   ;;  %v8398_v40 = vld [vmem:[#allocation2 + $0x274] ss:$24 sps:$4 sm:$0xff]  }
  0x70   :  { %1962 = vmatpush1.bf16.msra.mxu0 %v8360_v14  ;;  %v8400_v41 = vld [vmem:[#allocation2 + $0x574] ss:$24 sps:$4 sm:$0xff]   ;;  %v8402_v42 = vld [vmem:[#allocation2 + $0x270] ss:$24 sps:$4 sm:$0xff]   ;;  %v8404_v44 = vld [vmem:[#allocation2 + $0x244] ss:$24 sps:$4 sm:$0xff]  }
  0x71   :  { %2005 = vmatpush1.bf16.msra.mxu1 %v8361_v15  ;;  %1963 = vmatprep.subr.bf16.mxu0 %v8362_v16  ;;  %v8403_v43 = vld [vmem:[#allocation2 + $0x570] ss:$24 sps:$4 sm:$0xff]   ;;  %v8406_v45 = vld [vmem:[#allocation2 + $0x544] ss:$24 sps:$4 sm:$0xff]   ;;  %v8408_v50 = vld [vmem:[#allocation2 + $0x240] ss:$24 sps:$4 sm:$0xff]  }
  0x72   :  { %2006 = vmatprep.subr.bf16.mxu1 %v8364_v17  ;;  %v135_v46 = vld [vmem:[%s10164_s0 + $0x8] sm:$0xff]  ;;  %v142_v47 = vld [vmem:[%s10164_s0 + $0x40] sm:$0xff]  ;;  %v137_v48 = vld [vmem:[%s10164_s0 + $0x18] sm:$0xff]  ;;  %vm1951_vm0 = vcmask 130048  }
  0x73   :  { %v144_v49 = vld [vmem:[%s10164_s0 + $0x50] sm:$0xff]  ;;  %v8409_v51 = vld [vmem:[#allocation2 + $0x540] ss:$24 sps:$4 sm:$0xff]   ;;  %v9961_v53 = vpack.c.bf16 %v142_v47, %v135_v46  ;;  %v8416_v58 = vld [vmem:[#allocation2 + $0x1e4] ss:$24 sps:$4 sm:$0xff]  }
  0x74   :  { %1964 = vmatpush1.bf16.msra.mxu0 %v8366_v18  ;;  %v8410_v52 = vld [vmem:[#allocation2 + $0x214] ss:$24 sps:$4 sm:$0xff]   ;;  %v9963_v54 = vpack.c.bf16 %v144_v49, %v137_v48  ;;  %v8414_v56 = vld [vmem:[#allocation2 + $0x210] ss:$24 sps:$4 sm:$0xff]   ;;  %v8418_v59 = vld [vmem:[#allocation2 + $0x4e4] ss:$24 sps:$4 sm:$0xff]  }
  0x75   :  { %2007 = vmatpush1.bf16.msra.mxu1 %v8367_v19  ;;  %1965 = vmatprep.subr.bf16.mxu0 %v8368_v20  ;;  %v8412_v55 = vld [vmem:[#allocation2 + $0x514] ss:$24 sps:$4 sm:$0xff]   ;;  %v8415_v57 = vld [vmem:[#allocation2 + $0x510] ss:$24 sps:$4 sm:$0xff]   ;;  %v8420_v60 = vld [vmem:[#allocation2 + $0x1e0] ss:$24 sps:$4 sm:$0xff]  }
  0x76   :  { %2008 = vmatprep.subr.bf16.mxu1 %v8370_v21  ;;  %1987 = vmatprep.mubr.bf16.mxu0 %v9961_v53  ;;  %v8421_v61 = vld [vmem:[#allocation2 + $0x4e0] ss:$24 sps:$4 sm:$0xff]   ;;  %v8422_v62 = vld [vmem:[#allocation2 + $0x1b4] ss:$24 sps:$4 sm:$0xff]   ;;  %v8426_v0 = vld [vmem:[#allocation2 + $0x1b0] ss:$24 sps:$4 sm:$0xff]  }
  0x77   :  { %2030 = vmatprep.mubr.bf16.mxu1 %v9963_v54  ;;  %v8424_v63 = vld [vmem:[#allocation2 + $0x4b4] ss:$24 sps:$4 sm:$0xff]   ;;  %v8427_v1 = vld [vmem:[#allocation2 + $0x4b0] ss:$24 sps:$4 sm:$0xff]   ;;  %v8428_v2 = vld [vmem:[#allocation2 + $0x184] ss:$24 sps:$4 sm:$0xff]  }
  0x78   :  { %1966 = vmatpush1.bf16.msra.mxu0 %v8372_v22  ;;  %v8430_v3 = vld [vmem:[#allocation2 + $0x484] ss:$24 sps:$4 sm:$0xff]   ;;  %v8432_v4 = vld [vmem:[#allocation2 + $0x180] ss:$24 sps:$4 sm:$0xff]   ;;  %v136_v8 = vld [vmem:[%s10164_s0 + $0x10] sm:$0xff]  ;;  %v9874_v21 = vmov 0  }
  0x79   :  { %2009 = vmatpush1.bf16.msra.mxu1 %v8373_v23  ;;  %1967 = vmatprep.subr.bf16.mxu0 %v8374_v24  ;;  %v8433_v5 = vld [vmem:[#allocation2 + $0x480] ss:$24 sps:$4 sm:$0xff]   ;;  %v143_v9 = vld [vmem:[%s10164_s0 + $0x48] sm:$0xff]  ;;  %v8439_v11 = vld [vmem:[#allocation2 + $0x904] ss:$24 sps:$4 sm:$0xff]  }
  0x7a   :  { %2010 = vmatprep.subr.bf16.mxu1 %v8376_v25  ;;  %v134_v6 = vld [vmem:[%s10164_s0] sm:$0xff]  ;;  %v141_v7 = vld [vmem:[%s10164_s0 + $0x38] sm:$0xff]  ;;  %v8436_v10 = vld [vmem:[#allocation2 + $0x754] ss:$24 sps:$4 sm:$0xff]   ;;  %v9981_v13 = vpack.c.bf16 %v143_v9, %v136_v8 }
  0x7b   :  { %v9979_v12 = vpack.c.bf16 %v141_v7, %v134_v6  ;;  %v8434_v14 = vld [vmem:[#allocation2 + $0x750] ss:$24 sps:$4 sm:$0xff]   ;;  %v8437_v15 = vld [vmem:[#allocation2 + $0x900] ss:$24 sps:$4 sm:$0xff]   ;;  %v8442_v16 = vld [vmem:[#allocation2 + $0x724] ss:$24 sps:$4 sm:$0xff]  }
  0x7c   :  { %1968 = vmatpush1.bf16.msra.mxu0 %v8378_v26  ;;  %v8445_v17 = vld [vmem:[#allocation2 + $0x15c] ss:$24 sps:$4 sm:$0xff]   ;;  %v8440_v18 = vld [vmem:[#allocation2 + $0x720] ss:$24 sps:$4 sm:$0xff]   ;;  %v147_v20 = vld [vmem:[%s10164_s0 + $0x68] sm:$0xff] }
  0x7d   :  { %2011 = vmatpush1.bf16.msra.mxu1 %v8379_v27  ;;  %1969 = vmatprep.subr.bf16.mxu0 %v8380_v28  ;;  %v140_v19 = vld [vmem:[%s10164_s0 + $0x30] sm:$0xff]  ;;  %v8451_v26 = vld [vmem:[#allocation2 + $0x12c] ss:$24 sps:$4 sm:$0xff]   ;;  %v8449_v28 = vld [vmem:[#allocation2 + $0x128] ss:$24 sps:$4 sm:$0xff]  }
  0x7e   :  { %2012 = vmatprep.subr.bf16.mxu1 %v8382_v29  ;;  %v8448_v22 = vld [vmem:[#allocation2 + $0x6f4] ss:$24 sps:$4 sm:$0xff]   ;;  %v9992_v23 = vpack.c.bf16 %v147_v20, %v140_v19  ;;  %v8443_v24 = vld [vmem:[#allocation2 + $0x158] ss:$24 sps:$4 sm:$0xff]   ;;  %v8454_v27 = vld [vmem:[#allocation2 + $0x6c4] ss:$24 sps:$4 sm:$0xff]  }
  0x7f   :  { %v8446_v25 = vld [vmem:[#allocation2 + $0x6f0] ss:$24 sps:$4 sm:$0xff]   ;;  %v8452_v29 = vld [vmem:[#allocation2 + $0x6c0] ss:$24 sps:$4 sm:$0xff]   ;;  %v8478_v46 = vld [vmem:[#allocation2 + $0x604] ss:$24 sps:$4 sm:$0xff]  }
  0x80   :  { %1970 = vmatpush1.bf16.msra.mxu0 %v8384_v30  ;;  %v8457_v30 = vld [vmem:[#allocation2 + $0xfc] ss:$24 sps:$4 sm:$0xff]   ;;  %v8473_v47 = vld [vmem:[#allocation2 + $0x68] ss:$24 sps:$4 sm:$0xff]   ;;  %v8511_v7 = vld [vmem:[#allocation2 + $0x24c] ss:$24 sps:$4 sm:$0xff]  }
  0x81   :  { %2013 = vmatpush1.bf16.msra.mxu1 %v8385_v31  ;;  %1971 = vmatprep.subr.bf16.mxu0 %v8386_v32  ;;  %v8460_v31 = vld [vmem:[#allocation2 + $0x694] ss:$24 sps:$4 sm:$0xff]   ;;  %v8455_v32 = vld [vmem:[#allocation2 + $0xf8] ss:$24 sps:$4 sm:$0xff]   ;;  %v8514_v8 = vld [vmem:[#allocation2 + $0x7e4] ss:$24 sps:$4 sm:$0xff]  }
  0x82   :  { %2014 = vmatprep.subr.bf16.mxu1 %v8388_v33  ;;  %v8458_v33 = vld [vmem:[#allocation2 + $0x690] ss:$24 sps:$4 sm:$0xff]   ;;  %v8476_v48 = vld [vmem:[#allocation2 + $0x600] ss:$24 sps:$4 sm:$0xff]   ;;  %v8481_v49 = vld [vmem:[#allocation2 + $0x3c] ss:$24 sps:$4 sm:$0xff]  }
  0x83   :  { %v8506_v6 = vld [vmem:[#allocation2 + $0x810] ss:$24 sps:$4 sm:$0xff]   ;;  %v8524_v20 = vld [vmem:[#allocation2 + $0x780] ss:$24 sps:$4 sm:$0xff]  }
  0x84   :  { %1972 = vmatpush2.bf16.msra.mxu0 %v8390_v34  ;;  %v8463_v34 = vld [vmem:[#allocation2 + $0xcc] ss:$24 sps:$4 sm:$0xff]   ;;  %v8509_v9 = vld [vmem:[#allocation2 + $0x248] ss:$24 sps:$4 sm:$0xff]  }
  0x85   :  { %2015 = vmatpush2.bf16.msra.mxu1 %v8391_v35  ;;  %1973 = vmatprep.subr.bf16.mxu0 %v8392_v36  ;;  %v8466_v35 = vld [vmem:[#allocation2 + $0x664] ss:$24 sps:$4 sm:$0xff]   ;;  %v8461_v36 = vld [vmem:[#allocation2 + $0xc8] ss:$24 sps:$4 sm:$0xff]  }
  0x86   :  { %2016 = vmatprep.subr.bf16.mxu1 %v8394_v37  ;;  %v8464_v37 = vld [vmem:[#allocation2 + $0x660] ss:$24 sps:$4 sm:$0xff]  }
  0x87   :  { %v8521_v19 = vld [vmem:[#allocation2 + $0x1e8] ss:$24 sps:$4 sm:$0xff]  }
  0x88   :  { %1974 = vmatpush2.bf16.msra.mxu0 %v8396_v38  ;;  %v8469_v38 = vld [vmem:[#allocation2 + $0x9c] ss:$24 sps:$4 sm:$0xff]  }
  0x89   :  { %2017 = vmatpush2.bf16.msra.mxu1 %v8397_v39  ;;  %1975 = vmatprep.subr.bf16.mxu0 %v8398_v40  ;;  %v8472_v39 = vld [vmem:[#allocation2 + $0x634] ss:$24 sps:$4 sm:$0xff]   ;;  %v8467_v40 = vld [vmem:[#allocation2 + $0x98] ss:$24 sps:$4 sm:$0xff]  }
  0x8a   :  { %2018 = vmatprep.subr.bf16.mxu1 %v8400_v41  ;;  %v139_v41 = vld [vmem:[%s10164_s0 + $0x28] sm:$0xff] }
  0x8c   :  { %1976 = vmatpush2.bf16.msra.mxu0 %v8402_v42  ;;  %v146_v42 = vld [vmem:[%s10164_s0 + $0x60] sm:$0xff] }
  0x8d   :  { %2019 = vmatpush2.bf16.msra.mxu1 %v8403_v43  ;;  %1977 = vmatprep.subr.bf16.mxu0 %v8404_v44  ;;  %v8470_v43 = vld [vmem:[#allocation2 + $0x630] ss:$24 sps:$4 sm:$0xff]   ;;  %v10003_v44 = vpack.c.bf16 %v146_v42, %v139_v41  ;;  %v8553_v42 = vld [vmem:[#allocation2 + $0x6fc] ss:$24 sps:$4 sm:$0xff]  }
  0x8e   :  { %2020 = vmatprep.subr.bf16.mxu1 %v8406_v45  ;;  %v8475_v45 = vld [vmem:[#allocation2 + $0x6c] ss:$24 sps:$4 sm:$0xff]   ;;  %v8548_v41 = vld [vmem:[#allocation2 + $0x3c8] ss:$24 sps:$4 sm:$0xff]  }
  0x90   :  { %1978 = vmatpush2.bf16.msra.mxu0 %v8408_v50  ;;  %v8484_v50 = vld [vmem:[#allocation2 + $0x8d4] ss:$24 sps:$4 sm:$0xff]  }
  0x91   :  { %2021 = vmatpush2.bf16.msra.mxu1 %v8409_v51  ;;  %1979 = vmatprep.subr.bf16.mxu0 %v8410_v52  ;;  %v8479_v51 = vld [vmem:[#allocation2 + $0x38] ss:$24 sps:$4 sm:$0xff]  }
  0x92   :  { %2022 = vmatprep.subr.bf16.mxu1 %v8412_v55  ;;  %v8482_v52 = vld [vmem:[#allocation2 + $0x8d0] ss:$24 sps:$4 sm:$0xff]   ;;  %v8487_v55 = vld [vmem:[#allocation2 + $0xc] ss:$24 sps:$4 sm:$0xff]  }
  0x94   :  { %1980 = vmatpush2.bf16.msra.mxu0 %v8414_v56  ;;  %v8490_v56 = vld [vmem:[#allocation2 + $0x8a4] ss:$24 sps:$4 sm:$0xff]  }
  0x95   :  { %2023 = vmatpush2.bf16.msra.mxu1 %v8415_v57  ;;  %1981 = vmatprep.subr.bf16.mxu0 %v8416_v58  ;;  %v8485_v57 = vld [vmem:[#allocation2 + $0x8] ss:$24 sps:$4 sm:$0xff]  }
  0x96   :  { %2024 = vmatprep.subr.bf16.mxu1 %v8418_v59  ;;  %v8488_v58 = vld [vmem:[#allocation2 + $0x8a0] ss:$24 sps:$4 sm:$0xff]   ;;  %v8493_v59 = vld [vmem:[#allocation2 + $0x2dc] ss:$24 sps:$4 sm:$0xff]  }
  0x98   :  { %1982 = vmatpush2.bf16.msra.mxu0 %v8420_v60  ;;  %v8496_v60 = vld [vmem:[#allocation2 + $0x874] ss:$24 sps:$4 sm:$0xff]  }
  0x99   :  { %2025 = vmatpush2.bf16.msra.mxu1 %v8421_v61  ;;  %1983 = vmatprep.subr.bf16.mxu0 %v8422_v62  ;;  %v8491_v61 = vld [vmem:[#allocation2 + $0x2d8] ss:$24 sps:$4 sm:$0xff]  }
  0x9a   :  { %2026 = vmatprep.subr.bf16.mxu1 %v8424_v63  ;;  %v8494_v62 = vld [vmem:[#allocation2 + $0x870] ss:$24 sps:$4 sm:$0xff]   ;;  %v8499_v63 = vld [vmem:[#allocation2 + $0x2ac] ss:$24 sps:$4 sm:$0xff]  }
  0x9c   :  { %1984 = vmatpush2.bf16.msra.mxu0 %v8426_v0  ;;  %v8502_v0 = vld [vmem:[#allocation2 + $0x844] ss:$24 sps:$4 sm:$0xff]  }
  0x9d   :  { %2027 = vmatpush2.bf16.msra.mxu1 %v8427_v1  ;;  %1985 = vmatprep.subr.bf16.mxu0 %v8428_v2  ;;  %v8497_v1 = vld [vmem:[#allocation2 + $0x2a8] ss:$24 sps:$4 sm:$0xff]  }
  0x9e   :  { %2028 = vmatprep.subr.bf16.mxu1 %v8430_v3  ;;  %v8500_v2 = vld [vmem:[#allocation2 + $0x840] ss:$24 sps:$4 sm:$0xff]   ;;  %v8505_v3 = vld [vmem:[#allocation2 + $0x27c] ss:$24 sps:$4 sm:$0xff]  }
  0xa0   :  { %1986 = vmatpush2.bf16.msra.mxu0 %v8432_v4  ;;  %v8508_v4 = vld [vmem:[#allocation2 + $0x814] ss:$24 sps:$4 sm:$0xff]  }
  0xa1   :  { %2029 = vmatpush2.bf16.msra.mxu1 %v8433_v5  ;;  %2041 = vmatprep.subr.bf16.mxu0 %v8436_v10  ;;  %v8503_v5 = vld [vmem:[#allocation2 + $0x278] ss:$24 sps:$4 sm:$0xff]  }
  0xa2   :  { %2098 = vmatprep.subr.bf16.mxu1 %v8439_v11  ;;  %v8512_v10 = vld [vmem:[#allocation2 + $0x7e0] ss:$24 sps:$4 sm:$0xff]   ;;  %v8517_v11 = vld [vmem:[#allocation2 + $0x21c] ss:$24 sps:$4 sm:$0xff]  }
  0xa3   :  { %1988 = vmatmul.mubr.bf16.vlgmr.msra.gmra.mxu0 %v9979_v12 }
  0xa4   :  { %2031 = vmatmul.mubr.bf16.vlgmr.msra.gmra.mxu1 %v9981_v13  ;;  %2042 = vmatpush1.bf16.msra.mxu0 %v8434_v14  ;;  %v8520_v14 = vld [vmem:[#allocation2 + $0x7b4] ss:$24 sps:$4 sm:$0xff]  }
  0xa5   :  { %2099 = vmatpush1.bf16.msra.mxu1 %v8437_v15  ;;  %2043 = vmatprep.subr.bf16.mxu0 %v8442_v16  ;;  %v8515_v15 = vld [vmem:[#allocation2 + $0x218] ss:$24 sps:$4 sm:$0xff]  }
  0xa6   :  { %2116 = vmatprep.mubr.bf16.mxu1 %v9874_v21  ;;  %2127 = vmatprep.subr.bf16.mxu1 %v8445_v17  ;;  %v8518_v16 = vld [vmem:[#allocation2 + $0x7b0] ss:$24 sps:$4 sm:$0xff]   ;;  %v8523_v17 = vld [vmem:[#allocation2 + $0x1ec] ss:$24 sps:$4 sm:$0xff]  }
  0xa7   :  { %2073 = vmatprep.mubr.bf16.mxu0 %v10003_v44 }
  0xa8   :  { %2044 = vmatpush1.bf16.msra.mxu0 %v8440_v18  ;;  %v8526_v18 = vld [vmem:[#allocation2 + $0x784] ss:$24 sps:$4 sm:$0xff]  }
  0xa9   :  { %2045 = vmatprep.subr.bf16.mxu0 %v8448_v22  ;;  %v138_v22 = vld [vmem:[%s10164_s0 + $0x20] sm:$0xff] }
  0xac   :  { %7622 = vmatmul.mubr.msk.bf16.vlgmr.msra.gmra.mxu1 %vm1951_vm0, %v9992_v23  ;;  %2046 = vmatpush1.bf16.msra.mxu0 %v8446_v25  ;;  %v8529_v25 = vld [vmem:[#allocation2 + $0x1bc] ss:$24 sps:$4 sm:$0xff]  }
  0xad   :  { %2128 = vmatpush1.bf16.msra.mxu1 %v8443_v24  ;;  %2047 = vmatprep.subr.bf16.mxu0 %v8454_v27  ;;  %v145_v24 = vld [vmem:[%s10164_s0 + $0x58] sm:$0xff] }
  0xae   :  { %2129 = vmatprep.subr.bf16.mxu1 %v8451_v26  ;;  %2159 = vmatprep.mubr.bf16.mxu1 %v9961_v53  ;;  %v8532_v26 = vld [vmem:[#allocation2 + $0x45c] ss:$24 sps:$4 sm:$0xff]   ;;  %v10012_v27 = vpack.c.bf16 %v145_v24, %v138_v22  ;;  %v8605_v22 = vld [vmem:[#allocation2 + $0x848] ss:$24 sps:$4 sm:$0xff]  }
  0xaf   :  { %v8608_v24 = vld [vmem:[#allocation2 + $0x4e8] ss:$24 sps:$4 sm:$0xff]  }
  0xb0   :  { %2048 = vmatpush1.bf16.msra.mxu0 %v8452_v29  ;;  %v8530_v29 = vld [vmem:[#allocation2 + $0x458] ss:$24 sps:$4 sm:$0xff]  }
  0xb1   :  { %2130 = vmatpush1.bf16.msra.mxu1 %v8449_v28  ;;  %2049 = vmatprep.subr.bf16.mxu0 %v8460_v31  ;;  %v8527_v28 = vld [vmem:[#allocation2 + $0x1b8] ss:$24 sps:$4 sm:$0xff]   ;;  %v8538_v31 = vld [vmem:[#allocation2 + $0x42c] ss:$24 sps:$4 sm:$0xff]  }
  0xb2   :  { %2131 = vmatprep.subr.bf16.mxu1 %v8457_v30  ;;  %v8535_v30 = vld [vmem:[#allocation2 + $0x18c] ss:$24 sps:$4 sm:$0xff]  }
  0xb4   :  { %2050 = vmatpush1.bf16.msra.mxu0 %v8458_v33  ;;  %v8536_v33 = vld [vmem:[#allocation2 + $0x428] ss:$24 sps:$4 sm:$0xff]  }
  0xb5   :  { %2132 = vmatpush1.bf16.msra.mxu1 %v8455_v32  ;;  %2051 = vmatprep.subr.bf16.mxu0 %v8466_v35  ;;  %v8533_v32 = vld [vmem:[#allocation2 + $0x188] ss:$24 sps:$4 sm:$0xff]   ;;  %v8544_v35 = vld [vmem:[#allocation2 + $0x3fc] ss:$24 sps:$4 sm:$0xff]  }
  0xb6   :  { %2133 = vmatprep.subr.bf16.mxu1 %v8463_v34  ;;  %v8541_v34 = vld [vmem:[#allocation2 + $0x75c] ss:$24 sps:$4 sm:$0xff]  }
  0xb8   :  { %2052 = vmatpush1.bf16.msra.mxu0 %v8464_v37  ;;  %v8542_v37 = vld [vmem:[#allocation2 + $0x3f8] ss:$24 sps:$4 sm:$0xff]  }
  0xb9   :  { %2134 = vmatpush1.bf16.msra.mxu1 %v8461_v36  ;;  %2053 = vmatprep.subr.bf16.mxu0 %v8472_v39  ;;  %v8539_v36 = vld [vmem:[#allocation2 + $0x758] ss:$24 sps:$4 sm:$0xff]   ;;  %v8550_v39 = vld [vmem:[#allocation2 + $0x3cc] ss:$24 sps:$4 sm:$0xff]  }
  0xba   :  { %2135 = vmatprep.subr.bf16.mxu1 %v8469_v38  ;;  %v8547_v38 = vld [vmem:[#allocation2 + $0x72c] ss:$24 sps:$4 sm:$0xff]  }
  0xbc   :  { %2054 = vmatpush1.bf16.msra.mxu0 %v8470_v43  ;;  %v8556_v43 = vld [vmem:[#allocation2 + $0x39c] ss:$24 sps:$4 sm:$0xff]  }
  0xbd   :  { %2136 = vmatpush1.bf16.msra.mxu1 %v8467_v40  ;;  %2055 = vmatprep.subr.bf16.mxu0 %v8478_v46  ;;  %v8545_v40 = vld [vmem:[#allocation2 + $0x728] ss:$24 sps:$4 sm:$0xff]   ;;  %v8554_v46 = vld [vmem:[#allocation2 + $0x398] ss:$24 sps:$4 sm:$0xff]  }
  0xbe   :  { %2137 = vmatprep.subr.bf16.mxu1 %v8475_v45  ;;  %v8551_v45 = vld [vmem:[#allocation2 + $0x6f8] ss:$24 sps:$4 sm:$0xff]  }
  0xc0   :  { %2056 = vmatpush1.bf16.msra.mxu0 %v8476_v48  ;;  %v8562_v48 = vld [vmem:[#allocation2 + $0x36c] ss:$24 sps:$4 sm:$0xff]  }
  0xc1   :  { %2138 = vmatpush1.bf16.msra.mxu1 %v8473_v47  ;;  %2057 = vmatprep.subr.bf16.mxu0 %v8484_v50  ;;  %v8559_v47 = vld [vmem:[#allocation2 + $0x6cc] ss:$24 sps:$4 sm:$0xff]   ;;  %v8560_v50 = vld [vmem:[#allocation2 + $0x368] ss:$24 sps:$4 sm:$0xff]  }
  0xc2   :  { %2139 = vmatprep.subr.bf16.mxu1 %v8481_v49  ;;  %v8557_v49 = vld [vmem:[#allocation2 + $0x6c8] ss:$24 sps:$4 sm:$0xff]  }
  0xc4   :  { %2058 = vmatpush2.bf16.msra.mxu0 %v8482_v52  ;;  %v8568_v52 = vld [vmem:[#allocation2 + $0x33c] ss:$24 sps:$4 sm:$0xff]  }
  0xc5   :  { %2140 = vmatpush1.bf16.msra.mxu1 %v8479_v51  ;;  %2059 = vmatprep.subr.bf16.mxu0 %v8490_v56  ;;  %v8565_v51 = vld [vmem:[#allocation2 + $0x69c] ss:$24 sps:$4 sm:$0xff]   ;;  %v8566_v56 = vld [vmem:[#allocation2 + $0x338] ss:$24 sps:$4 sm:$0xff]  }
  0xc6   :  { %2141 = vmatprep.subr.bf16.mxu1 %v8487_v55  ;;  %v8563_v55 = vld [vmem:[#allocation2 + $0x698] ss:$24 sps:$4 sm:$0xff]  }
  0xc8   :  { %2060 = vmatpush2.bf16.msra.mxu0 %v8488_v58  ;;  %v8574_v58 = vld [vmem:[#allocation2 + $0x30c] ss:$24 sps:$4 sm:$0xff]  }
  0xc9   :  { %2142 = vmatpush1.bf16.msra.mxu1 %v8485_v57  ;;  %2061 = vmatprep.subr.bf16.mxu0 %v8496_v60  ;;  %v8571_v57 = vld [vmem:[#allocation2 + $0x66c] ss:$24 sps:$4 sm:$0xff]   ;;  %v8572_v60 = vld [vmem:[#allocation2 + $0x308] ss:$24 sps:$4 sm:$0xff]  }
  0xca   :  { %2143 = vmatprep.subr.bf16.mxu1 %v8493_v59  ;;  %v8569_v59 = vld [vmem:[#allocation2 + $0x668] ss:$24 sps:$4 sm:$0xff]  }
  0xcc   :  { %2062 = vmatpush2.bf16.msra.mxu0 %v8494_v62  ;;  %v8580_v62 = vld [vmem:[#allocation2 + $0x5dc] ss:$24 sps:$4 sm:$0xff]  }
  0xcd   :  { %2144 = vmatpush2.bf16.msra.mxu1 %v8491_v61  ;;  %2063 = vmatprep.subr.bf16.mxu0 %v8502_v0  ;;  %v8577_v61 = vld [vmem:[#allocation2 + $0x63c] ss:$24 sps:$4 sm:$0xff]   ;;  %v8578_v0 = vld [vmem:[#allocation2 + $0x5d8] ss:$24 sps:$4 sm:$0xff]  }
  0xce   :  { %2145 = vmatprep.subr.bf16.mxu1 %v8499_v63  ;;  %v8575_v63 = vld [vmem:[#allocation2 + $0x638] ss:$24 sps:$4 sm:$0xff]  }
  0xd0   :  { %2064 = vmatpush2.bf16.msra.mxu0 %v8500_v2  ;;  %v8586_v2 = vld [vmem:[#allocation2 + $0x5ac] ss:$24 sps:$4 sm:$0xff]  }
  0xd1   :  { %2146 = vmatpush2.bf16.msra.mxu1 %v8497_v1  ;;  %2065 = vmatprep.subr.bf16.mxu0 %v8508_v4  ;;  %v8583_v1 = vld [vmem:[#allocation2 + $0x60c] ss:$24 sps:$4 sm:$0xff]   ;;  %v8584_v4 = vld [vmem:[#allocation2 + $0x5a8] ss:$24 sps:$4 sm:$0xff]  }
  0xd2   :  { %2147 = vmatprep.subr.bf16.mxu1 %v8505_v3  ;;  %v8581_v3 = vld [vmem:[#allocation2 + $0x608] ss:$24 sps:$4 sm:$0xff]  }
  0xd4   :  { %2066 = vmatpush2.bf16.msra.mxu0 %v8506_v6  ;;  %v8592_v6 = vld [vmem:[#allocation2 + $0x57c] ss:$24 sps:$4 sm:$0xff]  }
  0xd5   :  { %2148 = vmatpush2.bf16.msra.mxu1 %v8503_v5  ;;  %2067 = vmatprep.subr.bf16.mxu0 %v8514_v8  ;;  %v8589_v5 = vld [vmem:[#allocation2 + $0x8dc] ss:$24 sps:$4 sm:$0xff]   ;;  %v8590_v8 = vld [vmem:[#allocation2 + $0x578] ss:$24 sps:$4 sm:$0xff]  }
  0xd6   :  { %2149 = vmatprep.subr.bf16.mxu1 %v8511_v7  ;;  %v8587_v7 = vld [vmem:[#allocation2 + $0x8d8] ss:$24 sps:$4 sm:$0xff]  }
  0xd8   :  { %2068 = vmatpush2.bf16.msra.mxu0 %v8512_v10  ;;  %v8598_v10 = vld [vmem:[#allocation2 + $0x54c] ss:$24 sps:$4 sm:$0xff]  }
  0xd9   :  { %2150 = vmatpush2.bf16.msra.mxu1 %v8509_v9  ;;  %2069 = vmatprep.subr.bf16.mxu0 %v8520_v14  ;;  %v8595_v9 = vld [vmem:[#allocation2 + $0x8ac] ss:$24 sps:$4 sm:$0xff]   ;;  %v8596_v14 = vld [vmem:[#allocation2 + $0x548] ss:$24 sps:$4 sm:$0xff]  }
  0xda   :  { %2151 = vmatprep.subr.bf16.mxu1 %v8517_v11  ;;  %v8593_v11 = vld [vmem:[#allocation2 + $0x8a8] ss:$24 sps:$4 sm:$0xff]  }
  0xdc   :  { %2070 = vmatpush2.bf16.msra.mxu0 %v8518_v16  ;;  %v8604_v16 = vld [vmem:[#allocation2 + $0x51c] ss:$24 sps:$4 sm:$0xff]  }
  0xdd   :  { %2152 = vmatpush2.bf16.msra.mxu1 %v8515_v15  ;;  %2071 = vmatprep.subr.bf16.mxu0 %v8526_v18  ;;  %v8601_v15 = vld [vmem:[#allocation2 + $0x87c] ss:$24 sps:$4 sm:$0xff]   ;;  %v8602_v18 = vld [vmem:[#allocation2 + $0x518] ss:$24 sps:$4 sm:$0xff]  }
  0xde   :  { %2153 = vmatprep.subr.bf16.mxu1 %v8523_v17  ;;  %v8599_v17 = vld [vmem:[#allocation2 + $0x878] ss:$24 sps:$4 sm:$0xff]  }
  0xe0   :  { %2072 = vmatpush2.bf16.msra.mxu0 %v8524_v20  ;;  %v8610_v20 = vld [vmem:[#allocation2 + $0x4ec] ss:$24 sps:$4 sm:$0xff]  }
  0xe1   :  { %2154 = vmatpush2.bf16.msra.mxu1 %v8521_v19  ;;  %2170 = vmatprep.subr.bf16.mxu0 %v8532_v26  ;;  %v8607_v19 = vld [vmem:[#allocation2 + $0x84c] ss:$24 sps:$4 sm:$0xff]   ;;  %v8616_v26 = vld [vmem:[#allocation2 + $0x4bc] ss:$24 sps:$4 sm:$0xff]  }
  0xe2   :  { %2155 = vmatprep.subr.bf16.mxu1 %v8529_v25  ;;  %v8613_v25 = vld [vmem:[#allocation2 + $0x81c] ss:$24 sps:$4 sm:$0xff]  }
  0xe3   :  { %2074 = vmatmul.mubr.bf16.vlgmr.msra.gmra.mxu0 %v10012_v27 }
  0xe4   :  { %2171 = vmatpush1.bf16.msra.mxu0 %v8530_v29  ;;  %2202 = vmatprep.mubr.bf16.mxu0 %v9963_v54  ;;  %v8614_v29 = vld [vmem:[#allocation2 + $0x4b8] ss:$24 sps:$4 sm:$0xff]  }
  0xe5   :  { %2156 = vmatpush2.bf16.msra.mxu1 %v8527_v28  ;;  %2172 = vmatprep.subr.bf16.mxu0 %v8538_v31  ;;  %v8611_v28 = vld [vmem:[#allocation2 + $0x818] ss:$24 sps:$4 sm:$0xff]   ;;  %v8622_v31 = vld [vmem:[#allocation2 + $0x48c] ss:$24 sps:$4 sm:$0xff]  }
  0xe6   :  { %2157 = vmatprep.subr.bf16.mxu1 %v8535_v30  ;;  %v8619_v30 = vld [vmem:[#allocation2 + $0x7ec] ss:$24 sps:$4 sm:$0xff]  }
  0xe8   :  { %2173 = vmatpush1.bf16.msra.mxu0 %v8536_v33  ;;  %v8620_v33 = vld [vmem:[#allocation2 + $0x488] ss:$24 sps:$4 sm:$0xff]  }
  0xe9   :  { %2158 = vmatpush2.bf16.msra.mxu1 %v8533_v32  ;;  %2174 = vmatprep.subr.bf16.mxu0 %v8544_v35  ;;  %v8617_v32 = vld [vmem:[#allocation2 + $0x7e8] ss:$24 sps:$4 sm:$0xff]   ;;  %v8628_v35 = vld [vmem:[#allocation2 + $0x164] ss:$24 sps:$4 sm:$0xff]  }
  0xea   :  { %2213 = vmatprep.subr.bf16.mxu1 %v8541_v34  ;;  %v8625_v34 = vld [vmem:[#allocation2 + $0x7bc] ss:$24 sps:$4 sm:$0xff]  }
  0xec   :  { %2160 = vmatmul.mubr.bf16.vlgmr.msra.gmra.mxu1 %v9979_v12  ;;  %2175 = vmatpush1.bf16.msra.mxu0 %v8542_v37  ;;  %v8626_v37 = vld [vmem:[#allocation2 + $0x160] ss:$24 sps:$4 sm:$0xff]  }
  0xed   :  { %2214 = vmatpush1.bf16.msra.mxu1 %v8539_v36  ;;  %2176 = vmatprep.subr.bf16.mxu0 %v8550_v39  ;;  %v8623_v36 = vld [vmem:[#allocation2 + $0x7b8] ss:$24 sps:$4 sm:$0xff]   ;;  %v8634_v39 = vld [vmem:[#allocation2 + $0x134] ss:$24 sps:$4 sm:$0xff]  }
  0xee   :  { %2215 = vmatprep.subr.bf16.mxu1 %v8547_v38  ;;  %2245 = vmatprep.mubr.bf16.mxu1 %v10003_v44  ;;  %v8631_v38 = vld [vmem:[#allocation2 + $0x78c] ss:$24 sps:$4 sm:$0xff]  }
  0xf0   :  { %2177 = vmatpush1.bf16.msra.mxu0 %v8548_v41  ;;  %v8632_v41 = vld [vmem:[#allocation2 + $0x130] ss:$24 sps:$4 sm:$0xff]  }
  0xf1   :  { %2216 = vmatpush1.bf16.msra.mxu1 %v8545_v40  ;;  %2178 = vmatprep.subr.bf16.mxu0 %v8556_v43  ;;  %v8629_v40 = vld [vmem:[#allocation2 + $0x788] ss:$24 sps:$4 sm:$0xff]   ;;  %v8640_v43 = vld [vmem:[#allocation2 + $0x90c] ss:$24 sps:$4 sm:$0xff]  }
  0xf2   :  { %2217 = vmatprep.subr.bf16.mxu1 %v8553_v42  ;;  %v8637_v42 = vld [vmem:[#allocation2 + $0x104] ss:$24 sps:$4 sm:$0xff]  }
  0xf4   :  { %2179 = vmatpush1.bf16.msra.mxu0 %v8554_v46  ;;  %v8638_v46 = vld [vmem:[#allocation2 + $0x908] ss:$24 sps:$4 sm:$0xff]  }
  0xf5   :  { %2218 = vmatpush1.bf16.msra.mxu1 %v8551_v45  ;;  %2180 = vmatprep.subr.bf16.mxu0 %v8562_v48  ;;  %v8635_v45 = vld [vmem:[#allocation2 + $0x100] ss:$24 sps:$4 sm:$0xff]   ;;  %v8646_v48 = vld [vmem:[#allocation2 + $0x464] ss:$24 sps:$4 sm:$0xff]  }
  0xf6   :  { %2219 = vmatprep.subr.bf16.mxu1 %v8559_v47  ;;  %v8643_v47 = vld [vmem:[#allocation2 + $0xd4] ss:$24 sps:$4 sm:$0xff]  }
  0xf8   :  { %2181 = vmatpush1.bf16.msra.mxu0 %v8560_v50  ;;  %v8649_v50 = vld [vmem:[#allocation2 + $0xa4] ss:$24 sps:$4 sm:$0xff]  }
  0xf9   :  { %2220 = vmatpush1.bf16.msra.mxu1 %v8557_v49  ;;  %2182 = vmatprep.subr.bf16.mxu0 %v8568_v52  ;;  %v8641_v49 = vld [vmem:[#allocation2 + $0xd0] ss:$24 sps:$4 sm:$0xff]   ;;  %v8652_v52 = vld [vmem:[#allocation2 + $0x434] ss:$24 sps:$4 sm:$0xff]  }
  0xfa   :  { %2221 = vmatprep.subr.bf16.mxu1 %v8565_v51  ;;  %v8644_v51 = vld [vmem:[#allocation2 + $0x460] ss:$24 sps:$4 sm:$0xff]  }
  0xfc   :  { %2183 = vmatpush1.bf16.msra.mxu0 %v8566_v56  ;;  %v8650_v56 = vld [vmem:[#allocation2 + $0x430] ss:$24 sps:$4 sm:$0xff]  }
  0xfd   :  { %2222 = vmatpush1.bf16.msra.mxu1 %v8563_v55  ;;  %2184 = vmatprep.subr.bf16.mxu0 %v8574_v58  ;;  %v8655_v55 = vld [vmem:[#allocation2 + $0x74] ss:$24 sps:$4 sm:$0xff]   ;;  %v8658_v58 = vld [vmem:[#allocation2 + $0x404] ss:$24 sps:$4 sm:$0xff]  }
  0xfe   :  { %2223 = vmatprep.subr.bf16.mxu1 %v8571_v57  ;;  %v8653_v57 = vld [vmem:[#allocation2 + $0x70] ss:$24 sps:$4 sm:$0xff]  }
 0x100   :  { %2185 = vmatpush1.bf16.msra.mxu0 %v8572_v60  ;;  %v8656_v60 = vld [vmem:[#allocation2 + $0x400] ss:$24 sps:$4 sm:$0xff]  }
 0x101   :  { %2224 = vmatpush1.bf16.msra.mxu1 %v8569_v59  ;;  %2186 = vmatprep.subr.bf16.mxu0 %v8580_v62  ;;  %v8661_v59 = vld [vmem:[#allocation2 + $0x44] ss:$24 sps:$4 sm:$0xff]   ;;  %v8664_v62 = vld [vmem:[#allocation2 + $0x3d4] ss:$24 sps:$4 sm:$0xff]  }
 0x102   :  { %2225 = vmatprep.subr.bf16.mxu1 %v8577_v61  ;;  %v8659_v61 = vld [vmem:[#allocation2 + $0x40] ss:$24 sps:$4 sm:$0xff]  }
 0x104   :  { %2187 = vmatpush2.bf16.msra.mxu0 %v8578_v0  ;;  %v8662_v0 = vld [vmem:[#allocation2 + $0x3d0] ss:$24 sps:$4 sm:$0xff]  }
 0x105   :  { %2226 = vmatpush1.bf16.msra.mxu1 %v8575_v63  ;;  %2188 = vmatprep.subr.bf16.mxu0 %v8586_v2  ;;  %v8667_v63 = vld [vmem:[#allocation2 + $0x14] ss:$24 sps:$4 sm:$0xff]   ;;  %v8670_v2 = vld [vmem:[#allocation2 + $0x3a4] ss:$24 sps:$4 sm:$0xff]  }
 0x106   :  { %2227 = vmatprep.subr.bf16.mxu1 %v8583_v1  ;;  %v8665_v1 = vld [vmem:[#allocation2 + $0x10] ss:$24 sps:$4 sm:$0xff]  }
 0x108   :  { %2189 = vmatpush2.bf16.msra.mxu0 %v8584_v4  ;;  %v8668_v4 = vld [vmem:[#allocation2 + $0x3a0] ss:$24 sps:$4 sm:$0xff]  }
 0x109   :  { %2228 = vmatpush1.bf16.msra.mxu1 %v8581_v3  ;;  %2190 = vmatprep.subr.bf16.mxu0 %v8592_v6  ;;  %v8673_v3 = vld [vmem:[#allocation2 + $0x2e4] ss:$24 sps:$4 sm:$0xff]   ;;  %v8679_v6 = vld [vmem:[#allocation2 + $0x2b4] ss:$24 sps:$4 sm:$0xff]  }
 0x10a   :  { %2229 = vmatprep.subr.bf16.mxu1 %v8589_v5  ;;  %v8676_v5 = vld [vmem:[#allocation2 + $0x374] ss:$24 sps:$4 sm:$0xff]  }
 0x10c   :  { %2191 = vmatpush2.bf16.msra.mxu0 %v8590_v8  ;;  %v8677_v8 = vld [vmem:[#allocation2 + $0x2b0] ss:$24 sps:$4 sm:$0xff]  }
 0x10d   :  { %2230 = vmatpush2.bf16.msra.mxu1 %v8587_v7  ;;  %2192 = vmatprep.subr.bf16.mxu0 %v8598_v10  ;;  %v8674_v7 = vld [vmem:[#allocation2 + $0x370] ss:$24 sps:$4 sm:$0xff]   ;;  %v8685_v10 = vld [vmem:[#allocation2 + $0x284] ss:$24 sps:$4 sm:$0xff]  }
 0x10e   :  { %2231 = vmatprep.subr.bf16.mxu1 %v8595_v9  ;;  %v8682_v9 = vld [vmem:[#allocation2 + $0x344] ss:$24 sps:$4 sm:$0xff]  }
 0x110   :  { %2193 = vmatpush2.bf16.msra.mxu0 %v8596_v14  ;;  %v8683_v14 = vld [vmem:[#allocation2 + $0x280] ss:$24 sps:$4 sm:$0xff]  }
 0x111   :  { %2232 = vmatpush2.bf16.msra.mxu1 %v8593_v11  ;;  %2194 = vmatprep.subr.bf16.mxu0 %v8604_v16  ;;  %v8680_v11 = vld [vmem:[#allocation2 + $0x340] ss:$24 sps:$4 sm:$0xff]   ;;  %v8691_v16 = vld [vmem:[#allocation2 + $0x254] ss:$24 sps:$4 sm:$0xff]  }
 0x112   :  { %2233 = vmatprep.subr.bf16.mxu1 %v8601_v15  ;;  %v8688_v15 = vld [vmem:[#allocation2 + $0x314] ss:$24 sps:$4 sm:$0xff]  }
 0x114   :  { %2195 = vmatpush2.bf16.msra.mxu0 %v8602_v18  ;;  %v8689_v18 = vld [vmem:[#allocation2 + $0x250] ss:$24 sps:$4 sm:$0xff]  }
 0x115   :  { %2234 = vmatpush2.bf16.msra.mxu1 %v8599_v17  ;;  %2196 = vmatprep.subr.bf16.mxu0 %v8610_v20  ;;  %v8686_v17 = vld [vmem:[#allocation2 + $0x310] ss:$24 sps:$4 sm:$0xff]   ;;  %v8697_v20 = vld [vmem:[#allocation2 + $0x224] ss:$24 sps:$4 sm:$0xff]  }
 0x116   :  { %2235 = vmatprep.subr.bf16.mxu1 %v8607_v19  ;;  %v8694_v19 = vld [vmem:[#allocation2 + $0x5e4] ss:$24 sps:$4 sm:$0xff]  }
 0x118   :  { %2197 = vmatpush2.bf16.msra.mxu0 %v8608_v24  ;;  %v8695_v24 = vld [vmem:[#allocation2 + $0x220] ss:$24 sps:$4 sm:$0xff]  }
 0x119   :  { %2236 = vmatpush2.bf16.msra.mxu1 %v8605_v22  ;;  %2198 = vmatprep.subr.bf16.mxu0 %v8616_v26  ;;  %v8692_v22 = vld [vmem:[#allocation2 + $0x5e0] ss:$24 sps:$4 sm:$0xff]   ;;  %v8703_v26 = vld [vmem:[#allocation2 + $0x1f4] ss:$24 sps:$4 sm:$0xff]  }
 0x11a   :  { %2237 = vmatprep.subr.bf16.mxu1 %v8613_v25  ;;  %v8700_v25 = vld [vmem:[#allocation2 + $0x5b4] ss:$24 sps:$4 sm:$0xff]  }
 0x11c   :  { %2199 = vmatpush2.bf16.msra.mxu0 %v8614_v29  ;;  %v8701_v29 = vld [vmem:[#allocation2 + $0x1f0] ss:$24 sps:$4 sm:$0xff]  }
 0x11d   :  { %2238 = vmatpush2.bf16.msra.mxu1 %v8611_v28  ;;  %2200 = vmatprep.subr.bf16.mxu0 %v8622_v31  ;;  %v8698_v28 = vld [vmem:[#allocation2 + $0x5b0] ss:$24 sps:$4 sm:$0xff]   ;;  %v8709_v31 = vld [vmem:[#allocation2 + $0x1c4] ss:$24 sps:$4 sm:$0xff]  }
 0x11e   :  { %2239 = vmatprep.subr.bf16.mxu1 %v8619_v30  ;;  %v8706_v30 = vld [vmem:[#allocation2 + $0x584] ss:$24 sps:$4 sm:$0xff]  }
 0x120   :  { %2201 = vmatpush2.bf16.msra.mxu0 %v8620_v33  ;;  %v8707_v33 = vld [vmem:[#allocation2 + $0x1c0] ss:$24 sps:$4 sm:$0xff]  }
 0x121   :  { %2240 = vmatpush2.bf16.msra.mxu1 %v8617_v32  ;;  %2299 = vmatprep.subr.bf16.mxu0 %v8628_v35  ;;  %v8704_v32 = vld [vmem:[#allocation2 + $0x580] ss:$24 sps:$4 sm:$0xff]   ;;  %v8715_v35 = vld [vmem:[#allocation2 + $0x194] ss:$24 sps:$4 sm:$0xff]  }
 0x122   :  { %2241 = vmatprep.subr.bf16.mxu1 %v8625_v34  ;;  %v8712_v34 = vld [vmem:[#allocation2 + $0x554] ss:$24 sps:$4 sm:$0xff]  }
 0x123   :  { %2203 = vmatmul.mubr.bf16.vlgmr.msra.gmra.mxu0 %v9981_v13 }
 0x124   :  { %2300 = vmatpush1.bf16.msra.mxu0 %v8626_v37  ;;  %2331 = vmatprep.mubr.bf16.mxu0 %v9961_v53  ;;  %v8647_v53 = vld [vmem:[#allocation2 + $0xa0] ss:$24 sps:$4 sm:$0xff]   ;;  %v8713_v37 = vld [vmem:[#allocation2 + $0x190] ss:$24 sps:$4 sm:$0xff]  }
 0x125   :  { %2242 = vmatpush2.bf16.msra.mxu1 %v8623_v36  ;;  %2301 = vmatprep.subr.bf16.mxu0 %v8634_v39  ;;  %v8710_v36 = vld [vmem:[#allocation2 + $0x550] ss:$24 sps:$4 sm:$0xff]   ;;  %v8721_v39 = vld [vmem:[#allocation2 + $0x764] ss:$24 sps:$4 sm:$0xff]  }
 0x126   :  { %2243 = vmatprep.subr.bf16.mxu1 %v8631_v38  ;;  %v8718_v38 = vld [vmem:[#allocation2 + $0x524] ss:$24 sps:$4 sm:$0xff]  }
 0x128   :  { %2302 = vmatpush1.bf16.msra.mxu0 %v8632_v41  ;;  %v8719_v41 = vld [vmem:[#allocation2 + $0x760] ss:$24 sps:$4 sm:$0xff]  }
 0x129   :  { %2244 = vmatpush2.bf16.msra.mxu1 %v8629_v40  ;;  %2303 = vmatprep.subr.bf16.mxu0 %v8637_v42  ;;  %v8716_v40 = vld [vmem:[#allocation2 + $0x520] ss:$24 sps:$4 sm:$0xff]   ;;  %v8724_v42 = vld [vmem:[#allocation2 + $0x4f4] ss:$24 sps:$4 sm:$0xff]  }
 0x12a   :  { %2270 = vmatprep.subr.bf16.mxu1 %v8640_v43  ;;  %v8727_v43 = vld [vmem:[#allocation2 + $0x734] ss:$24 sps:$4 sm:$0xff]  }
 0x12c   :  { %2246 = vmatmul.mubr.bf16.vlgmr.msra.gmra.mxu1 %v10012_v27  ;;  %2304 = vmatpush1.bf16.msra.mxu0 %v8635_v45  ;;  %v8722_v45 = vld [vmem:[#allocation2 + $0x4f0] ss:$24 sps:$4 sm:$0xff]  }
 0x12d   :  { %2271 = vmatpush1.bf16.msra.mxu1 %v8638_v46  ;;  %2305 = vmatprep.subr.bf16.mxu0 %v8643_v47  ;;  %v8725_v46 = vld [vmem:[#allocation2 + $0x730] ss:$24 sps:$4 sm:$0xff]   ;;  %v8730_v47 = vld [vmem:[#allocation2 + $0x4c4] ss:$24 sps:$4 sm:$0xff]  }
 0x12e   :  { %2288 = vmatprep.mubr.bf16.mxu1 %v9874_v21  ;;  %2342 = vmatprep.subr.bf16.mxu1 %v8646_v48  ;;  %v8733_v48 = vld [vmem:[#allocation2 + $0x704] ss:$24 sps:$4 sm:$0xff]  }
 0x130   :  { %2306 = vmatpush1.bf16.msra.mxu0 %v8641_v49  ;;  %v8728_v49 = vld [vmem:[#allocation2 + $0x4c0] ss:$24 sps:$4 sm:$0xff]  }
 0x131   :  { %2307 = vmatprep.subr.bf16.mxu0 %v8649_v50  ;;  %v8731_v50 = vld [vmem:[#allocation2 + $0x700] ss:$24 sps:$4 sm:$0xff]  }
 0x134   :  { %7623 = vmatmul.mubr.msk.bf16.vlgmr.msra.gmra.mxu1 %vm1951_vm0, %v9992_v23  ;;  %2308 = vmatpush1.bf16.msra.mxu0 %v8647_v53  ;;  %v8739_v53 = vld [vmem:[#allocation2 + $0x6d4] ss:$24 sps:$4 sm:$0xff]  }
 0x135   :  { %2343 = vmatpush1.bf16.msra.mxu1 %v8644_v51  ;;  %2309 = vmatprep.subr.bf16.mxu0 %v8655_v55  ;;  %v8736_v51 = vld [vmem:[#allocation2 + $0x494] ss:$24 sps:$4 sm:$0xff]   ;;  %v8737_v55 = vld [vmem:[#allocation2 + $0x6d0] ss:$24 sps:$4 sm:$0xff]  }
 0x136   :  { %2344 = vmatprep.subr.bf16.mxu1 %v8652_v52  ;;  %2374 = vmatprep.mubr.bf16.mxu1 %v9963_v54  ;;  %v8671_v54 = vld [vmem:[#allocation2 + $0x2e0] ss:$24 sps:$4 sm:$0xff]   ;;  %v8734_v52 = vld [vmem:[#allocation2 + $0x490] ss:$24 sps:$4 sm:$0xff]  }
 0x138   :  { %2310 = vmatpush1.bf16.msra.mxu0 %v8653_v57  ;;  %v8740_v57 = vld [vmem:[#allocation2 + $0x6a0] ss:$24 sps:$4 sm:$0xff]  }
 0x139   :  { %2345 = vmatpush1.bf16.msra.mxu1 %v8650_v56  ;;  %2311 = vmatprep.subr.bf16.mxu0 %v8661_v59  ;;  %v8745_v56 = vld [vmem:[#allocation2 + $0x914] ss:$24 sps:$4 sm:$0xff]  }
 0x13a   :  { %2346 = vmatprep.subr.bf16.mxu1 %v8658_v58  ;;  %v8743_v58 = vld [vmem:[#allocation2 + $0x910] ss:$24 sps:$4 sm:$0xff]   ;;  %v8748_v59 = vld [vmem:[#allocation2 + $0x674] ss:$24 sps:$4 sm:$0xff]  }
 0x13c   :  { %2312 = vmatpush1.bf16.msra.mxu0 %v8659_v61  ;;  %v8754_v61 = vld [vmem:[#allocation2 + $0x644] ss:$24 sps:$4 sm:$0xff]  }
 0x13d   :  { %2347 = vmatpush1.bf16.msra.mxu1 %v8656_v60  ;;  %2313 = vmatprep.subr.bf16.mxu0 %v8667_v63  ;;  %v8746_v60 = vld [vmem:[#allocation2 + $0x670] ss:$24 sps:$4 sm:$0xff]   ;;  %v8752_v63 = vld [vmem:[#allocation2 + $0x640] ss:$24 sps:$4 sm:$0xff]  }
 0x13e   :  { %2348 = vmatprep.subr.bf16.mxu1 %v8664_v62  ;;  %v8749_v62 = vld [vmem:[#allocation6 + $0x150] ss:$24 sps:$4 sm:$0xff]  }
 0x140   :  { %2314 = vmatpush1.bf16.msra.mxu0 %v8665_v1  ;;  %v8760_v1 = vld [vmem:[#allocation2 + $0x614] ss:$24 sps:$4 sm:$0xff]  }
 0x141   :  { %2349 = vmatpush1.bf16.msra.mxu1 %v8662_v0  ;;  %2315 = vmatprep.subr.bf16.mxu0 %v8673_v3  ;;  %v8757_v0 = vld [vmem:[#allocation6 + $0x124] ss:$24 sps:$4 sm:$0xff]  }
 0x142   :  { %2350 = vmatprep.subr.bf16.mxu1 %v8670_v2  ;;  %v8755_v2 = vld [vmem:[#allocation6 + $0x120] ss:$24 sps:$4 sm:$0xff]  }
 0x143   :  { %v8758_v3 = vld [vmem:[#allocation2 + $0x610] ss:$24 sps:$4 sm:$0xff]  }
 0x144   :  { %2316 = vmatpush2.bf16.msra.mxu0 %v8671_v54  ;;  %v8764_v54 = vld [vmem:[#allocation2 + $0x8e0] ss:$24 sps:$4 sm:$0xff]  }
 0x145   :  { %2351 = vmatpush1.bf16.msra.mxu1 %v8668_v4  ;;  %2317 = vmatprep.subr.bf16.mxu0 %v8679_v6  ;;  %v8766_v4 = vld [vmem:[#allocation2 + $0x8e4] ss:$24 sps:$4 sm:$0xff]   ;;  %v8772_v6 = vld [vmem:[#allocation2 + $0x8b4] ss:$24 sps:$4 sm:$0xff]  }
 0x146   :  { %2352 = vmatprep.subr.bf16.mxu1 %v8676_v5  ;;  %v8769_v5 = vld [vmem:[#allocation6 + $0xc4] ss:$24 sps:$4 sm:$0xff]  }
 0x148   :  { %2318 = vmatpush2.bf16.msra.mxu0 %v8677_v8  ;;  %v8770_v8 = vld [vmem:[#allocation2 + $0x8b0] ss:$24 sps:$4 sm:$0xff]  }
 0x149   :  { %2353 = vmatpush1.bf16.msra.mxu1 %v8674_v7  ;;  %2319 = vmatprep.subr.bf16.mxu0 %v8685_v10  ;;  %v8767_v7 = vld [vmem:[#allocation6 + $0xc0] ss:$24 sps:$4 sm:$0xff]   ;;  %v8778_v10 = vld [vmem:[#allocation2 + $0x884] ss:$24 sps:$4 sm:$0xff]  }
 0x14a   :  { %2354 = vmatprep.subr.bf16.mxu1 %v8682_v9  ;;  %v8775_v9 = vld [vmem:[#allocation6 + $0x94] ss:$24 sps:$4 sm:$0xff]  }
 0x14c   :  { %2320 = vmatpush2.bf16.msra.mxu0 %v8683_v14  ;;  %v8781_v14 = vld [vmem:[#allocation6 + $0x64] ss:$24 sps:$4 sm:$0xff]  }
 0x14d   :  { %2355 = vmatpush1.bf16.msra.mxu1 %v8680_v11  ;;  %2321 = vmatprep.subr.bf16.mxu0 %v8691_v16  ;;  %v8776_v11 = vld [vmem:[#allocation2 + $0x880] ss:$24 sps:$4 sm:$0xff]  }
 0x14e   :  { %2356 = vmatprep.subr.bf16.mxu1 %v8688_v15  ;;  %v8784_v15 = vld [vmem:[#allocation2 + $0x854] ss:$24 sps:$4 sm:$0xff]  }
 0x14f   :  { %v8779_v16 = vld [vmem:[#allocation6 + $0x60] ss:$24 sps:$4 sm:$0xff]  }
 0x150   :  { %2322 = vmatpush2.bf16.msra.mxu0 %v8689_v18  ;;  %v8787_v18 = vld [vmem:[#allocation6 + $0x34] ss:$24 sps:$4 sm:$0xff]  }
 0x151   :  { %2357 = vmatpush1.bf16.msra.mxu1 %v8686_v17  ;;  %2323 = vmatprep.subr.bf16.mxu0 %v8697_v20  ;;  %v8782_v17 = vld [vmem:[#allocation2 + $0x850] ss:$24 sps:$4 sm:$0xff]  }
 0x152   :  { %2358 = vmatprep.subr.bf16.mxu1 %v8694_v19  ;;  %v8790_v19 = vld [vmem:[#allocation2 + $0x824] ss:$24 sps:$4 sm:$0xff]  }
 0x153   :  { %v8785_v20 = vld [vmem:[#allocation6 + $0x30] ss:$24 sps:$4 sm:$0xff]  }
 0x154   :  { %2324 = vmatpush2.bf16.msra.mxu0 %v8695_v24  ;;  %v8793_v24 = vld [vmem:[#allocation6 + $0x4] ss:$24 sps:$4 sm:$0xff]  }
 0x155   :  { %2359 = vmatpush2.bf16.msra.mxu1 %v8692_v22  ;;  %2325 = vmatprep.subr.bf16.mxu0 %v8703_v26  ;;  %v8788_v22 = vld [vmem:[#allocation2 + $0x820] ss:$24 sps:$4 sm:$0xff]   ;;  %v451_v26 = vlaneseq }
 0x156   :  { %2360 = vmatprep.subr.bf16.mxu1 %v8700_v25  ;;  %v8796_v25 = vld [vmem:[#allocation2 + $0x7f4] ss:$24 sps:$4 sm:$0xff]  }
 0x158   :  { %2326 = vmatpush2.bf16.msra.mxu0 %v8701_v29  ;;  %v8791_v29 = vld [vmem:[#allocation6] ss:$24 sps:$4 sm:$0xff]  }
 0x159   :  { %2361 = vmatpush2.bf16.msra.mxu1 %v8698_v28  ;;  %2327 = vmatprep.subr.bf16.mxu0 %v8709_v31  ;;  %v8799_v31 = vld [vmem:[#allocation6 + $0x2d4] ss:$24 sps:$4 sm:$0xff]  }
 0x15a   :  { %2362 = vmatprep.subr.bf16.mxu1 %v8706_v30  ;;  %v8794_v30 = vld [vmem:[#allocation2 + $0x7f0] ss:$24 sps:$4 sm:$0xff]  }
 0x15c   :  { %2328 = vmatpush2.bf16.msra.mxu0 %v8707_v33  ;;  %v10033_v33 = vshrl.u32 %v451_v26, 7 }
 0x15d   :  { %2363 = vmatpush2.bf16.msra.mxu1 %v8704_v32  ;;  %2329 = vmatprep.subr.bf16.mxu0 %v8715_v35  ;;  %v8802_v32 = vld [vmem:[#allocation2 + $0x7c4] ss:$24 sps:$4 sm:$0xff]  }
 0x15e   :  { %2364 = vmatprep.subr.bf16.mxu1 %v8712_v34 }
 0x160   :  { %2330 = vmatpush2.bf16.msra.mxu0 %v8713_v37  ;;  %v8800_v37 = vld [vmem:[#allocation2 + $0x7c0] ss:$24 sps:$4 sm:$0xff]  }
 0x161   :  { %2365 = vmatpush2.bf16.msra.mxu1 %v8710_v36  ;;  %2385 = vmatprep.subr.bf16.mxu0 %v8721_v39  ;;  %v8797_v36 = vld [vmem:[#allocation6 + $0x2d0] ss:$24 sps:$4 sm:$0xff]   ;;  %v8805_v39 = vld [vmem:[#allocation6 + $0x2a4] ss:$24 sps:$4 sm:$0xff]  }
 0x162   :  { %2366 = vmatprep.subr.bf16.mxu1 %v8718_v38  ;;  %v10037_v38 = vld [vmem:[#allocation4] sm:$0x3f] }
 0x163   :  { %2332 = vmatmul.mubr.bf16.vlgmr.msra.gmra.mxu0 %v9979_v12  ;;  %v8742_v12 = vld [vmem:[#allocation2 + $0x6a4] ss:$24 sps:$4 sm:$0xff]   ;;  %v10035_v34 = vpop.f32.mrf.mxu0 }
 0x164   :  { %2386 = vmatpush1.bf16.msra.mxu0 %v8719_v41  ;;  %2417 = vmatprep.mubr.bf16.mxu0 %v10003_v44  ;;  %v8751_v44 = vld [vmem:[#allocation6 + $0x154] ss:$24 sps:$4 sm:$0xff]   ;;  %v10031_v28 = vpop.f32.mrf.mxu1  ;;  %v10040_v41 = vsub.s32 1, %v10033_v33 }
 0x165   :  { %2367 = vmatpush2.bf16.msra.mxu1 %v8716_v40  ;;  %2387 = vmatprep.subr.bf16.mxu0 %v8727_v43  ;;  %v8808_v40 = vld [vmem:[#allocation2 + $0x794] ss:$24 sps:$4 sm:$0xff]  }
 0x166   :  { %2368 = vmatprep.subr.bf16.mxu1 %v8724_v42  ;;  %v2034_v35 = vpop.f32.mrf.mxu1  ;;  %v1991_v42 = vpop.f32.mrf.mxu0 }
 0x168   :  { %2388 = vmatpush1.bf16.msra.mxu0 %v8725_v46  ;;  %v2036_v43 = vpop.f32.mrf.mxu1  ;;  %v8806_v46 = vld [vmem:[#allocation2 + $0x790] ss:$24 sps:$4 sm:$0xff]  }
 0x169   :  { %2369 = vmatpush2.bf16.msra.mxu1 %v8722_v45  ;;  %2389 = vmatprep.subr.bf16.mxu0 %v8733_v48  ;;  %v8803_v45 = vld [vmem:[#allocation6 + $0x2a0] ss:$24 sps:$4 sm:$0xff]   ;;  %v8829_v48 = vld [vmem:[#allocation6 + $0x454] ss:$24 sps:$4 sm:$0xff]  }
 0x16a   :  { %2370 = vmatprep.subr.bf16.mxu1 %v8730_v47  ;;  %v8811_v47 = vld [vmem:[#allocation6 + $0x274] ss:$24 sps:$4 sm:$0xff]  }
 0x16c   :  { %2390 = vmatpush1.bf16.msra.mxu0 %v8731_v50  ;;  %v1993_v50 = vpop.f32.mrf.mxu0 }
 0x16d   :  { %2371 = vmatpush2.bf16.msra.mxu1 %v8728_v49  ;;  %2391 = vmatprep.subr.bf16.mxu0 %v8739_v53  ;;  %v458_v49 = vrot.slane %v10037_v38, %v10040_v41  ;;  %v8809_v53 = vld [vmem:[#allocation6 + $0x270] ss:$24 sps:$4 sm:$0xff]  }
 0x16e   :  { %2372 = vmatprep.subr.bf16.mxu1 %v8736_v51  ;;  %v2038_v51 = vpop.f32.mrf.mxu1 }
 0x170   :  { %2392 = vmatpush1.bf16.msra.mxu0 %v8737_v55  ;;  %v10044_v55 = vpop.f32.mrf.mxu1 }
 0x171   :  { %2373 = vmatpush2.bf16.msra.mxu1 %v8734_v52  ;;  %2393 = vmatprep.subr.bf16.mxu0 %v8742_v12  ;;  %v8827_v52 = vld [vmem:[#allocation6 + $0x450] ss:$24 sps:$4 sm:$0xff]   ;;  %v8814_v12 = vld [vmem:[#allocation6 + $0x244] ss:$24 sps:$4 sm:$0xff]  }
 0x172   :  { %2442 = vmatprep.subr.bf16.mxu1 %v8745_v56  ;;  %v8832_v56 = vld [vmem:[#allocation6 + $0x424] ss:$24 sps:$4 sm:$0xff]  }
 0x174   :  { %2375 = vmatmul.mubr.bf16.vlgmr.msra.gmra.mxu1 %v9981_v13  ;;  %2394 = vmatpush1.bf16.msra.mxu0 %v8740_v57  ;;  %v8763_v13 = vld [vmem:[#allocation6 + $0xf4] ss:$24 sps:$4 sm:$0xff]   ;;  %v1992_v57 = vadd.f32 %v1991_v42, %v458_v49 }
 0x175   :  { %2443 = vmatpush1.bf16.msra.mxu1 %v8743_v58  ;;  %2395 = vmatprep.subr.bf16.mxu0 %v8748_v59  ;;  %v10047_v58 = vsub.s32 0, %v10033_v33  ;;  %v1995_v59 = vpop.f32.mrf.mxu0  ;;  %v8847_v42 = vld [vmem:[#allocation6 + $0x334] ss:$24 sps:$4 sm:$0xff]  }
 0x176   :  { %2460 = vmatprep.mubr.bf16.mxu1 %v9874_v21  ;;  %4249 = vmatprep.subr.bf16.mxu1 %v8751_v44  ;;  %v8761_v21 = vld [vmem:[#allocation6 + $0xf0] ss:$24 sps:$4 sm:$0xff]   ;;  %v8812_v44 = vld [vmem:[#allocation6 + $0x240] ss:$24 sps:$4 sm:$0xff]  }
 0x178   :  { %2396 = vmatpush1.bf16.msra.mxu0 %v8746_v60  ;;  %v2120_v60 = vpop.f32.mrf.mxu1 }
 0x179   :  { %2397 = vmatprep.subr.bf16.mxu0 %v8754_v61 }
 0x17c   :  { %7624 = vmatmul.mubr.msk.bf16.vlgmr.msra.gmra.mxu1 %vm1951_vm0, %v9992_v23  ;;  %2398 = vmatpush1.bf16.msra.mxu0 %v8752_v63  ;;  %v8773_v23 = vld [vmem:[#allocation6 + $0x90] ss:$24 sps:$4 sm:$0xff]   ;;  %v2035_v63 = vadd.f32 %v2034_v35, %v1992_v57  ;;  %v8844_v35 = vld [vmem:[#allocation6 + $0x364] ss:$24 sps:$4 sm:$0xff]  }
 0x17d   :  { %4250 = vmatpush1.bf16.msra.mxu1 %v8749_v62  ;;  %2399 = vmatprep.subr.bf16.mxu0 %v8760_v1  ;;  %v8817_v62 = vld [vmem:[#allocation6 + $0x214] ss:$24 sps:$4 sm:$0xff]   ;;  %v8830_v1 = vld [vmem:[#allocation6 + $0x420] ss:$24 sps:$4 sm:$0xff]   ;;  %v8856_v57 = vld [vmem:[#allocation6 + $0x5a4] ss:$24 sps:$4 sm:$0xff]  }
 0x17e   :  { %4251 = vmatprep.subr.bf16.mxu1 %v8757_v0  ;;  %v1996_v0 = vadd.f32 %v1995_v59, %v458_v49  ;;  %v8914_v49 = vld [vmem:[#allocation6 + $0x750] ss:$24 sps:$4 sm:$0xff]  }
 0x17f   :  { %v8926_v59 = vld [vmem:[#allocation6 + $0x6f0] ss:$24 sps:$4 sm:$0xff]  }
 0x180   :  { %2400 = vmatpush1.bf16.msra.mxu0 %v8758_v3  ;;  %v454_v3 = vrot.slane %v10037_v38, %v10047_v58 }
 0x181   :  { %4252 = vmatpush1.bf16.msra.mxu1 %v8755_v2  ;;  %2401 = vmatprep.subr.bf16.mxu0 %v8766_v4  ;;  %v8835_v2 = vld [vmem:[#allocation6 + $0x3f4] ss:$24 sps:$4 sm:$0xff]  }
 0x182   :  { %4253 = vmatprep.subr.bf16.mxu1 %v8763_v13 }
 0x184   :  { %2402 = vmatpush2.bf16.msra.mxu0 %v8764_v54  ;;  %v1994_v54 = vadd.f32 %v1993_v50, %v454_v3 }
 0x185   :  { %4254 = vmatpush1.bf16.msra.mxu1 %v8761_v21  ;;  %2403 = vmatprep.subr.bf16.mxu0 %v8772_v6  ;;  %v8815_v21 = vld [vmem:[#allocation6 + $0x210] ss:$24 sps:$4 sm:$0xff]  }
 0x186   :  { %4255 = vmatprep.subr.bf16.mxu1 %v8769_v5  ;;  %v2122_v5 = vpop.f32.mrf.mxu1 }
 0x188   :  { %2404 = vmatpush2.bf16.msra.mxu0 %v8770_v8  ;;  %v8833_v8 = vld [vmem:[#allocation6 + $0x3f0] ss:$24 sps:$4 sm:$0xff]  }
 0x189   :  { %4256 = vmatpush1.bf16.msra.mxu1 %v8767_v7  ;;  %2405 = vmatprep.subr.bf16.mxu0 %v8778_v10  ;;  %v8820_v7 = vld [vmem:[#allocation6 + $0x1e4] ss:$24 sps:$4 sm:$0xff]   ;;  %v1990_v10 = vadd.f32 %v10035_v34, %v454_v3 }
 0x18a   :  { %4257 = vmatprep.subr.bf16.mxu1 %v8775_v9  ;;  %v8838_v9 = vld [vmem:[#allocation6 + $0x3c4] ss:$24 sps:$4 sm:$0xff]  }
 0x18b   :  { %v8826_v34 = vld [vmem:[#allocation6 + $0x184] ss:$24 sps:$4 sm:$0xff]  }
 0x18c   :  { %2406 = vmatpush2.bf16.msra.mxu0 %v8776_v11  ;;  %v8946_v3 = vld [vmem:[#allocation6 + $0x664] ss:$24 sps:$4 sm:$0xff]  }
 0x18d   :  { %4258 = vmatpush1.bf16.msra.mxu1 %v8773_v23  ;;  %2407 = vmatprep.subr.bf16.mxu0 %v8784_v15  ;;  %v8818_v15 = vld [vmem:[#allocation6 + $0x1e0] ss:$24 sps:$4 sm:$0xff]  }
 0x18e   :  { %4259 = vmatprep.subr.bf16.mxu1 %v8781_v14 }
 0x190   :  { %2408 = vmatpush2.bf16.msra.mxu0 %v8782_v17  ;;  %v2037_v17 = vadd.f32 %v2036_v43, %v1994_v54  ;;  %v8952_v54 = vld [vmem:[#allocation6 + $0x634] ss:$24 sps:$4 sm:$0xff]  }
 0x191   :  { %4260 = vmatpush1.bf16.msra.mxu1 %v8779_v16  ;;  %2409 = vmatprep.subr.bf16.mxu0 %v8790_v19  ;;  %v8836_v16 = vld [vmem:[#allocation6 + $0x3c0] ss:$24 sps:$4 sm:$0xff]   ;;  %v8823_v19 = vld [vmem:[#allocation6 + $0x1b4] ss:$24 sps:$4 sm:$0xff]  }
 0x192   :  { %4261 = vmatprep.subr.bf16.mxu1 %v8787_v18  ;;  %v2124_v18 = vpop.f32.mrf.mxu1 }
 0x194   :  { %2410 = vmatpush2.bf16.msra.mxu0 %v8788_v22 }
 0x195   :  { %4262 = vmatpush1.bf16.msra.mxu1 %v8785_v20  ;;  %2411 = vmatprep.subr.bf16.mxu0 %v8796_v25  ;;  %v8841_v20 = vld [vmem:[#allocation6 + $0x394] ss:$24 sps:$4 sm:$0xff]  }
 0x196   :  { %4263 = vmatprep.subr.bf16.mxu1 %v8793_v24  ;;  %v2033_v24 = vadd.f32 %v10031_v28, %v1990_v10  ;;  %v8871_v10 = vld [vmem:[#allocation6 + $0x4b4] ss:$24 sps:$4 sm:$0xff]  }
 0x198   :  { %2412 = vmatpush2.bf16.msra.mxu0 %v8794_v30  ;;  %v8821_v30 = vld [vmem:[#allocation6 + $0x1b0] ss:$24 sps:$4 sm:$0xff]  }
 0x199   :  { %4264 = vmatpush1.bf16.msra.mxu1 %v8791_v29  ;;  %2413 = vmatprep.subr.bf16.mxu0 %v8802_v32 }
 0x19a   :  { %4265 = vmatprep.subr.bf16.mxu1 %v8799_v31  ;;  %v8839_v31 = vld [vmem:[#allocation6 + $0x390] ss:$24 sps:$4 sm:$0xff]  }
 0x19c   :  { %2414 = vmatpush2.bf16.msra.mxu0 %v8800_v37 }
 0x19d   :  { %4266 = vmatpush2.bf16.msra.mxu1 %v8797_v36  ;;  %2415 = vmatprep.subr.bf16.mxu0 %v8808_v40  ;;  %v8842_v40 = vld [vmem:[#allocation6 + $0x360] ss:$24 sps:$4 sm:$0xff]  }
 0x19e   :  { %4267 = vmatprep.subr.bf16.mxu1 %v8805_v39  ;;  %v8824_v39 = vld [vmem:[#allocation6 + $0x180] ss:$24 sps:$4 sm:$0xff]  }
 0x1a0   :  { %2416 = vmatpush2.bf16.msra.mxu0 %v8806_v46 }
 0x1a1   :  { %4268 = vmatpush2.bf16.msra.mxu1 %v8803_v45  ;;  %4292 = vmatprep.subr.bf16.mxu0 %v8829_v48  ;;  %v8916_v45 = vld [vmem:[#allocation6 + $0x754] ss:$24 sps:$4 sm:$0xff]   ;;  %v8850_v48 = vld [vmem:[#allocation6 + $0x304] ss:$24 sps:$4 sm:$0xff]  }
 0x1a2   :  { %4269 = vmatprep.subr.bf16.mxu1 %v8811_v47  ;;  %v8845_v47 = vld [vmem:[#allocation6 + $0x330] ss:$24 sps:$4 sm:$0xff]  }
 0x1a3   :  { %v2075_v61 = vpop.f32.mrf.mxu0  ;;  %2418 = vmatmul.mubr.bf16.vlgmr.msra.gmra.mxu0 %v10012_v27  ;;  %v2039_v27 = vadd.f32 %v2038_v51, %v1996_v0  ;;  %v8922_v51 = vld [vmem:[#allocation6 + $0x724] ss:$24 sps:$4 sm:$0xff]   ;;  %v8857_v0 = vld [vmem:[#allocation6 + $0x570] ss:$24 sps:$4 sm:$0xff]  }
 0x1a4   :  { %4293 = vmatpush1.bf16.msra.mxu0 %v8827_v52  ;;  %v2076_v32 = vadd.f32 %v2075_v61, %v2033_v24  ;;  %v8920_v52 = vld [vmem:[#allocation6 + $0x720] ss:$24 sps:$4 sm:$0xff]   ;;  %v8974_v24 = vld [vmem:[#allocation6 + $0x870] ss:$24 sps:$4 sm:$0xff]  }
 0x1a5   :  { %4270 = vmatpush2.bf16.msra.mxu1 %v8809_v53  ;;  %v2077_v13 = vpop.f32.mrf.mxu0  ;;  %4294 = vmatprep.subr.bf16.mxu0 %v8832_v56  ;;  %v8848_v53 = vld [vmem:[#allocation6 + $0x300] ss:$24 sps:$4 sm:$0xff]   ;;  %v8851_v56 = vld [vmem:[#allocation6 + $0x5d0] ss:$24 sps:$4 sm:$0xff]  }
 0x1a6   :  { %4271 = vmatprep.subr.bf16.mxu1 %v8814_v12  ;;  %v2078_v4 = vadd.f32 %v2077_v13, %v2035_v63  ;;  %v2119_v28 = vadd.f32 %v10044_v55, %v2076_v32  ;;  %v8853_v55 = vld [vmem:[#allocation6 + $0x5d4] ss:$24 sps:$4 sm:$0xff]   ;;  %v8932_v61 = vld [vmem:[#allocation6 + $0x6c0] ss:$24 sps:$4 sm:$0xff]  }
 0x1a7   :  { %v2079_v6 = vpop.f32.mrf.mxu0  ;;  %v8928_v12 = vld [vmem:[#allocation6 + $0x6f4] ss:$24 sps:$4 sm:$0xff]   ;;  %v8860_v13 = vld [vmem:[#allocation6 + $0x540] ss:$24 sps:$4 sm:$0xff]  }
 0x1a8   :  { %4295 = vmatpush1.bf16.msra.mxu0 %v8830_v1  ;;  %v2121_v11 = vadd.f32 %v2120_v60, %v2078_v4  ;;  %v2080_v25 = vadd.f32 %v2079_v6, %v2037_v17  ;;  %v2471_v46 = vmax.f32 %v2119_v28, 0.0  ;;  %v8854_v60 = vld [vmem:[#allocation6 + $0x5a0] ss:$24 sps:$4 sm:$0xff]   ;;  %v8940_v63 = vld [vmem:[#allocation6 + $0x694] ss:$24 sps:$4 sm:$0xff]   ;;  %v10062_v28 = vsub.s32 2, %v10033_v33 }
 0x1a9   :  { %4272 = vmatpush2.bf16.msra.mxu1 %v8812_v44  ;;  %v2081_v23 = vpop.f32.mrf.mxu0  ;;  %4296 = vmatprep.subr.bf16.mxu0 %v8835_v2  ;;  %v8934_v44 = vld [vmem:[#allocation6 + $0x6c4] ss:$24 sps:$4 sm:$0xff]   ;;  %v8938_v1 = vld [vmem:[#allocation6 + $0x690] ss:$24 sps:$4 sm:$0xff]   ;;  %v8944_v4 = vld [vmem:[#allocation6 + $0x660] ss:$24 sps:$4 sm:$0xff]  }
 0x1aa   :  { %4273 = vmatprep.subr.bf16.mxu1 %v8817_v62  ;;  %v2082_v14 = vadd.f32 %v2081_v23, %v2039_v27  ;;  %v2472_v26 = vmax.f32 %v2121_v11, 0.0  ;;  %v2123_v37 = vadd.f32 %v2122_v5, %v2080_v25  ;;  %v8859_v62 = vld [vmem:[#allocation6 + $0x574] ss:$24 sps:$4 sm:$0xff]   ;;  %v8862_v2 = vld [vmem:[#allocation6 + $0x544] ss:$24 sps:$4 sm:$0xff]  }
 0x1ab   :  { %v8863_v5 = vld [vmem:[#allocation6 + $0x510] ss:$24 sps:$4 sm:$0xff]   ;;  %v8958_v27 = vld [vmem:[#allocation6 + $0x604] ss:$24 sps:$4 sm:$0xff]   ;;  %v8964_v23 = vld [vmem:[#allocation6 + $0x8d4] ss:$24 sps:$4 sm:$0xff]  }
 0x1ac   :  { %v2125_v22 = vadd.f32 %v2124_v18, %v2082_v14  ;;  %4297 = vmatpush1.bf16.msra.mxu0 %v8833_v8  ;;  %v2477_v43 = vmax.f32 %v2123_v37, 0.0  ;;  %v8950_v6 = vld [vmem:[#allocation6 + $0x630] ss:$24 sps:$4 sm:$0xff]   ;;  %v8866_v8 = vld [vmem:[#allocation6 + $0x4e0] ss:$24 sps:$4 sm:$0xff]  }
 0x1ad   :  { %4274 = vmatpush2.bf16.msra.mxu1 %v8815_v21  ;;  %4298 = vmatprep.subr.bf16.mxu0 %v8838_v9  ;;  %v8865_v21 = vld [vmem:[#allocation6 + $0x514] ss:$24 sps:$4 sm:$0xff]   ;;  %v8956_v9 = vld [vmem:[#allocation6 + $0x600] ss:$24 sps:$4 sm:$0xff]   ;;  %v8869_v11 = vld [vmem:[#allocation6 + $0x4b0] ss:$24 sps:$4 sm:$0xff]  }
 0x1ae   :  { %4275 = vmatprep.subr.bf16.mxu1 %v8820_v7  ;;  %v2478_v29 = vmax.f32 %v2125_v22, 0.0  ;;  %v10058_v50 = vpack.c.bf16 %v2477_v43, %v2471_v46  ;;  %v8868_v7 = vld [vmem:[#allocation6 + $0x4e4] ss:$24 sps:$4 sm:$0xff]   ;;  %v8962_v14 = vld [vmem:[#allocation6 + $0x8d0] ss:$24 sps:$4 sm:$0xff]   ;;  %v2161_v22 = vpop.f32.mrf.mxu1 }
 0x1af   :  { %v8872_v17 = vld [vmem:[#allocation6 + $0x480] ss:$24 sps:$4 sm:$0xff]   ;;  %v8982_v25 = vld [vmem:[#allocation6 + $0x844] ss:$24 sps:$4 sm:$0xff]   ;;  %v9000_v46 = vld [vmem:[#allocation6 + $0x7b4] ss:$24 sps:$4 sm:$0xff]  }
 0x1b0   :  { %v10054_v36 = vpack.c.bf16 %v2478_v29, %v2472_v26  ;;  %4299 = vmatpush1.bf16.msra.mxu0 %v8836_v16  ;;  %v8970_v16 = vld [vmem:[#allocation6 + $0x8a4] ss:$24 sps:$4 sm:$0xff]   ;;  %v8968_v18 = vld [vmem:[#allocation6 + $0x8a0] ss:$24 sps:$4 sm:$0xff]   ;;  %v2163_v26 = vpop.f32.mrf.mxu1 }
 0x1b1   :  { %4276 = vmatpush2.bf16.msra.mxu1 %v8818_v15  ;;  %4300 = vmatprep.subr.bf16.mxu0 %v8841_v20  ;;  %v8874_v15 = vld [vmem:[#allocation6 + $0x484] ss:$24 sps:$4 sm:$0xff]   ;;  %v8976_v20 = vld [vmem:[#allocation6 + $0x874] ss:$24 sps:$4 sm:$0xff]   ;;  %v8980_v29 = vld [vmem:[#allocation6 + $0x840] ss:$24 sps:$4 sm:$0xff]  }
 0x1b2   :  { %4277 = vmatprep.subr.bf16.mxu1 %v8823_v19  ;;  %4281 = vmatprep.mubr.bf16.mxu1 %v10054_v36  ;;  %v8877_v19 = vld [vmem:[#allocation6 + $0x15c] ss:$24 sps:$4 sm:$0xff]   ;;  %v8992_v43 = vld [vmem:[#allocation6 + $0x7e0] ss:$24 sps:$4 sm:$0xff]  }
 0x1b3   :  { %v8994_v37 = vld [vmem:[#allocation6 + $0x7e4] ss:$24 sps:$4 sm:$0xff]  }
 0x1b4   :  { %4301 = vmatpush1.bf16.msra.mxu0 %v8839_v31  ;;  %v8988_v31 = vld [vmem:[#allocation6 + $0x814] ss:$24 sps:$4 sm:$0xff]  }
 0x1b5   :  { %4278 = vmatpush2.bf16.msra.mxu1 %v8821_v30  ;;  %4302 = vmatprep.subr.bf16.mxu0 %v8844_v35  ;;  %v2165_v30 = vpop.f32.mrf.mxu1 }
 0x1b6   :  { %4279 = vmatprep.subr.bf16.mxu1 %v8826_v34  ;;  %v8986_v34 = vld [vmem:[#allocation6 + $0x810] ss:$24 sps:$4 sm:$0xff]  }
 0x1b7   :  { %v2167_v35 = vpop.f32.mrf.mxu1 }
 0x1b8   :  { %4303 = vmatpush1.bf16.msra.mxu0 %v8842_v40 }
 0x1b9   :  { %4280 = vmatpush2.bf16.msra.mxu1 %v8824_v39  ;;  %4304 = vmatprep.subr.bf16.mxu0 %v8847_v42  ;;  %v10065_v39 = vsub.s32 3, %v10033_v33 }
 0x1ba   :  { %4335 = vmatprep.subr.bf16.mxu1 %v8916_v45 }
 0x1bc   :  { %4282 = vmatmul.mubr.bf16.vlgmr.msra.gmra.mxu1 %v10058_v50  ;;  %4305 = vmatpush1.bf16.msra.mxu0 %v8845_v47  ;;  %v462_v47 = vrot.slane %v10037_v38, %v10062_v28 }
 0x1bd   :  { %4336 = vmatpush1.bf16.msra.mxu1 %v8914_v49  ;;  %4306 = vmatprep.subr.bf16.mxu0 %v8850_v48  ;;  %v466_v48 = vrot.slane %v10037_v38, %v10065_v39  ;;  %v8998_v49 = vld [vmem:[#allocation6 + $0x7b0] ss:$24 sps:$4 sm:$0xff]  }
 0x1be   :  { %4337 = vmatprep.subr.bf16.mxu1 %v8922_v51 }
 0x1c0   :  { %4307 = vmatpush1.bf16.msra.mxu0 %v8848_v53 }
 0x1c1   :  { %4338 = vmatpush1.bf16.msra.mxu1 %v8920_v52  ;;  %4308 = vmatprep.subr.bf16.mxu0 %v8853_v55  ;;  %v9006_v52 = vld [vmem:[#allocation6 + $0x784] ss:$24 sps:$4 sm:$0xff]  }
 0x1c2   :  { %4339 = vmatprep.subr.bf16.mxu1 %v8928_v12  ;;  %v2164_v12 = vadd.f32 %v2163_v26, %v466_v48  ;;  %v8887_v26 = vld [vmem:[#allocation6 + $0x98] ss:$24 sps:$4 sm:$0xff]  }
 0x1c4   :  { %4309 = vmatpush2.bf16.msra.mxu0 %v8851_v56  ;;  %v2166_v56 = vadd.f32 %v2165_v30, %v462_v47  ;;  %v8890_v30 = vld [vmem:[#allocation6 + $0x68] ss:$24 sps:$4 sm:$0xff]  }
 0x1c5   :  { %4340 = vmatpush1.bf16.msra.mxu1 %v8926_v59  ;;  %4310 = vmatprep.subr.bf16.mxu0 %v8856_v57  ;;  %v2162_v57 = vadd.f32 %v2161_v22, %v462_v47  ;;  %v8886_v22 = vld [vmem:[#allocation6 + $0xcc] ss:$24 sps:$4 sm:$0xff]  }
 0x1c6   :  { %4341 = vmatprep.subr.bf16.mxu1 %v8934_v44  ;;  %v8910_v47 = vld [vmem:[#allocation6 + $0x24c] ss:$24 sps:$4 sm:$0xff]  }
 0x1c8   :  { %4311 = vmatpush2.bf16.msra.mxu0 %v8854_v60  ;;  %v2168_v60 = vadd.f32 %v2167_v35, %v466_v48  ;;  %v8896_v35 = vld [vmem:[#allocation6 + $0x8] ss:$24 sps:$4 sm:$0xff]  }
 0x1c9   :  { %4342 = vmatpush1.bf16.msra.mxu1 %v8932_v61  ;;  %4312 = vmatprep.subr.bf16.mxu0 %v8859_v62  ;;  %v8908_v48 = vld [vmem:[#allocation6 + $0x248] ss:$24 sps:$4 sm:$0xff]  }
 0x1ca   :  { %4343 = vmatprep.subr.bf16.mxu1 %v8940_v63  ;;  %v9004_v63 = vld [vmem:[#allocation6 + $0x780] ss:$24 sps:$4 sm:$0xff]  }
 0x1cc   :  { %4313 = vmatpush2.bf16.msra.mxu0 %v8857_v0  ;;  %v9012_v0 = vld [vmem:[#allocation6 + $0x45c] ss:$24 sps:$4 sm:$0xff]  }
 0x1cd   :  { %4344 = vmatpush1.bf16.msra.mxu1 %v8938_v1  ;;  %4314 = vmatprep.subr.bf16.mxu0 %v8862_v2 }
 0x1ce   :  { %4345 = vmatprep.subr.bf16.mxu1 %v8946_v3 }
 0x1d0   :  { %4315 = vmatpush2.bf16.msra.mxu0 %v8860_v13 }
 0x1d1   :  { %4346 = vmatpush1.bf16.msra.mxu1 %v8944_v4  ;;  %4316 = vmatprep.subr.bf16.mxu0 %v8865_v21 }
 0x1d2   :  { %4347 = vmatprep.subr.bf16.mxu1 %v8952_v54 }
 0x1d4   :  { %4317 = vmatpush2.bf16.msra.mxu0 %v8863_v5 }
 0x1d5   :  { %4348 = vmatpush1.bf16.msra.mxu1 %v8950_v6  ;;  %4318 = vmatprep.subr.bf16.mxu0 %v8868_v7 }
 0x1d6   :  { %4349 = vmatprep.subr.bf16.mxu1 %v8958_v27 }
 0x1d8   :  { %4319 = vmatpush2.bf16.msra.mxu0 %v8866_v8 }
 0x1d9   :  { %4350 = vmatpush1.bf16.msra.mxu1 %v8956_v9  ;;  %4320 = vmatprep.subr.bf16.mxu0 %v8871_v10 }
 0x1da   :  { %4351 = vmatprep.subr.bf16.mxu1 %v8964_v23 }
 0x1dc   :  { %4321 = vmatpush2.bf16.msra.mxu0 %v8869_v11 }
 0x1dd   :  { %4352 = vmatpush2.bf16.msra.mxu1 %v8962_v14  ;;  %4322 = vmatprep.subr.bf16.mxu0 %v8874_v15  ;;  %v8875_v14 = vld [vmem:[#allocation6 + $0x158] ss:$24 sps:$4 sm:$0xff]  }
 0x1de   :  { %4353 = vmatprep.subr.bf16.mxu1 %v8970_v16 }
 0x1e0   :  { %4323 = vmatpush2.bf16.msra.mxu0 %v8872_v17  ;;  %v8880_v17 = vld [vmem:[#allocation6 + $0x12c] ss:$24 sps:$4 sm:$0xff]  }
 0x1e1   :  { %4354 = vmatpush2.bf16.msra.mxu1 %v8968_v18  ;;  %4378 = vmatprep.subr.bf16.mxu0 %v8877_v19  ;;  %v8878_v18 = vld [vmem:[#allocation6 + $0x128] ss:$24 sps:$4 sm:$0xff]   ;;  %v8883_v19 = vld [vmem:[#allocation6 + $0xfc] ss:$24 sps:$4 sm:$0xff]  }
 0x1e2   :  { %4355 = vmatprep.subr.bf16.mxu1 %v8976_v20  ;;  %v8881_v20 = vld [vmem:[#allocation6 + $0xf8] ss:$24 sps:$4 sm:$0xff]  }
 0x1e3   :  { %v2204_v32 = vpop.f32.mrf.mxu0 }
 0x1e4   :  { %v2205_v1 = vadd.f32 %v2204_v32, %v2162_v57  ;;  %v8893_v32 = vld [vmem:[#allocation6 + $0x38] ss:$24 sps:$4 sm:$0xff]   ;;  %v8929_v57 = vld [vmem:[#allocation6 + $0x188] ss:$24 sps:$4 sm:$0xff]  }
 0x1e5   :  { %4356 = vmatpush2.bf16.msra.mxu1 %v8974_v24  ;;  %v2206_v40 = vpop.f32.mrf.mxu0  ;;  %v8884_v24 = vld [vmem:[#allocation6 + $0xc8] ss:$24 sps:$4 sm:$0xff]  }
 0x1e6   :  { %4357 = vmatprep.subr.bf16.mxu1 %v8982_v25  ;;  %v2207_v61 = vadd.f32 %v2206_v40, %v2164_v12  ;;  %v8889_v25 = vld [vmem:[#allocation6 + $0x9c] ss:$24 sps:$4 sm:$0xff]   ;;  %v8899_v40 = vld [vmem:[#allocation6 + $0x2d8] ss:$24 sps:$4 sm:$0xff]  }
 0x1e7   :  { %v2208_v51 = vpop.f32.mrf.mxu0  ;;  %v8923_v12 = vld [vmem:[#allocation6 + $0x1b8] ss:$24 sps:$4 sm:$0xff]  }
 0x1e8   :  { %v2209_v62 = vadd.f32 %v2208_v51, %v2166_v56  ;;  %v8911_v51 = vld [vmem:[#allocation6 + $0x218] ss:$24 sps:$4 sm:$0xff]   ;;  %v8931_v56 = vld [vmem:[#allocation6 + $0x18c] ss:$24 sps:$4 sm:$0xff]  }
 0x1e9   :  { %4358 = vmatpush2.bf16.msra.mxu1 %v8980_v29  ;;  %v2210_v59 = vpop.f32.mrf.mxu0  ;;  %v8892_v29 = vld [vmem:[#allocation6 + $0x6c] ss:$24 sps:$4 sm:$0xff]  }
 0x1ea   :  { %4359 = vmatprep.subr.bf16.mxu1 %v8988_v31  ;;  %v2211_v2 = vadd.f32 %v2210_v59, %v2168_v60  ;;  %v8895_v31 = vld [vmem:[#allocation6 + $0x3c] ss:$24 sps:$4 sm:$0xff]   ;;  %v8943_v60 = vld [vmem:[#allocation6 + $0x72c] ss:$24 sps:$4 sm:$0xff]  }
 0x1eb   :  { %v8937_v59 = vld [vmem:[#allocation6 + $0x75c] ss:$24 sps:$4 sm:$0xff]  }
 0x1ec   :  { %v2247_v42 = vpop.f32.mrf.mxu1 }
 0x1ed   :  { %4360 = vmatpush2.bf16.msra.mxu1 %v8986_v34  ;;  %v2248_v4 = vadd.f32 %v2247_v42, %v2205_v1  ;;  %v8898_v34 = vld [vmem:[#allocation6 + $0xc] ss:$24 sps:$4 sm:$0xff]   ;;  %v8953_v1 = vld [vmem:[#allocation6 + $0x6c8] ss:$24 sps:$4 sm:$0xff]  }
 0x1ee   :  { %v2249_v45 = vpop.f32.mrf.mxu1  ;;  %4361 = vmatprep.subr.bf16.mxu1 %v8994_v37  ;;  %v8901_v37 = vld [vmem:[#allocation6 + $0x2dc] ss:$24 sps:$4 sm:$0xff]   ;;  %v8904_v42 = vld [vmem:[#allocation6 + $0x2ac] ss:$24 sps:$4 sm:$0xff]  }
 0x1ef   :  { %v2250_v3 = vadd.f32 %v2249_v45, %v2207_v61  ;;  %v8907_v45 = vld [vmem:[#allocation6 + $0x27c] ss:$24 sps:$4 sm:$0xff]   ;;  %v8941_v61 = vld [vmem:[#allocation6 + $0x728] ss:$24 sps:$4 sm:$0xff]  }
 0x1f0   :  { %v2251_v53 = vpop.f32.mrf.mxu1 }
 0x1f1   :  { %4362 = vmatpush2.bf16.msra.mxu1 %v8992_v43  ;;  %v2252_v13 = vadd.f32 %v2251_v53, %v2209_v62  ;;  %v8902_v43 = vld [vmem:[#allocation6 + $0x2a8] ss:$24 sps:$4 sm:$0xff]   ;;  %v8919_v53 = vld [vmem:[#allocation6 + $0x1ec] ss:$24 sps:$4 sm:$0xff]   ;;  %v8949_v62 = vld [vmem:[#allocation6 + $0x6fc] ss:$24 sps:$4 sm:$0xff]  }
 0x1f2   :  { %v2253_v55 = vpop.f32.mrf.mxu1  ;;  %4363 = vmatprep.subr.bf16.mxu1 %v9000_v46  ;;  %v8905_v46 = vld [vmem:[#allocation6 + $0x278] ss:$24 sps:$4 sm:$0xff]  }
 0x1f3   :  { %v2254_v54 = vadd.f32 %v2253_v55, %v2211_v2  ;;  %v8925_v55 = vld [vmem:[#allocation6 + $0x1bc] ss:$24 sps:$4 sm:$0xff]   ;;  %v8959_v2 = vld [vmem:[#allocation6 + $0x698] ss:$24 sps:$4 sm:$0xff]  }
 0x1f4   :  { %v2290_v44 = vpop.f32.mrf.mxu1 }
 0x1f5   :  { %4364 = vmatpush2.bf16.msra.mxu1 %v8998_v49  ;;  %v2291_v7 = vadd.f32 %v2290_v44, %v2248_v4  ;;  %v8913_v49 = vld [vmem:[#allocation6 + $0x21c] ss:$24 sps:$4 sm:$0xff]   ;;  %v8935_v44 = vld [vmem:[#allocation6 + $0x758] ss:$24 sps:$4 sm:$0xff]  }
 0x1f6   :  { %v2292_v38 = vpop.f32.mrf.mxu1  ;;  %4365 = vmatprep.subr.bf16.mxu1 %v9006_v52  ;;  %v8917_v52 = vld [vmem:[#allocation6 + $0x1e8] ss:$24 sps:$4 sm:$0xff]  }
 0x1f7   :  { %v2293_v5 = vadd.f32 %v2292_v38, %v2250_v3  ;;  %v2473_v11 = vmax.f32 %v2291_v7, 0.0  ;;  %v8961_v38 = vld [vmem:[#allocation6 + $0x69c] ss:$24 sps:$4 sm:$0xff]   ;;  %v8967_v3 = vld [vmem:[#allocation6 + $0x66c] ss:$24 sps:$4 sm:$0xff]  }
 0x1f8   :  { %v2294_v21 = vpop.f32.mrf.mxu1  ;;  %v8979_v7 = vld [vmem:[#allocation6 + $0x60c] ss:$24 sps:$4 sm:$0xff]  }
 0x1f9   :  { %v2295_v6 = vadd.f32 %v2294_v21, %v2252_v13  ;;  %4366 = vmatpush2.bf16.msra.mxu1 %v9004_v63  ;;  %v2474_v10 = vmax.f32 %v2293_v5, 0.0  ;;  %v8947_v63 = vld [vmem:[#allocation6 + $0x6f8] ss:$24 sps:$4 sm:$0xff]   ;;  %v8965_v13 = vld [vmem:[#allocation6 + $0x668] ss:$24 sps:$4 sm:$0xff]  }
 0x1fa   :  { %v2296_v27 = vpop.f32.mrf.mxu1  ;;  %4421 = vmatprep.subr.bf16.mxu1 %v9012_v0  ;;  %v8955_v0 = vld [vmem:[#allocation6 + $0x6cc] ss:$24 sps:$4 sm:$0xff]   ;;  %v8973_v21 = vld [vmem:[#allocation6 + $0x63c] ss:$24 sps:$4 sm:$0xff]  }
 0x1fb   :  { %v2297_v8 = vadd.f32 %v2296_v27, %v2254_v54  ;;  %v2479_v9 = vmax.f32 %v2295_v6, 0.0  ;;  %v8971_v54 = vld [vmem:[#allocation6 + $0x638] ss:$24 sps:$4 sm:$0xff]   ;;  %v10080_v27 = vsub.s32 5, %v10033_v33 }
 0x1fd   :  { %v2480_v23 = vmax.f32 %v2297_v8, 0.0  ;;  %v10073_v16 = vpack.c.bf16 %v2479_v9, %v2473_v11  ;;  %v8977_v8 = vld [vmem:[#allocation6 + $0x608] ss:$24 sps:$4 sm:$0xff]   ;;  %v8985_v11 = vld [vmem:[#allocation6 + $0x8dc] ss:$24 sps:$4 sm:$0xff]  }
 0x1ff   :  { %v10071_v15 = vpack.c.bf16 %v2480_v23, %v2474_v10  ;;  %v10083_v23 = vsub.s32 4, %v10033_v33 }
 0x201   :  { %4324 = vmatprep.mubr.bf16.mxu0 %v10071_v15 }
 0x202   :  { %4325 = vmatmul.mubr.bf16.vlgmr.msra.gmra.mxu0 %v10073_v16 }
 0x203   :  { %4379 = vmatpush1.bf16.msra.mxu0 %v8875_v14  ;;  %4410 = vmatprep.mubr.bf16.mxu0 %v10054_v36 }
 0x204   :  { %4380 = vmatprep.subr.bf16.mxu0 %v8880_v17 }
 0x207   :  { %4381 = vmatpush1.bf16.msra.mxu0 %v8878_v18  ;;  %v9691_v18 = vld [vmem:[#allocation4] sm:$0x3f] }
 0x208   :  { %4382 = vmatprep.subr.bf16.mxu0 %v8883_v19  ;;  %v474_v19 = vrot.slane %v9691_v18, %v10080_v27 }
 0x20b   :  { %4383 = vmatpush1.bf16.msra.mxu0 %v8881_v20  ;;  %v8983_v20 = vld [vmem:[#allocation6 + $0x8d8] ss:$24 sps:$4 sm:$0xff]  }
 0x20c   :  { %4384 = vmatprep.subr.bf16.mxu0 %v8886_v22  ;;  %v470_v22 = vrot.slane %v9691_v18, %v10083_v23  ;;  %v9025_v18 = vld [vmem:[#allocation6 + $0x788] ss:$24 sps:$4 sm:$0xff]  }
 0x20f   :  { %4385 = vmatpush1.bf16.msra.mxu0 %v8884_v24 }
 0x210   :  { %4386 = vmatprep.subr.bf16.mxu0 %v8889_v25  ;;  %v8991_v25 = vld [vmem:[#allocation6 + $0x8ac] ss:$24 sps:$4 sm:$0xff]  }
 0x213   :  { %4387 = vmatpush1.bf16.msra.mxu0 %v8887_v26 }
 0x214   :  { %4388 = vmatprep.subr.bf16.mxu0 %v8892_v29 }
 0x217   :  { %4389 = vmatpush1.bf16.msra.mxu0 %v8890_v30  ;;  %v8989_v30 = vld [vmem:[#allocation6 + $0x8a8] ss:$24 sps:$4 sm:$0xff]  }
 0x218   :  { %4390 = vmatprep.subr.bf16.mxu0 %v8895_v31 }
 0x21b   :  { %4391 = vmatpush1.bf16.msra.mxu0 %v8893_v32 }
 0x21c   :  { %4392 = vmatprep.subr.bf16.mxu0 %v8898_v34  ;;  %v8997_v34 = vld [vmem:[#allocation6 + $0x87c] ss:$24 sps:$4 sm:$0xff]  }
 0x21f   :  { %4393 = vmatpush1.bf16.msra.mxu0 %v8896_v35 }
 0x220   :  { %4394 = vmatprep.subr.bf16.mxu0 %v8901_v37 }
 0x223   :  { %4395 = vmatpush2.bf16.msra.mxu0 %v8899_v40  ;;  %v2333_v5 = vpop.f32.mrf.mxu0 }
 0x224   :  { %4396 = vmatprep.subr.bf16.mxu0 %v8904_v42  ;;  %v2334_v33 = vadd.f32 %v2333_v5, %v470_v22  ;;  %v9018_v5 = vld [vmem:[#allocation6 + $0x42c] ss:$24 sps:$4 sm:$0xff]  }
 0x225   :  { %v2335_v9 = vpop.f32.mrf.mxu0 }
 0x226   :  { %v2336_v29 = vadd.f32 %v2335_v9, %v474_v19  ;;  %v9024_v9 = vld [vmem:[#allocation6 + $0x3fc] ss:$24 sps:$4 sm:$0xff]  }
 0x227   :  { %4397 = vmatpush2.bf16.msra.mxu0 %v8902_v43  ;;  %v2337_v14 = vpop.f32.mrf.mxu0 }
 0x228   :  { %4398 = vmatprep.subr.bf16.mxu0 %v8907_v45  ;;  %v2338_v35 = vadd.f32 %v2337_v14, %v470_v22  ;;  %v9022_v14 = vld [vmem:[#allocation6 + $0x3f8] ss:$24 sps:$4 sm:$0xff]   ;;  %v9036_v22 = vld [vmem:[#allocation6 + $0x39c] ss:$24 sps:$4 sm:$0xff]  }
 0x229   :  { %v2339_v26 = vpop.f32.mrf.mxu0 }
 0x22a   :  { %v2340_v43 = vadd.f32 %v2339_v26, %v474_v19  ;;  %v9033_v19 = vld [vmem:[#allocation6 + $0x464] ss:$24 sps:$4 sm:$0xff]   ;;  %v9034_v26 = vld [vmem:[#allocation6 + $0x398] ss:$24 sps:$4 sm:$0xff]  }
 0x22b   :  { %4399 = vmatpush2.bf16.msra.mxu0 %v8905_v46 }
 0x22c   :  { %4400 = vmatprep.subr.bf16.mxu0 %v8910_v47  ;;  %v8995_v47 = vld [vmem:[#allocation6 + $0x878] ss:$24 sps:$4 sm:$0xff]  }
 0x22f   :  { %4401 = vmatpush2.bf16.msra.mxu0 %v8908_v48 }
 0x230   :  { %4402 = vmatprep.subr.bf16.mxu0 %v8913_v49 }
 0x233   :  { %4403 = vmatpush2.bf16.msra.mxu0 %v8911_v51 }
 0x234   :  { %4404 = vmatprep.subr.bf16.mxu0 %v8919_v53  ;;  %v2376_v4 = vpop.f32.mrf.mxu1  ;;  %v9003_v53 = vld [vmem:[#allocation6 + $0x84c] ss:$24 sps:$4 sm:$0xff]  }
 0x235   :  { %v2377_v40 = vadd.f32 %v2376_v4, %v2334_v33  ;;  %v9010_v4 = vld [vmem:[#allocation6 + $0x458] ss:$24 sps:$4 sm:$0xff]   ;;  %v9045_v33 = vld [vmem:[#allocation6 + $0x404] ss:$24 sps:$4 sm:$0xff]  }
 0x236   :  { %v2378_v6 = vpop.f32.mrf.mxu1 }
 0x237   :  { %4405 = vmatpush2.bf16.msra.mxu0 %v8917_v52  ;;  %v2379_v37 = vadd.f32 %v2378_v6, %v2336_v29  ;;  %v9013_v6 = vld [vmem:[#allocation6 + $0x7e8] ss:$24 sps:$4 sm:$0xff]   ;;  %v9042_v29 = vld [vmem:[#allocation6 + $0x36c] ss:$24 sps:$4 sm:$0xff]  }
 0x238   :  { %4406 = vmatprep.subr.bf16.mxu0 %v8925_v55  ;;  %v2380_v10 = vpop.f32.mrf.mxu1 }
 0x239   :  { %v2381_v45 = vadd.f32 %v2380_v10, %v2338_v35  ;;  %v9019_v10 = vld [vmem:[#allocation6 + $0x7b8] ss:$24 sps:$4 sm:$0xff]   ;;  %v9051_v35 = vld [vmem:[#allocation6 + $0x3d4] ss:$24 sps:$4 sm:$0xff]  }
 0x23a   :  { %v2382_v17 = vpop.f32.mrf.mxu1 }
 0x23b   :  { %4407 = vmatpush2.bf16.msra.mxu0 %v8923_v12  ;;  %v2383_v52 = vadd.f32 %v2382_v17, %v2340_v43  ;;  %v9030_v17 = vld [vmem:[#allocation6 + $0x3cc] ss:$24 sps:$4 sm:$0xff]  }
 0x23c   :  { %4408 = vmatprep.subr.bf16.mxu0 %v8931_v56  ;;  %v2462_v24 = vpop.f32.mrf.mxu1  ;;  %v9057_v43 = vld [vmem:[#allocation6 + $0x3a4] ss:$24 sps:$4 sm:$0xff]  }
 0x23e   :  { %v2464_v31 = vpop.f32.mrf.mxu1 }
 0x23f   :  { %4409 = vmatpush2.bf16.msra.mxu0 %v8929_v57 }
 0x240   :  { %4464 = vmatprep.subr.bf16.mxu0 %v8937_v59  ;;  %v2466_v49 = vpop.f32.mrf.mxu1 }
 0x242   :  { %4411 = vmatmul.mubr.bf16.vlgmr.msra.gmra.mxu0 %v10058_v50 }
 0x243   :  { %4465 = vmatpush1.bf16.msra.mxu0 %v8935_v44  ;;  %v9001_v44 = vld [vmem:[#allocation6 + $0x848] ss:$24 sps:$4 sm:$0xff]  }
 0x244   :  { %4466 = vmatprep.subr.bf16.mxu0 %v8943_v60 }
 0x247   :  { %4467 = vmatpush1.bf16.msra.mxu0 %v8941_v61  ;;  %v2468_v61 = vpop.f32.mrf.mxu1 }
 0x248   :  { %4468 = vmatprep.subr.bf16.mxu0 %v8949_v62  ;;  %v9009_v62 = vld [vmem:[#allocation6 + $0x81c] ss:$24 sps:$4 sm:$0xff]  }
 0x24b   :  { %4469 = vmatpush1.bf16.msra.mxu0 %v8947_v63 }
 0x24c   :  { %4470 = vmatprep.subr.bf16.mxu0 %v8955_v0 }
 0x24f   :  { %4471 = vmatpush1.bf16.msra.mxu0 %v8953_v1 }
 0x250   :  { %4472 = vmatprep.subr.bf16.mxu0 %v8961_v38 }
 0x253   :  { %4473 = vmatpush1.bf16.msra.mxu0 %v8959_v2  ;;  %v9007_v2 = vld [vmem:[#allocation6 + $0x818] ss:$24 sps:$4 sm:$0xff]  }
 0x254   :  { %4474 = vmatprep.subr.bf16.mxu0 %v8967_v3 }
 0x257   :  { %4475 = vmatpush1.bf16.msra.mxu0 %v8965_v13 }
 0x258   :  { %4476 = vmatprep.subr.bf16.mxu0 %v8973_v21  ;;  %v9015_v21 = vld [vmem:[#allocation6 + $0x7ec] ss:$24 sps:$4 sm:$0xff]  }
 0x25b   :  { %4477 = vmatpush1.bf16.msra.mxu0 %v8971_v54 }
 0x25c   :  { %4478 = vmatprep.subr.bf16.mxu0 %v8979_v7  ;;  %v9021_v7 = vld [vmem:[#allocation6 + $0x7bc] ss:$24 sps:$4 sm:$0xff]  }
 0x25f   :  { %4479 = vmatpush1.bf16.msra.mxu0 %v8977_v8  ;;  %v9016_v8 = vld [vmem:[#allocation6 + $0x428] ss:$24 sps:$4 sm:$0xff]  }
 0x260   :  { %4480 = vmatprep.subr.bf16.mxu0 %v8985_v11  ;;  %v9027_v11 = vld [vmem:[#allocation6 + $0x78c] ss:$24 sps:$4 sm:$0xff]  }
 0x263   :  { %4481 = vmatpush2.bf16.msra.mxu0 %v8983_v20  ;;  %v2419_v32 = vpop.f32.mrf.mxu0  ;;  %v9028_v20 = vld [vmem:[#allocation6 + $0x3c8] ss:$24 sps:$4 sm:$0xff]  }
 0x264   :  { %4482 = vmatprep.subr.bf16.mxu0 %v8991_v25  ;;  %v2420_v48 = vadd.f32 %v2419_v32, %v2377_v40  ;;  %v9039_v25 = vld [vmem:[#allocation6 + $0x434] ss:$24 sps:$4 sm:$0xff]  }
 0x265   :  { %v2421_v42 = vpop.f32.mrf.mxu0  ;;  %v9048_v32 = vld [vmem:[#allocation6 + $0x33c] ss:$24 sps:$4 sm:$0xff]   ;;  %v9054_v40 = vld [vmem:[#allocation6 + $0x30c] ss:$24 sps:$4 sm:$0xff]  }
 0x266   :  { %v2422_v46 = vadd.f32 %v2421_v42, %v2379_v37  ;;  %v2463_v60 = vadd.f32 %v2462_v24, %v2420_v48  ;;  %v9031_v24 = vld [vmem:[#allocation6 + $0x460] ss:$24 sps:$4 sm:$0xff]   ;;  %v9049_v42 = vld [vmem:[#allocation6 + $0x3d0] ss:$24 sps:$4 sm:$0xff]  }
 0x267   :  { %4483 = vmatpush2.bf16.msra.mxu0 %v8989_v30  ;;  %v2423_v51 = vpop.f32.mrf.mxu0  ;;  %v9037_v30 = vld [vmem:[#allocation6 + $0x430] ss:$24 sps:$4 sm:$0xff]  }
 0x268   :  { %4484 = vmatprep.subr.bf16.mxu0 %v8997_v34  ;;  %v2424_v55 = vadd.f32 %v2423_v51, %v2381_v45  ;;  %v2465_v56 = vadd.f32 %v2464_v31, %v2422_v46  ;;  %v2475_v3 = vmax.f32 %v2463_v60, 0.0  ;;  %v9040_v31 = vld [vmem:[#allocation6 + $0x368] ss:$24 sps:$4 sm:$0xff]   ;;  %v9046_v37 = vld [vmem:[#allocation6 + $0x338] ss:$24 sps:$4 sm:$0xff]  }
 0x269   :  { %v2425_v12 = vpop.f32.mrf.mxu0  ;;  %v9043_v34 = vld [vmem:[#allocation6 + $0x400] ss:$24 sps:$4 sm:$0xff]   ;;  %v9060_v45 = vld [vmem:[#allocation6 + $0x5dc] ss:$24 sps:$4 sm:$0xff]   ;;  %v9061_v51 = vld [vmem:[#allocation6 + $0x370] ss:$24 sps:$4 sm:$0xff]  }
 0x26a   :  { %v2467_v57 = vadd.f32 %v2466_v49, %v2424_v55  ;;  %v2426_v59 = vadd.f32 %v2425_v12, %v2383_v52  ;;  %v2476_v1 = vmax.f32 %v2465_v56, 0.0  ;;  %v9055_v46 = vld [vmem:[#allocation6 + $0x3a0] ss:$24 sps:$4 sm:$0xff]   ;;  %v9066_v49 = vld [vmem:[#allocation6 + $0x5ac] ss:$24 sps:$4 sm:$0xff]  }
 0x26b   :  { %4485 = vmatpush2.bf16.msra.mxu0 %v8995_v47  ;;  %v9063_v47 = vld [vmem:[#allocation6 + $0x374] ss:$24 sps:$4 sm:$0xff]   ;;  %v9058_v48 = vld [vmem:[#allocation6 + $0x5d8] ss:$24 sps:$4 sm:$0xff]   ;;  %v9064_v52 = vld [vmem:[#allocation6 + $0x5a8] ss:$24 sps:$4 sm:$0xff]  }
 0x26c   :  { %4486 = vmatprep.subr.bf16.mxu0 %v9003_v53  ;;  %v2469_v63 = vadd.f32 %v2468_v61, %v2426_v59  ;;  %v2481_v0 = vmax.f32 %v2467_v57, 0.0  ;;  %v9069_v53 = vld [vmem:[#allocation6 + $0x344] ss:$24 sps:$4 sm:$0xff]   ;;  %v9067_v12 = vld [vmem:[#allocation6 + $0x340] ss:$24 sps:$4 sm:$0xff]  }
 0x26d   :  { %v9072_v55 = vld [vmem:[#allocation6 + $0x57c] ss:$24 sps:$4 sm:$0xff]   ;;  %v9070_v57 = vld [vmem:[#allocation6 + $0x578] ss:$24 sps:$4 sm:$0xff]   ;;  %v9078_v59 = vld [vmem:[#allocation6 + $0x54c] ss:$24 sps:$4 sm:$0xff]  }
 0x26e   :  { %v2482_v38 = vmax.f32 %v2469_v63, 0.0  ;;  %v10089_v54 = vpack.c.bf16 %v2481_v0, %v2475_v3  ;;  %v9075_v56 = vld [vmem:[#allocation6 + $0x314] ss:$24 sps:$4 sm:$0xff]   ;;  %v9081_v60 = vld [vmem:[#allocation6 + $0x5e4] ss:$24 sps:$4 sm:$0xff]  }
 0x26f   :  { %4487 = vmatpush2.bf16.msra.mxu0 %v9001_v44  ;;  %v9073_v44 = vld [vmem:[#allocation6 + $0x310] ss:$24 sps:$4 sm:$0xff]   ;;  %v9079_v63 = vld [vmem:[#allocation6 + $0x5e0] ss:$24 sps:$4 sm:$0xff]   ;;  %v9087_v0 = vld [vmem:[#allocation6 + $0x5b4] ss:$24 sps:$4 sm:$0xff]  }
 0x270   :  { %4488 = vmatprep.subr.bf16.mxu0 %v9009_v62  ;;  %v10087_v13 = vpack.c.bf16 %v2482_v38, %v2476_v1  ;;  %v9076_v61 = vld [vmem:[#allocation6 + $0x548] ss:$24 sps:$4 sm:$0xff]   ;;  %v9084_v62 = vld [vmem:[#allocation6 + $0x51c] ss:$24 sps:$4 sm:$0xff]   ;;  %v9082_v1 = vld [vmem:[#allocation6 + $0x518] ss:$24 sps:$4 sm:$0xff]  }
 0x271   :  { %v9090_v38 = vld [vmem:[#allocation6 + $0x4ec] ss:$24 sps:$4 sm:$0xff]  }
 0x272   :  { %4367 = vmatprep.mubr.bf16.mxu1 %v10087_v13  ;;  %4496 = vmatprep.mubr.bf16.mxu0 %v10087_v13  ;;  %v9093_v3 = vld [vmem:[#allocation6 + $0x584] ss:$24 sps:$4 sm:$0xff]  }
 0x273   :  { %4489 = vmatpush2.bf16.msra.mxu0 %v9007_v2  ;;  %4368 = vmatmul.mubr.bf16.vlgmr.msra.gmra.mxu1 %v10089_v54  ;;  %v9085_v2 = vld [vmem:[#allocation6 + $0x5b0] ss:$24 sps:$4 sm:$0xff]  }
 0x274   :  { %4422 = vmatpush1.bf16.msra.mxu1 %v9010_v4  ;;  %4490 = vmatprep.subr.bf16.mxu0 %v9015_v21  ;;  %v9088_v4 = vld [vmem:[#allocation6 + $0x4e8] ss:$24 sps:$4 sm:$0xff]   ;;  %v9096_v21 = vld [vmem:[#allocation6 + $0x4bc] ss:$24 sps:$4 sm:$0xff]  }
 0x275   :  { %4453 = vmatprep.mubr.bf16.mxu1 %v10071_v15  ;;  %4423 = vmatprep.subr.bf16.mxu1 %v9018_v5  ;;  %v9091_v5 = vld [vmem:[#allocation6 + $0x580] ss:$24 sps:$4 sm:$0xff]  }
 0x277   :  { %4491 = vmatpush2.bf16.msra.mxu0 %v9013_v6  ;;  %v9099_v6 = vld [vmem:[#allocation6 + $0x554] ss:$24 sps:$4 sm:$0xff]  }
 0x278   :  { %4492 = vmatprep.subr.bf16.mxu0 %v9021_v7  ;;  %4424 = vmatpush1.bf16.msra.mxu1 %v9016_v8  ;;  %v9094_v7 = vld [vmem:[#allocation6 + $0x4b8] ss:$24 sps:$4 sm:$0xff]   ;;  %v9102_v8 = vld [vmem:[#allocation6 + $0x48c] ss:$24 sps:$4 sm:$0xff]  }
 0x279   :  { %4425 = vmatprep.subr.bf16.mxu1 %v9024_v9  ;;  %v9097_v9 = vld [vmem:[#allocation6 + $0x550] ss:$24 sps:$4 sm:$0xff]  }
 0x27b   :  { %4493 = vmatpush2.bf16.msra.mxu0 %v9019_v10  ;;  %v9105_v10 = vld [vmem:[#allocation6 + $0x524] ss:$24 sps:$4 sm:$0xff]  }
 0x27c   :  { %4494 = vmatprep.subr.bf16.mxu0 %v9027_v11  ;;  %4426 = vmatpush1.bf16.msra.mxu1 %v9022_v14  ;;  %v9100_v11 = vld [vmem:[#allocation6 + $0x488] ss:$24 sps:$4 sm:$0xff]   ;;  %v9108_v14 = vld [vmem:[#allocation6 + $0x164] ss:$24 sps:$4 sm:$0xff]  }
 0x27d   :  { %4427 = vmatprep.subr.bf16.mxu1 %v9030_v17  ;;  %v9103_v17 = vld [vmem:[#allocation6 + $0x520] ss:$24 sps:$4 sm:$0xff]  }
 0x27f   :  { %4495 = vmatpush2.bf16.msra.mxu0 %v9025_v18  ;;  %v9111_v18 = vld [vmem:[#allocation6 + $0x4f4] ss:$24 sps:$4 sm:$0xff]  }
 0x280   :  { %4550 = vmatprep.subr.bf16.mxu0 %v9033_v19  ;;  %4428 = vmatpush1.bf16.msra.mxu1 %v9028_v20  ;;  %v9106_v19 = vld [vmem:[#allocation6 + $0x160] ss:$24 sps:$4 sm:$0xff]   ;;  %v9114_v20 = vld [vmem:[#allocation6 + $0x134] ss:$24 sps:$4 sm:$0xff]  }
 0x281   :  { %4429 = vmatprep.subr.bf16.mxu1 %v9036_v22  ;;  %v9109_v22 = vld [vmem:[#allocation6 + $0x4f0] ss:$24 sps:$4 sm:$0xff]  }
 0x282   :  { %4497 = vmatmul.mubr.bf16.vlgmr.msra.gmra.mxu0 %v10089_v54 }
 0x283   :  { %4551 = vmatpush1.bf16.msra.mxu0 %v9031_v24  ;;  %4582 = vmatprep.mubr.bf16.mxu0 %v10071_v15  ;;  %v9052_v15 = vld [vmem:[#allocation6 + $0x308] ss:$24 sps:$4 sm:$0xff]   ;;  %v9117_v24 = vld [vmem:[#allocation6 + $0x4c4] ss:$24 sps:$4 sm:$0xff]  }
 0x284   :  { %4552 = vmatprep.subr.bf16.mxu0 %v9039_v25  ;;  %4430 = vmatpush1.bf16.msra.mxu1 %v9034_v26  ;;  %v9112_v25 = vld [vmem:[#allocation6 + $0x130] ss:$24 sps:$4 sm:$0xff]   ;;  %v9120_v26 = vld [vmem:[#allocation6 + $0x104] ss:$24 sps:$4 sm:$0xff]  }
 0x285   :  { %4431 = vmatprep.subr.bf16.mxu1 %v9042_v29  ;;  %v9115_v29 = vld [vmem:[#allocation6 + $0x4c0] ss:$24 sps:$4 sm:$0xff]  }
 0x287   :  { %4553 = vmatpush1.bf16.msra.mxu0 %v9037_v30  ;;  %v9123_v30 = vld [vmem:[#allocation6 + $0x494] ss:$24 sps:$4 sm:$0xff]  }
 0x288   :  { %4554 = vmatprep.subr.bf16.mxu0 %v9045_v33  ;;  %4432 = vmatpush1.bf16.msra.mxu1 %v9040_v31  ;;  %v9118_v33 = vld [vmem:[#allocation6 + $0x100] ss:$24 sps:$4 sm:$0xff]   ;;  %v9126_v31 = vld [vmem:[#allocation6 + $0xd4] ss:$24 sps:$4 sm:$0xff]  }
 0x289   :  { %4433 = vmatprep.subr.bf16.mxu1 %v9048_v32  ;;  %v9121_v32 = vld [vmem:[#allocation6 + $0x490] ss:$24 sps:$4 sm:$0xff]  }
 0x28b   :  { %4555 = vmatpush1.bf16.msra.mxu0 %v9043_v34  ;;  %v9177_v34 = vld [vmem:[#allocation9 + $0x154] ss:$24 sps:$4 sm:$0xff]  }
 0x28c   :  { %4556 = vmatprep.subr.bf16.mxu0 %v9051_v35  ;;  %4434 = vmatpush1.bf16.msra.mxu1 %v9046_v37  ;;  %v9124_v35 = vld [vmem:[#allocation6 + $0xd0] ss:$24 sps:$4 sm:$0xff]   ;;  %v9129_v37 = vld [vmem:[#allocation6 + $0xa4] ss:$24 sps:$4 sm:$0xff]  }
 0x28d   :  { %4435 = vmatprep.subr.bf16.mxu1 %v9054_v40  ;;  %v9183_v40 = vld [vmem:[#allocation9 + $0x124] ss:$24 sps:$4 sm:$0xff]  }
 0x28f   :  { %4557 = vmatpush1.bf16.msra.mxu0 %v9049_v42  ;;  %v9127_v42 = vld [vmem:[#allocation6 + $0xa0] ss:$24 sps:$4 sm:$0xff]  }
 0x290   :  { %4558 = vmatprep.subr.bf16.mxu0 %v9057_v43  ;;  %4436 = vmatpush1.bf16.msra.mxu1 %v9052_v15  ;;  %v9132_v43 = vld [vmem:[#allocation6 + $0x74] ss:$24 sps:$4 sm:$0xff]   ;;  %v9181_v15 = vld [vmem:[#allocation9 + $0x120] ss:$24 sps:$4 sm:$0xff]  }
 0x291   :  { %4437 = vmatprep.subr.bf16.mxu1 %v9060_v45  ;;  %v9189_v45 = vld [vmem:[#allocation9 + $0xf4] ss:$24 sps:$4 sm:$0xff]  }
 0x293   :  { %4559 = vmatpush1.bf16.msra.mxu0 %v9055_v46  ;;  %v9130_v46 = vld [vmem:[#allocation6 + $0x70] ss:$24 sps:$4 sm:$0xff]  }
 0x294   :  { %4560 = vmatprep.subr.bf16.mxu0 %v9063_v47  ;;  %4438 = vmatpush2.bf16.msra.mxu1 %v9058_v48  ;;  %v9135_v47 = vld [vmem:[#allocation6 + $0x44] ss:$24 sps:$4 sm:$0xff]   ;;  %v9187_v48 = vld [vmem:[#allocation9 + $0xf0] ss:$24 sps:$4 sm:$0xff]  }
 0x295   :  { %4439 = vmatprep.subr.bf16.mxu1 %v9066_v49  ;;  %v9195_v49 = vld [vmem:[#allocation9 + $0xc4] ss:$24 sps:$4 sm:$0xff]  }
 0x297   :  { %4561 = vmatpush1.bf16.msra.mxu0 %v9061_v51  ;;  %v9133_v51 = vld [vmem:[#allocation6 + $0x40] ss:$24 sps:$4 sm:$0xff]  }
 0x298   :  { %4562 = vmatprep.subr.bf16.mxu0 %v9069_v53  ;;  %4440 = vmatpush2.bf16.msra.mxu1 %v9064_v52  ;;  %v9138_v53 = vld [vmem:[#allocation6 + $0x14] ss:$24 sps:$4 sm:$0xff]  }
 0x299   :  { %4441 = vmatprep.subr.bf16.mxu1 %v9072_v55  ;;  %v9201_v52 = vld [vmem:[#allocation9 + $0x94] ss:$24 sps:$4 sm:$0xff]  }
 0x29a   :  { %v9136_v55 = vld [vmem:[#allocation6 + $0x10] ss:$24 sps:$4 sm:$0xff]  }
 0x29b   :  { %4563 = vmatpush1.bf16.msra.mxu0 %v9067_v12  ;;  %v9141_v12 = vld [vmem:[#allocation6 + $0x2e4] ss:$24 sps:$4 sm:$0xff]  }
 0x29c   :  { %4564 = vmatprep.subr.bf16.mxu0 %v9075_v56  ;;  %4442 = vmatpush2.bf16.msra.mxu1 %v9070_v57  ;;  %v9199_v56 = vld [vmem:[#allocation9 + $0x90] ss:$24 sps:$4 sm:$0xff]   ;;  %v9207_v57 = vld [vmem:[#allocation9 + $0x64] ss:$24 sps:$4 sm:$0xff]  }
 0x29d   :  { %4443 = vmatprep.subr.bf16.mxu1 %v9078_v59  ;;  %v9139_v59 = vld [vmem:[#allocation6 + $0x2e0] ss:$24 sps:$4 sm:$0xff]  }
 0x29f   :  { %4565 = vmatpush1.bf16.msra.mxu0 %v9073_v44  ;;  %v9144_v44 = vld [vmem:[#allocation6 + $0x2b4] ss:$24 sps:$4 sm:$0xff]  }
 0x2a0   :  { %4566 = vmatprep.subr.bf16.mxu0 %v9081_v60  ;;  %4444 = vmatpush2.bf16.msra.mxu1 %v9076_v61  ;;  %v9205_v60 = vld [vmem:[#allocation9 + $0x60] ss:$24 sps:$4 sm:$0xff]   ;;  %v9213_v61 = vld [vmem:[#allocation9 + $0x34] ss:$24 sps:$4 sm:$0xff]  }
 0x2a1   :  { %4445 = vmatprep.subr.bf16.mxu1 %v9084_v62  ;;  %v9142_v62 = vld [vmem:[#allocation6 + $0x2b0] ss:$24 sps:$4 sm:$0xff]  }
 0x2a3   :  { %4567 = vmatpush2.bf16.msra.mxu0 %v9079_v63  ;;  %v9147_v63 = vld [vmem:[#allocation6 + $0x284] ss:$24 sps:$4 sm:$0xff]  }
 0x2a4   :  { %4568 = vmatprep.subr.bf16.mxu0 %v9087_v0  ;;  %4446 = vmatpush2.bf16.msra.mxu1 %v9082_v1  ;;  %v9211_v0 = vld [vmem:[#allocation9 + $0x30] ss:$24 sps:$4 sm:$0xff]   ;;  %v9219_v1 = vld [vmem:[#allocation9 + $0x4] ss:$24 sps:$4 sm:$0xff]  }
 0x2a5   :  { %4447 = vmatprep.subr.bf16.mxu1 %v9090_v38  ;;  %v9145_v38 = vld [vmem:[#allocation6 + $0x280] ss:$24 sps:$4 sm:$0xff]  }
 0x2a7   :  { %4569 = vmatpush2.bf16.msra.mxu0 %v9085_v2  ;;  %v9150_v2 = vld [vmem:[#allocation6 + $0x254] ss:$24 sps:$4 sm:$0xff]  }
 0x2a8   :  { %4570 = vmatprep.subr.bf16.mxu0 %v9093_v3  ;;  %4448 = vmatpush2.bf16.msra.mxu1 %v9088_v4  ;;  %v9217_v3 = vld [vmem:[#allocation9] ss:$24 sps:$4 sm:$0xff]   ;;  %v9225_v4 = vld [vmem:[#allocation9 + $0x2d4] ss:$24 sps:$4 sm:$0xff]  }
 0x2a9   :  { %4449 = vmatprep.subr.bf16.mxu1 %v9096_v21  ;;  %v9148_v21 = vld [vmem:[#allocation6 + $0x250] ss:$24 sps:$4 sm:$0xff]  }
 0x2ab   :  { %4571 = vmatpush2.bf16.msra.mxu0 %v9091_v5  ;;  %v9153_v5 = vld [vmem:[#allocation6 + $0x224] ss:$24 sps:$4 sm:$0xff]  }
 0x2ac   :  { %4572 = vmatprep.subr.bf16.mxu0 %v9099_v6  ;;  %4450 = vmatpush2.bf16.msra.mxu1 %v9094_v7  ;;  %v9223_v6 = vld [vmem:[#allocation9 + $0x2d0] ss:$24 sps:$4 sm:$0xff]   ;;  %v9231_v7 = vld [vmem:[#allocation9 + $0x2a4] ss:$24 sps:$4 sm:$0xff]  }
 0x2ad   :  { %4451 = vmatprep.subr.bf16.mxu1 %v9102_v8  ;;  %v9151_v8 = vld [vmem:[#allocation6 + $0x220] ss:$24 sps:$4 sm:$0xff]  }
 0x2af   :  { %4573 = vmatpush2.bf16.msra.mxu0 %v9097_v9  ;;  %v9156_v9 = vld [vmem:[#allocation6 + $0x1f4] ss:$24 sps:$4 sm:$0xff]  }
 0x2b0   :  { %4574 = vmatprep.subr.bf16.mxu0 %v9105_v10  ;;  %4452 = vmatpush2.bf16.msra.mxu1 %v9100_v11  ;;  %v9229_v10 = vld [vmem:[#allocation9 + $0x2a0] ss:$24 sps:$4 sm:$0xff]   ;;  %v9237_v11 = vld [vmem:[#allocation9 + $0x274] ss:$24 sps:$4 sm:$0xff]  }
 0x2b1   :  { %4507 = vmatprep.subr.bf16.mxu1 %v9108_v14  ;;  %v9154_v14 = vld [vmem:[#allocation6 + $0x1f0] ss:$24 sps:$4 sm:$0xff]  }
 0x2b3   :  { %4575 = vmatpush2.bf16.msra.mxu0 %v9103_v17  ;;  %4454 = vmatmul.mubr.bf16.vlgmr.msra.gmra.mxu1 %v10073_v16  ;;  %v9159_v17 = vld [vmem:[#allocation6 + $0x1c4] ss:$24 sps:$4 sm:$0xff]  }
 0x2b4   :  { %4576 = vmatprep.subr.bf16.mxu0 %v9111_v18  ;;  %4508 = vmatpush1.bf16.msra.mxu1 %v9106_v19  ;;  %v9235_v18 = vld [vmem:[#allocation9 + $0x270] ss:$24 sps:$4 sm:$0xff]   ;;  %v9243_v19 = vld [vmem:[#allocation9 + $0x244] ss:$24 sps:$4 sm:$0xff]  }
 0x2b5   :  { %4539 = vmatprep.mubr.bf16.mxu1 %v10054_v36  ;;  %4509 = vmatprep.subr.bf16.mxu1 %v9114_v20  ;;  %v9175_v36 = vld [vmem:[#allocation9 + $0x150] ss:$24 sps:$4 sm:$0xff]  }
 0x2b6   :  { %v9157_v20 = vld [vmem:[#allocation6 + $0x1c0] ss:$24 sps:$4 sm:$0xff]  }
 0x2b7   :  { %4577 = vmatpush2.bf16.msra.mxu0 %v9109_v22  ;;  %v9162_v22 = vld [vmem:[#allocation6 + $0x194] ss:$24 sps:$4 sm:$0xff]  }
 0x2b8   :  { %4578 = vmatprep.subr.bf16.mxu0 %v9117_v24  ;;  %4510 = vmatpush1.bf16.msra.mxu1 %v9112_v25  ;;  %v9241_v24 = vld [vmem:[#allocation9 + $0x240] ss:$24 sps:$4 sm:$0xff]   ;;  %v9249_v25 = vld [vmem:[#allocation9 + $0x214] ss:$24 sps:$4 sm:$0xff]  }
 0x2b9   :  { %4511 = vmatprep.subr.bf16.mxu1 %v9120_v26  ;;  %v9160_v26 = vld [vmem:[#allocation6 + $0x190] ss:$24 sps:$4 sm:$0xff]  }
 0x2bb   :  { %4579 = vmatpush2.bf16.msra.mxu0 %v9115_v29  ;;  %v9165_v29 = vld [vmem:[#allocation6 + $0x764] ss:$24 sps:$4 sm:$0xff]  }
 0x2bc   :  { %4580 = vmatprep.subr.bf16.mxu0 %v9123_v30  ;;  %4512 = vmatpush1.bf16.msra.mxu1 %v9118_v33  ;;  %v9247_v30 = vld [vmem:[#allocation9 + $0x210] ss:$24 sps:$4 sm:$0xff]   ;;  %v9252_v33 = vld [vmem:[#allocation9 + $0x1e4] ss:$24 sps:$4 sm:$0xff]  }
 0x2bd   :  { %4513 = vmatprep.subr.bf16.mxu1 %v9126_v31  ;;  %v9163_v31 = vld [vmem:[#allocation6 + $0x760] ss:$24 sps:$4 sm:$0xff]  }
 0x2bf   :  { %4581 = vmatpush2.bf16.msra.mxu0 %v9121_v32  ;;  %v9168_v32 = vld [vmem:[#allocation6 + $0x734] ss:$24 sps:$4 sm:$0xff]  }
 0x2c0   :  { %6402 = vmatprep.subr.bf16.mxu0 %v9177_v34  ;;  %4514 = vmatpush1.bf16.msra.mxu1 %v9124_v35  ;;  %v9250_v34 = vld [vmem:[#allocation9 + $0x1e0] ss:$24 sps:$4 sm:$0xff]   ;;  %v9255_v35 = vld [vmem:[#allocation9 + $0x1b4] ss:$24 sps:$4 sm:$0xff]  }
 0x2c1   :  { %4515 = vmatprep.subr.bf16.mxu1 %v9129_v37  ;;  %v9166_v37 = vld [vmem:[#allocation6 + $0x730] ss:$24 sps:$4 sm:$0xff]  }
 0x2c2   :  { %4583 = vmatmul.mubr.bf16.vlgmr.msra.gmra.mxu0 %v10073_v16  ;;  %v9193_v16 = vld [vmem:[#allocation9 + $0xc0] ss:$24 sps:$4 sm:$0xff]  }
 0x2c3   :  { %6403 = vmatpush1.bf16.msra.mxu0 %v9175_v36  ;;  %v9171_v36 = vld [vmem:[#allocation6 + $0x704] ss:$24 sps:$4 sm:$0xff]  }
 0x2c4   :  { %6404 = vmatprep.subr.bf16.mxu0 %v9183_v40  ;;  %4516 = vmatpush1.bf16.msra.mxu1 %v9127_v42  ;;  %v9253_v40 = vld [vmem:[#allocation9 + $0x1b0] ss:$24 sps:$4 sm:$0xff]   ;;  %v9258_v42 = vld [vmem:[#allocation9 + $0x184] ss:$24 sps:$4 sm:$0xff]  }
 0x2c5   :  { %4517 = vmatprep.subr.bf16.mxu1 %v9132_v43  ;;  %v9169_v43 = vld [vmem:[#allocation6 + $0x700] ss:$24 sps:$4 sm:$0xff]  }
 0x2c7   :  { %6405 = vmatpush1.bf16.msra.mxu0 %v9181_v15  ;;  %v9174_v15 = vld [vmem:[#allocation6 + $0x6d4] ss:$24 sps:$4 sm:$0xff]  }
 0x2c8   :  { %6406 = vmatprep.subr.bf16.mxu0 %v9189_v45  ;;  %4518 = vmatpush1.bf16.msra.mxu1 %v9130_v46  ;;  %v9256_v45 = vld [vmem:[#allocation9 + $0x180] ss:$24 sps:$4 sm:$0xff]  }
 0x2c9   :  { %4519 = vmatprep.subr.bf16.mxu1 %v9135_v47  ;;  %v9180_v46 = vld [vmem:[#allocation6 + $0x6a4] ss:$24 sps:$4 sm:$0xff]   ;;  %v9186_v47 = vld [vmem:[#allocation6 + $0x674] ss:$24 sps:$4 sm:$0xff]  }
 0x2cb   :  { %6407 = vmatpush1.bf16.msra.mxu0 %v9187_v48  ;;  %v9184_v48 = vld [vmem:[#allocation6 + $0x670] ss:$24 sps:$4 sm:$0xff]  }
 0x2cc   :  { %6408 = vmatprep.subr.bf16.mxu0 %v9195_v49  ;;  %4520 = vmatpush1.bf16.msra.mxu1 %v9133_v51  ;;  %v9192_v49 = vld [vmem:[#allocation6 + $0x644] ss:$24 sps:$4 sm:$0xff]   ;;  %v9190_v51 = vld [vmem:[#allocation6 + $0x640] ss:$24 sps:$4 sm:$0xff]  }
 0x2cd   :  { %4521 = vmatprep.subr.bf16.mxu1 %v9138_v53  ;;  %v9198_v53 = vld [vmem:[#allocation6 + $0x614] ss:$24 sps:$4 sm:$0xff]  }
 0x2cf   :  { %6409 = vmatpush1.bf16.msra.mxu0 %v9193_v16  ;;  %v9196_v16 = vld [vmem:[#allocation6 + $0x610] ss:$24 sps:$4 sm:$0xff]  }
 0x2d0   :  { %6410 = vmatprep.subr.bf16.mxu0 %v9201_v52  ;;  %4522 = vmatpush1.bf16.msra.mxu1 %v9136_v55  ;;  %v9204_v52 = vld [vmem:[#allocation6 + $0x8e4] ss:$24 sps:$4 sm:$0xff]   ;;  %v9202_v55 = vld [vmem:[#allocation6 + $0x8e0] ss:$24 sps:$4 sm:$0xff]  }
 0x2d1   :  { %4523 = vmatprep.subr.bf16.mxu1 %v9141_v12  ;;  %v9210_v12 = vld [vmem:[#allocation6 + $0x8b4] ss:$24 sps:$4 sm:$0xff]  }
 0x2d3   :  { %6411 = vmatpush1.bf16.msra.mxu0 %v9199_v56  ;;  %v9208_v56 = vld [vmem:[#allocation6 + $0x8b0] ss:$24 sps:$4 sm:$0xff]  }
 0x2d4   :  { %6412 = vmatprep.subr.bf16.mxu0 %v9207_v57  ;;  %4524 = vmatpush2.bf16.msra.mxu1 %v9139_v59  ;;  %v9216_v57 = vld [vmem:[#allocation6 + $0x884] ss:$24 sps:$4 sm:$0xff]   ;;  %v9214_v59 = vld [vmem:[#allocation6 + $0x880] ss:$24 sps:$4 sm:$0xff]  }
 0x2d5   :  { %4525 = vmatprep.subr.bf16.mxu1 %v9144_v44  ;;  %v9222_v44 = vld [vmem:[#allocation6 + $0x854] ss:$24 sps:$4 sm:$0xff]  }
 0x2d7   :  { %6413 = vmatpush1.bf16.msra.mxu0 %v9205_v60  ;;  %v9220_v60 = vld [vmem:[#allocation6 + $0x850] ss:$24 sps:$4 sm:$0xff]  }
 0x2d8   :  { %6414 = vmatprep.subr.bf16.mxu0 %v9213_v61  ;;  %4526 = vmatpush2.bf16.msra.mxu1 %v9142_v62  ;;  %v9228_v61 = vld [vmem:[#allocation6 + $0x824] ss:$24 sps:$4 sm:$0xff]   ;;  %v9226_v62 = vld [vmem:[#allocation6 + $0x820] ss:$24 sps:$4 sm:$0xff]  }
 0x2d9   :  { %4527 = vmatprep.subr.bf16.mxu1 %v9147_v63  ;;  %v9234_v63 = vld [vmem:[#allocation6 + $0x7f4] ss:$24 sps:$4 sm:$0xff]  }
 0x2db   :  { %6415 = vmatpush1.bf16.msra.mxu0 %v9211_v0  ;;  %v9232_v0 = vld [vmem:[#allocation6 + $0x7f0] ss:$24 sps:$4 sm:$0xff]  }
 0x2dc   :  { %6416 = vmatprep.subr.bf16.mxu0 %v9219_v1  ;;  %4528 = vmatpush2.bf16.msra.mxu1 %v9145_v38  ;;  %v4283_v1 = vpop.f32.mrf.mxu1  ;;  %v9240_v38 = vld [vmem:[#allocation6 + $0x7c4] ss:$24 sps:$4 sm:$0xff]  }
 0x2dd   :  { %4529 = vmatprep.subr.bf16.mxu1 %v9150_v2  ;;  %v9238_v2 = vld [vmem:[#allocation6 + $0x7c0] ss:$24 sps:$4 sm:$0xff]  }
 0x2df   :  { %6417 = vmatpush1.bf16.msra.mxu0 %v9217_v3  ;;  %v4285_v3 = vpop.f32.mrf.mxu1 }
 0x2e0   :  { %6418 = vmatprep.subr.bf16.mxu0 %v9225_v4  ;;  %4530 = vmatpush2.bf16.msra.mxu1 %v9148_v21  ;;  %v4326_v4 = vpop.f32.mrf.mxu0  ;;  %v9246_v21 = vld [vmem:[#allocation6 + $0x794] ss:$24 sps:$4 sm:$0xff]  }
 0x2e1   :  { %4531 = vmatprep.subr.bf16.mxu1 %v9153_v5  ;;  %v9244_v5 = vld [vmem:[#allocation6 + $0x790] ss:$24 sps:$4 sm:$0xff]  }
 0x2e3   :  { %6419 = vmatpush2.bf16.msra.mxu0 %v9223_v6  ;;  %v4287_v6 = vpop.f32.mrf.mxu1 }
 0x2e4   :  { %6420 = vmatprep.subr.bf16.mxu0 %v9231_v7  ;;  %4532 = vmatpush2.bf16.msra.mxu1 %v9151_v8  ;;  %v4328_v7 = vpop.f32.mrf.mxu0  ;;  %v9261_v8 = vld [vmem:[#allocation9 + $0x454] ss:$24 sps:$4 sm:$0xff]  }
 0x2e5   :  { %4533 = vmatprep.subr.bf16.mxu1 %v9156_v9  ;;  %v10102_v9 = vld [vmem:[#allocation7] sm:$0x3f] }
 0x2e7   :  { %6421 = vmatpush2.bf16.msra.mxu0 %v9229_v10  ;;  %v9259_v10 = vld [vmem:[#allocation9 + $0x450] ss:$24 sps:$4 sm:$0xff]  }
 0x2e8   :  { %6422 = vmatprep.subr.bf16.mxu0 %v9237_v11  ;;  %4534 = vmatpush2.bf16.msra.mxu1 %v9154_v14  ;;  %v4289_v11 = vpop.f32.mrf.mxu1  ;;  %v4330_v14 = vpop.f32.mrf.mxu0 }
 0x2e9   :  { %4535 = vmatprep.subr.bf16.mxu1 %v9159_v17  ;;  %v9264_v17 = vld [vmem:[#allocation9 + $0x424] ss:$24 sps:$4 sm:$0xff]  }
 0x2eb   :  { %6423 = vmatpush2.bf16.msra.mxu0 %v9235_v18  ;;  %v2786_v18 = vrot.slane %v10102_v9, %v10040_v41 }
 0x2ec   :  { %6424 = vmatprep.subr.bf16.mxu0 %v9243_v19  ;;  %4536 = vmatpush2.bf16.msra.mxu1 %v9157_v20  ;;  %v2782_v19 = vrot.slane %v10102_v9, %v10047_v58 }
 0x2ed   :  { %4537 = vmatprep.subr.bf16.mxu1 %v9162_v22  ;;  %v9262_v22 = vld [vmem:[#allocation9 + $0x420] ss:$24 sps:$4 sm:$0xff]  }
 0x2ef   :  { %6425 = vmatpush2.bf16.msra.mxu0 %v9241_v24  ;;  %v4288_v24 = vadd.f32 %v4287_v6, %v2782_v19  ;;  %v9291_v6 = vld [vmem:[#allocation9 + $0x574] ss:$24 sps:$4 sm:$0xff]  }
 0x2f0   :  { %6426 = vmatprep.subr.bf16.mxu0 %v9249_v25  ;;  %4538 = vmatpush2.bf16.msra.mxu1 %v9160_v26  ;;  %v4332_v25 = vpop.f32.mrf.mxu0 }
 0x2f1   :  { %4593 = vmatprep.subr.bf16.mxu1 %v9165_v29  ;;  %v9267_v29 = vld [vmem:[#allocation9 + $0x3f4] ss:$24 sps:$4 sm:$0xff]  }
 0x2f3   :  { %6427 = vmatpush2.bf16.msra.mxu0 %v9247_v30  ;;  %4540 = vmatmul.mubr.bf16.vlgmr.msra.gmra.mxu1 %v10058_v50  ;;  %v9172_v50 = vld [vmem:[#allocation6 + $0x6d0] ss:$24 sps:$4 sm:$0xff]   ;;  %v4286_v30 = vadd.f32 %v4285_v3, %v2786_v18 }
 0x2f4   :  { %6428 = vmatprep.subr.bf16.mxu0 %v9252_v33  ;;  %4594 = vmatpush1.bf16.msra.mxu1 %v9163_v31  ;;  %v4290_v33 = vadd.f32 %v4289_v11, %v2786_v18  ;;  %v4284_v31 = vadd.f32 %v4283_v1, %v2782_v19  ;;  %v9379_v1 = vld [vmem:[#allocation9 + $0x690] ss:$24 sps:$4 sm:$0xff]   ;;  %v9288_v3 = vld [vmem:[#allocation9 + $0x5a4] ss:$24 sps:$4 sm:$0xff]   ;;  %v9292_v18 = vld [vmem:[#allocation9 + $0x540] ss:$24 sps:$4 sm:$0xff]  }
 0x2f5   :  { %4625 = vmatprep.mubr.bf16.mxu1 %v10087_v13  ;;  %4595 = vmatprep.subr.bf16.mxu1 %v9168_v32  ;;  %v9178_v13 = vld [vmem:[#allocation6 + $0x6a0] ss:$24 sps:$4 sm:$0xff]   ;;  %v4331_v32 = vadd.f32 %v4330_v14, %v4288_v24 }
 0x2f6   :  { %v9294_v11 = vld [vmem:[#allocation9 + $0x544] ss:$24 sps:$4 sm:$0xff]   ;;  %v9397_v14 = vld [vmem:[#allocation9 + $0x600] ss:$24 sps:$4 sm:$0xff]   ;;  %v9297_v19 = vld [vmem:[#allocation9 + $0x514] ss:$24 sps:$4 sm:$0xff]  }
 0x2f7   :  { %6429 = vmatpush2.bf16.msra.mxu0 %v9250_v34  ;;  %v9295_v24 = vld [vmem:[#allocation9 + $0x510] ss:$24 sps:$4 sm:$0xff]  }
 0x2f8   :  { %6430 = vmatprep.subr.bf16.mxu0 %v9255_v35  ;;  %4596 = vmatpush1.bf16.msra.mxu1 %v9166_v37  ;;  %v4329_v35 = vadd.f32 %v4328_v7, %v4286_v30  ;;  %v4333_v37 = vadd.f32 %v4332_v25, %v4290_v33  ;;  %v9391_v7 = vld [vmem:[#allocation9 + $0x630] ss:$24 sps:$4 sm:$0xff]   ;;  %v9411_v30 = vld [vmem:[#allocation9 + $0x8a4] ss:$24 sps:$4 sm:$0xff]   ;;  %v9298_v33 = vld [vmem:[#allocation9 + $0x4e0] ss:$24 sps:$4 sm:$0xff]  }
 0x2f9   :  { %4597 = vmatprep.subr.bf16.mxu1 %v9171_v36  ;;  %v9265_v36 = vld [vmem:[#allocation9 + $0x3f0] ss:$24 sps:$4 sm:$0xff]  }
 0x2fb   :  { %6431 = vmatpush2.bf16.msra.mxu0 %v9253_v40  ;;  %v4327_v40 = vadd.f32 %v4326_v4, %v4284_v31  ;;  %v9385_v4 = vld [vmem:[#allocation9 + $0x660] ss:$24 sps:$4 sm:$0xff]  }
 0x2fc   :  { %6432 = vmatprep.subr.bf16.mxu0 %v9258_v42  ;;  %4598 = vmatpush1.bf16.msra.mxu1 %v9169_v43  ;;  %v9270_v43 = vld [vmem:[#allocation9 + $0x3c4] ss:$24 sps:$4 sm:$0xff]  }
 0x2fd   :  { %4599 = vmatprep.subr.bf16.mxu1 %v9174_v15 }
 0x2ff   :  { %6433 = vmatpush2.bf16.msra.mxu0 %v9256_v45 }
 0x300   :  { %4600 = vmatpush1.bf16.msra.mxu1 %v9172_v50 }
 0x301   :  { %4601 = vmatprep.subr.bf16.mxu1 %v9180_v46 }
 0x302   :  { %v4412_v25 = vpop.f32.mrf.mxu0 }
 0x304   :  { %4602 = vmatpush1.bf16.msra.mxu1 %v9178_v13  ;;  %v9268_v13 = vld [vmem:[#allocation9 + $0x3c0] ss:$24 sps:$4 sm:$0xff]   ;;  %v4414_v31 = vpop.f32.mrf.mxu0 }
 0x305   :  { %4603 = vmatprep.subr.bf16.mxu1 %v9186_v47 }
 0x308   :  { %4604 = vmatpush1.bf16.msra.mxu1 %v9184_v48  ;;  %v9273_v48 = vld [vmem:[#allocation9 + $0x394] ss:$24 sps:$4 sm:$0xff]  }
 0x309   :  { %4605 = vmatprep.subr.bf16.mxu1 %v9192_v49  ;;  %v9355_v49 = vld [vmem:[#allocation9 + $0x750] ss:$24 sps:$4 sm:$0xff]  }
 0x30c   :  { %4606 = vmatpush1.bf16.msra.mxu1 %v9190_v51  ;;  %v9357_v51 = vld [vmem:[#allocation9 + $0x754] ss:$24 sps:$4 sm:$0xff]  }
 0x30d   :  { %4607 = vmatprep.subr.bf16.mxu1 %v9198_v53  ;;  %v9271_v53 = vld [vmem:[#allocation9 + $0x390] ss:$24 sps:$4 sm:$0xff]   ;;  %6488 = vmatprep.subr.bf16.mxu0 %v9357_v51  ;;  %v9433_v51 = vld [vmem:[#allocation9 + $0x7e0] ss:$24 sps:$4 sm:$0xff]  }
 0x310   :  { %4608 = vmatpush1.bf16.msra.mxu1 %v9196_v16  ;;  %v9276_v16 = vld [vmem:[#allocation9 + $0x364] ss:$24 sps:$4 sm:$0xff]  }
 0x311   :  { %4609 = vmatprep.subr.bf16.mxu1 %v9204_v52  ;;  %v9361_v52 = vld [vmem:[#allocation9 + $0x720] ss:$24 sps:$4 sm:$0xff]  }
 0x314   :  { %4610 = vmatpush2.bf16.msra.mxu1 %v9202_v55  ;;  %v9363_v55 = vld [vmem:[#allocation9 + $0x724] ss:$24 sps:$4 sm:$0xff]  }
 0x315   :  { %4611 = vmatprep.subr.bf16.mxu1 %v9210_v12  ;;  %v9274_v12 = vld [vmem:[#allocation9 + $0x360] ss:$24 sps:$4 sm:$0xff]  }
 0x318   :  { %4612 = vmatpush2.bf16.msra.mxu1 %v9208_v56  ;;  %v9279_v56 = vld [vmem:[#allocation9 + $0x334] ss:$24 sps:$4 sm:$0xff]  }
 0x319   :  { %4613 = vmatprep.subr.bf16.mxu1 %v9216_v57  ;;  %v9367_v57 = vld [vmem:[#allocation9 + $0x6f0] ss:$24 sps:$4 sm:$0xff]  }
 0x31c   :  { %4614 = vmatpush2.bf16.msra.mxu1 %v9214_v59  ;;  %v9369_v59 = vld [vmem:[#allocation9 + $0x6f4] ss:$24 sps:$4 sm:$0xff]  }
 0x31d   :  { %4615 = vmatprep.subr.bf16.mxu1 %v9222_v44  ;;  %v9277_v44 = vld [vmem:[#allocation9 + $0x330] ss:$24 sps:$4 sm:$0xff]  }
 0x320   :  { %4616 = vmatpush2.bf16.msra.mxu1 %v9220_v60  ;;  %v9282_v60 = vld [vmem:[#allocation9 + $0x304] ss:$24 sps:$4 sm:$0xff]  }
 0x321   :  { %4617 = vmatprep.subr.bf16.mxu1 %v9228_v61  ;;  %v9373_v61 = vld [vmem:[#allocation9 + $0x6c0] ss:$24 sps:$4 sm:$0xff]  }
 0x324   :  { %4618 = vmatpush2.bf16.msra.mxu1 %v9226_v62  ;;  %v9375_v62 = vld [vmem:[#allocation9 + $0x6c4] ss:$24 sps:$4 sm:$0xff]  }
 0x325   :  { %4619 = vmatprep.subr.bf16.mxu1 %v9234_v63  ;;  %v9280_v63 = vld [vmem:[#allocation9 + $0x300] ss:$24 sps:$4 sm:$0xff]  }
 0x328   :  { %4620 = vmatpush2.bf16.msra.mxu1 %v9232_v0  ;;  %v9285_v0 = vld [vmem:[#allocation9 + $0x5d4] ss:$24 sps:$4 sm:$0xff]  }
 0x329   :  { %4621 = vmatprep.subr.bf16.mxu1 %v9240_v38  ;;  %v9381_v38 = vld [vmem:[#allocation9 + $0x694] ss:$24 sps:$4 sm:$0xff]  }
 0x32c   :  { %4622 = vmatpush2.bf16.msra.mxu1 %v9238_v2  ;;  %v9283_v2 = vld [vmem:[#allocation9 + $0x5d0] ss:$24 sps:$4 sm:$0xff]  }
 0x32d   :  { %4623 = vmatprep.subr.bf16.mxu1 %v9246_v21  ;;  %v9387_v21 = vld [vmem:[#allocation9 + $0x664] ss:$24 sps:$4 sm:$0xff]  }
 0x330   :  { %4624 = vmatpush2.bf16.msra.mxu1 %v9244_v5  ;;  %v9286_v5 = vld [vmem:[#allocation9 + $0x5a0] ss:$24 sps:$4 sm:$0xff]  }
 0x331   :  { %6445 = vmatprep.subr.bf16.mxu1 %v9261_v8  ;;  %v9393_v8 = vld [vmem:[#allocation9 + $0x634] ss:$24 sps:$4 sm:$0xff]  }
 0x333   :  { %4626 = vmatmul.mubr.bf16.vlgmr.msra.gmra.mxu1 %v10089_v54  ;;  %v4369_v20 = vpop.f32.mrf.mxu1 }
 0x334   :  { %6446 = vmatpush1.bf16.msra.mxu1 %v9259_v10  ;;  %v4370_v50 = vadd.f32 %v4369_v20, %v4327_v40  ;;  %v9289_v10 = vld [vmem:[#allocation9 + $0x570] ss:$24 sps:$4 sm:$0xff]   ;;  %v9306_v40 = vld [vmem:[#allocation9 + $0x484] ss:$24 sps:$4 sm:$0xff]  }
 0x335   :  { %v4371_v26 = vpop.f32.mrf.mxu1  ;;  %6447 = vmatprep.subr.bf16.mxu1 %v9264_v17  ;;  %v9399_v17 = vld [vmem:[#allocation9 + $0x604] ss:$24 sps:$4 sm:$0xff]   ;;  %v9403_v20 = vld [vmem:[#allocation9 + $0x8d0] ss:$24 sps:$4 sm:$0xff]  }
 0x336   :  { %v4372_v15 = vadd.f32 %v4371_v26, %v4329_v35  ;;  %v9300_v26 = vld [vmem:[#allocation9 + $0x4e4] ss:$24 sps:$4 sm:$0xff]   ;;  %v9417_v35 = vld [vmem:[#allocation9 + $0x874] ss:$24 sps:$4 sm:$0xff]  }
 0x337   :  { %v4373_v34 = vpop.f32.mrf.mxu1 }
 0x338   :  { %6448 = vmatpush1.bf16.msra.mxu1 %v9262_v22  ;;  %v4374_v42 = vadd.f32 %v4373_v34, %v4331_v32  ;;  %v9405_v22 = vld [vmem:[#allocation9 + $0x8d4] ss:$24 sps:$4 sm:$0xff]   ;;  %v9415_v34 = vld [vmem:[#allocation9 + $0x870] ss:$24 sps:$4 sm:$0xff]  }
 0x339   :  { %v4375_v54 = vpop.f32.mrf.mxu1  ;;  %6449 = vmatprep.subr.bf16.mxu1 %v9267_v29  ;;  %v9409_v29 = vld [vmem:[#allocation9 + $0x8a0] ss:$24 sps:$4 sm:$0xff]   ;;  %v9303_v32 = vld [vmem:[#allocation9 + $0x4b4] ss:$24 sps:$4 sm:$0xff]  }
 0x33a   :  { %v4376_v45 = vadd.f32 %v4375_v54, %v4333_v37  ;;  %v10111_v47 = vpack.c.bf16 %v4374_v42, %v4370_v50  ;;  %v9301_v37 = vld [vmem:[#allocation9 + $0x4b0] ss:$24 sps:$4 sm:$0xff]   ;;  %v9421_v42 = vld [vmem:[#allocation9 + $0x840] ss:$24 sps:$4 sm:$0xff]   ;;  %v9423_v54 = vld [vmem:[#allocation9 + $0x844] ss:$24 sps:$4 sm:$0xff]  }
 0x33b   :  { %v9427_v50 = vld [vmem:[#allocation9 + $0x810] ss:$24 sps:$4 sm:$0xff]  }
 0x33c   :  { %v10109_v46 = vpack.c.bf16 %v4376_v45, %v4372_v15  ;;  %6450 = vmatpush1.bf16.msra.mxu1 %v9265_v36  ;;  %v4416_v36 = vpop.f32.mrf.mxu0  ;;  %v9309_v45 = vld [vmem:[#allocation9 + $0x15c] ss:$24 sps:$4 sm:$0xff]  }
 0x33d   :  { %6451 = vmatprep.subr.bf16.mxu1 %v9270_v43  ;;  %v9304_v43 = vld [vmem:[#allocation9 + $0x480] ss:$24 sps:$4 sm:$0xff]  }
 0x33e   :  { %6434 = vmatprep.mubr.bf16.mxu0 %v10109_v46  ;;  %v4418_v15 = vpop.f32.mrf.mxu0 }
 0x33f   :  { %6435 = vmatmul.mubr.bf16.vlgmr.msra.gmra.mxu0 %v10111_v47 }
 0x340   :  { %6452 = vmatpush1.bf16.msra.mxu1 %v9268_v13  ;;  %6489 = vmatpush1.bf16.msra.mxu0 %v9355_v49  ;;  %v9429_v13 = vld [vmem:[#allocation9 + $0x814] ss:$24 sps:$4 sm:$0xff]   ;;  %v2794_v49 = vrot.slane %v10102_v9, %v10065_v39 }
 0x341   :  { %6453 = vmatprep.subr.bf16.mxu1 %v9273_v48  ;;  %6490 = vmatprep.subr.bf16.mxu0 %v9363_v55 }
 0x342   :  { %v4498_v48 = vpop.f32.mrf.mxu0 }
 0x344   :  { %6454 = vmatpush1.bf16.msra.mxu1 %v9271_v53  ;;  %6491 = vmatpush1.bf16.msra.mxu0 %v9361_v52  ;;  %v9435_v53 = vld [vmem:[#allocation9 + $0x7e4] ss:$24 sps:$4 sm:$0xff]   ;;  %v4500_v52 = vpop.f32.mrf.mxu0 }
 0x345   :  { %6455 = vmatprep.subr.bf16.mxu1 %v9276_v16  ;;  %6492 = vmatprep.subr.bf16.mxu0 %v9369_v59  ;;  %v2790_v16 = vrot.slane %v10102_v9, %v10062_v28  ;;  %v9439_v59 = vld [vmem:[#allocation9 + $0x7b0] ss:$24 sps:$4 sm:$0xff]  }
 0x348   :  { %6456 = vmatpush1.bf16.msra.mxu1 %v9274_v12  ;;  %6493 = vmatpush1.bf16.msra.mxu0 %v9367_v57  ;;  %v4417_v57 = vadd.f32 %v4416_v36, %v2790_v16  ;;  %v9333_v36 = vld [vmem:[#allocation9 + $0x2dc] ss:$24 sps:$4 sm:$0xff]  }
 0x349   :  { %6457 = vmatprep.subr.bf16.mxu1 %v9279_v56  ;;  %6494 = vmatprep.subr.bf16.mxu0 %v9375_v62  ;;  %v4415_v56 = vadd.f32 %v4414_v31, %v2794_v49  ;;  %v9322_v31 = vld [vmem:[#allocation9 + $0x68] ss:$24 sps:$4 sm:$0xff]  }
 0x34c   :  { %6458 = vmatpush1.bf16.msra.mxu1 %v9277_v44  ;;  %6495 = vmatpush1.bf16.msra.mxu0 %v9373_v61  ;;  %v9441_v44 = vld [vmem:[#allocation9 + $0x7b4] ss:$24 sps:$4 sm:$0xff]   ;;  %v4502_v61 = vpop.f32.mrf.mxu0 }
 0x34d   :  { %6459 = vmatprep.subr.bf16.mxu1 %v9282_v60  ;;  %6496 = vmatprep.subr.bf16.mxu0 %v9381_v38  ;;  %v4413_v60 = vadd.f32 %v4412_v25, %v2790_v16  ;;  %v9318_v25 = vld [vmem:[#allocation9 + $0xcc] ss:$24 sps:$4 sm:$0xff]   ;;  %v9349_v16 = vld [vmem:[#allocation9 + $0x1b8] ss:$24 sps:$4 sm:$0xff]  }
 0x350   :  { %6460 = vmatpush1.bf16.msra.mxu1 %v9280_v63  ;;  %6497 = vmatpush1.bf16.msra.mxu0 %v9379_v1  ;;  %v4419_v63 = vadd.f32 %v4418_v15, %v2794_v49  ;;  %v9337_v15 = vld [vmem:[#allocation9 + $0x278] ss:$24 sps:$4 sm:$0xff]   ;;  %v9348_v49 = vld [vmem:[#allocation9 + $0x1ec] ss:$24 sps:$4 sm:$0xff]  }
 0x351   :  { %6461 = vmatprep.subr.bf16.mxu1 %v9285_v0  ;;  %6498 = vmatprep.subr.bf16.mxu0 %v9387_v21  ;;  %v4504_v21 = vpop.f32.mrf.mxu0 }
 0x354   :  { %6462 = vmatpush2.bf16.msra.mxu1 %v9283_v2  ;;  %6499 = vmatpush1.bf16.msra.mxu0 %v9385_v4  ;;  %v9447_v4 = vld [vmem:[#allocation9 + $0x784] ss:$24 sps:$4 sm:$0xff]  }
 0x355   :  { %6463 = vmatprep.subr.bf16.mxu1 %v9288_v3  ;;  %6500 = vmatprep.subr.bf16.mxu0 %v9393_v8 }
 0x358   :  { %6464 = vmatpush2.bf16.msra.mxu1 %v9286_v5  ;;  %6501 = vmatpush1.bf16.msra.mxu0 %v9391_v7 }
 0x359   :  { %6465 = vmatprep.subr.bf16.mxu1 %v9291_v6  ;;  %6502 = vmatprep.subr.bf16.mxu0 %v9399_v17  ;;  %v9445_v6 = vld [vmem:[#allocation9 + $0x780] ss:$24 sps:$4 sm:$0xff]   ;;  %v9453_v17 = vld [vmem:[#allocation9 + $0x45c] ss:$24 sps:$4 sm:$0xff]  }
 0x35c   :  { %6466 = vmatpush2.bf16.msra.mxu1 %v9289_v10  ;;  %6503 = vmatpush1.bf16.msra.mxu0 %v9397_v14  ;;  %v9307_v14 = vld [vmem:[#allocation9 + $0x158] ss:$24 sps:$4 sm:$0xff]  }
 0x35d   :  { %6467 = vmatprep.subr.bf16.mxu1 %v9294_v11  ;;  %6504 = vmatprep.subr.bf16.mxu0 %v9405_v22  ;;  %v9315_v22 = vld [vmem:[#allocation9 + $0xfc] ss:$24 sps:$4 sm:$0xff]  }
 0x360   :  { %6468 = vmatpush2.bf16.msra.mxu1 %v9292_v18  ;;  %6505 = vmatpush2.bf16.msra.mxu0 %v9403_v20  ;;  %v9310_v20 = vld [vmem:[#allocation9 + $0x128] ss:$24 sps:$4 sm:$0xff]  }
 0x361   :  { %6469 = vmatprep.subr.bf16.mxu1 %v9297_v19  ;;  %6506 = vmatprep.subr.bf16.mxu0 %v9411_v30  ;;  %v9312_v19 = vld [vmem:[#allocation9 + $0x12c] ss:$24 sps:$4 sm:$0xff]   ;;  %v9319_v30 = vld [vmem:[#allocation9 + $0x98] ss:$24 sps:$4 sm:$0xff]  }
 0x364   :  { %6470 = vmatpush2.bf16.msra.mxu1 %v9295_v24  ;;  %6507 = vmatpush2.bf16.msra.mxu0 %v9409_v29  ;;  %v9313_v24 = vld [vmem:[#allocation9 + $0xf8] ss:$24 sps:$4 sm:$0xff]   ;;  %v9321_v29 = vld [vmem:[#allocation9 + $0x9c] ss:$24 sps:$4 sm:$0xff]  }
 0x365   :  { %6471 = vmatprep.subr.bf16.mxu1 %v9300_v26  ;;  %6508 = vmatprep.subr.bf16.mxu0 %v9417_v35  ;;  %v9316_v26 = vld [vmem:[#allocation9 + $0xc8] ss:$24 sps:$4 sm:$0xff]   ;;  %v9330_v35 = vld [vmem:[#allocation9 + $0xc] ss:$24 sps:$4 sm:$0xff]  }
 0x368   :  { %6472 = vmatpush2.bf16.msra.mxu1 %v9298_v33  ;;  %6509 = vmatpush2.bf16.msra.mxu0 %v9415_v34  ;;  %v9324_v33 = vld [vmem:[#allocation9 + $0x6c] ss:$24 sps:$4 sm:$0xff]   ;;  %v9325_v34 = vld [vmem:[#allocation9 + $0x38] ss:$24 sps:$4 sm:$0xff]  }
 0x369   :  { %6473 = vmatprep.subr.bf16.mxu1 %v9303_v32  ;;  %6510 = vmatprep.subr.bf16.mxu0 %v9423_v54  ;;  %v9327_v32 = vld [vmem:[#allocation9 + $0x3c] ss:$24 sps:$4 sm:$0xff]   ;;  %v9334_v54 = vld [vmem:[#allocation9 + $0x2a8] ss:$24 sps:$4 sm:$0xff]  }
 0x36c   :  { %6474 = vmatpush2.bf16.msra.mxu1 %v9301_v37  ;;  %6511 = vmatpush2.bf16.msra.mxu0 %v9421_v42  ;;  %v9328_v37 = vld [vmem:[#allocation9 + $0x8] ss:$24 sps:$4 sm:$0xff]   ;;  %v9336_v42 = vld [vmem:[#allocation9 + $0x2ac] ss:$24 sps:$4 sm:$0xff]  }
 0x36d   :  { %6475 = vmatprep.subr.bf16.mxu1 %v9306_v40  ;;  %6512 = vmatprep.subr.bf16.mxu0 %v9429_v13  ;;  %v9331_v40 = vld [vmem:[#allocation9 + $0x2d8] ss:$24 sps:$4 sm:$0xff]   ;;  %v9345_v13 = vld [vmem:[#allocation9 + $0x21c] ss:$24 sps:$4 sm:$0xff]  }
 0x370   :  { %6476 = vmatpush2.bf16.msra.mxu1 %v9304_v43  ;;  %6513 = vmatpush2.bf16.msra.mxu0 %v9427_v50  ;;  %v9339_v43 = vld [vmem:[#allocation9 + $0x27c] ss:$24 sps:$4 sm:$0xff]   ;;  %v9340_v50 = vld [vmem:[#allocation9 + $0x248] ss:$24 sps:$4 sm:$0xff]  }
 0x371   :  { %6531 = vmatprep.subr.bf16.mxu1 %v9309_v45  ;;  %6514 = vmatprep.subr.bf16.mxu0 %v9435_v53  ;;  %v9342_v45 = vld [vmem:[#allocation9 + $0x24c] ss:$24 sps:$4 sm:$0xff]   ;;  %v9351_v53 = vld [vmem:[#allocation9 + $0x1bc] ss:$24 sps:$4 sm:$0xff]  }
 0x373   :  { %v4455_v55 = vpop.f32.mrf.mxu1 }
 0x374   :  { %6515 = vmatpush2.bf16.msra.mxu0 %v9433_v51  ;;  %v4456_v38 = vadd.f32 %v4455_v55, %v4413_v60  ;;  %v9346_v51 = vld [vmem:[#allocation9 + $0x1e8] ss:$24 sps:$4 sm:$0xff]   ;;  %v9370_v60 = vld [vmem:[#allocation9 + $0x6f8] ss:$24 sps:$4 sm:$0xff]  }
 0x375   :  { %v4457_v12 = vpop.f32.mrf.mxu1  ;;  %6516 = vmatprep.subr.bf16.mxu0 %v9441_v44  ;;  %v9352_v55 = vld [vmem:[#allocation9 + $0x188] ss:$24 sps:$4 sm:$0xff]   ;;  %v9372_v44 = vld [vmem:[#allocation9 + $0x6fc] ss:$24 sps:$4 sm:$0xff]  }
 0x376   :  { %v4458_v0 = vadd.f32 %v4457_v12, %v4415_v56  ;;  %v4499_v10 = vadd.f32 %v4498_v48, %v4456_v38  ;;  %v9343_v48 = vld [vmem:[#allocation9 + $0x218] ss:$24 sps:$4 sm:$0xff]   ;;  %v9360_v12 = vld [vmem:[#allocation9 + $0x75c] ss:$24 sps:$4 sm:$0xff]   ;;  %v9388_v38 = vld [vmem:[#allocation9 + $0x668] ss:$24 sps:$4 sm:$0xff]  }
 0x377   :  { %v4459_v62 = vpop.f32.mrf.mxu1  ;;  %v9358_v56 = vld [vmem:[#allocation9 + $0x758] ss:$24 sps:$4 sm:$0xff]  }
 0x378   :  { %v4460_v1 = vadd.f32 %v4459_v62, %v4417_v57  ;;  %6517 = vmatpush2.bf16.msra.mxu0 %v9439_v59  ;;  %v4501_v7 = vadd.f32 %v4500_v52, %v4458_v0  ;;  %v9354_v52 = vld [vmem:[#allocation9 + $0x18c] ss:$24 sps:$4 sm:$0xff]   ;;  %v9364_v59 = vld [vmem:[#allocation9 + $0x728] ss:$24 sps:$4 sm:$0xff]   ;;  %v9382_v0 = vld [vmem:[#allocation9 + $0x698] ss:$24 sps:$4 sm:$0xff]  }
 0x379   :  { %v4461_v2 = vpop.f32.mrf.mxu1  ;;  %6518 = vmatprep.subr.bf16.mxu0 %v9447_v4  ;;  %v9366_v57 = vld [vmem:[#allocation9 + $0x72c] ss:$24 sps:$4 sm:$0xff]   ;;  %v9376_v62 = vld [vmem:[#allocation9 + $0x6c8] ss:$24 sps:$4 sm:$0xff]  }
 0x37a   :  { %v4462_v3 = vadd.f32 %v4461_v2, %v4419_v63  ;;  %v4503_v5 = vadd.f32 %v4502_v61, %v4460_v1  ;;  %v9378_v61 = vld [vmem:[#allocation9 + $0x6cc] ss:$24 sps:$4 sm:$0xff]   ;;  %v9384_v63 = vld [vmem:[#allocation9 + $0x69c] ss:$24 sps:$4 sm:$0xff]  }
 0x37b   :  { %v9390_v1 = vld [vmem:[#allocation9 + $0x66c] ss:$24 sps:$4 sm:$0xff]   ;;  %v9396_v2 = vld [vmem:[#allocation9 + $0x63c] ss:$24 sps:$4 sm:$0xff]  }
 0x37c   :  { %v4505_v8 = vadd.f32 %v4504_v21, %v4462_v3  ;;  %6519 = vmatpush2.bf16.msra.mxu0 %v9445_v6  ;;  %v10121_v18 = vpack.c.bf16 %v4503_v5, %v4499_v10  ;;  %v9394_v3 = vld [vmem:[#allocation9 + $0x638] ss:$24 sps:$4 sm:$0xff]   ;;  %v9402_v4 = vld [vmem:[#allocation9 + $0x60c] ss:$24 sps:$4 sm:$0xff]   ;;  %v9400_v21 = vld [vmem:[#allocation9 + $0x608] ss:$24 sps:$4 sm:$0xff]  }
 0x37d   :  { %6574 = vmatprep.subr.bf16.mxu0 %v9453_v17  ;;  %v9408_v5 = vld [vmem:[#allocation9 + $0x8dc] ss:$24 sps:$4 sm:$0xff]   ;;  %v9406_v6 = vld [vmem:[#allocation9 + $0x8d8] ss:$24 sps:$4 sm:$0xff]  }
 0x37e   :  { %v10119_v11 = vpack.c.bf16 %v4505_v8, %v4501_v7  ;;  %v9414_v7 = vld [vmem:[#allocation9 + $0x8ac] ss:$24 sps:$4 sm:$0xff]   ;;  %v9412_v8 = vld [vmem:[#allocation9 + $0x8a8] ss:$24 sps:$4 sm:$0xff]   ;;  %v9420_v10 = vld [vmem:[#allocation9 + $0x87c] ss:$24 sps:$4 sm:$0xff]  }
 0x37f   :  { %v9418_v17 = vld [vmem:[#allocation9 + $0x878] ss:$24 sps:$4 sm:$0xff]  }
 0x380   :  { %6477 = vmatprep.mubr.bf16.mxu1 %v10119_v11 }
 0x381   :  { %6478 = vmatmul.mubr.bf16.vlgmr.msra.gmra.mxu1 %v10121_v18 }
 0x382   :  { %6532 = vmatpush1.bf16.msra.mxu1 %v9307_v14  ;;  %6563 = vmatprep.mubr.bf16.mxu1 %v10109_v46 }
 0x383   :  { %6533 = vmatprep.subr.bf16.mxu1 %v9312_v19  ;;  %v9426_v19 = vld [vmem:[#allocation9 + $0x84c] ss:$24 sps:$4 sm:$0xff]  }
 0x386   :  { %6534 = vmatpush1.bf16.msra.mxu1 %v9310_v20 }
 0x387   :  { %6535 = vmatprep.subr.bf16.mxu1 %v9315_v22  ;;  %v9424_v22 = vld [vmem:[#allocation9 + $0x848] ss:$24 sps:$4 sm:$0xff]  }
 0x38a   :  { %6536 = vmatpush1.bf16.msra.mxu1 %v9313_v24  ;;  %v4584_v24 = vpop.f32.mrf.mxu0 }
 0x38b   :  { %6537 = vmatprep.subr.bf16.mxu1 %v9318_v25  ;;  %v9432_v25 = vld [vmem:[#allocation9 + $0x81c] ss:$24 sps:$4 sm:$0xff]  }
 0x38e   :  { %6538 = vmatpush1.bf16.msra.mxu1 %v9316_v26 }
 0x38f   :  { %6539 = vmatprep.subr.bf16.mxu1 %v9321_v29  ;;  %v9430_v29 = vld [vmem:[#allocation9 + $0x818] ss:$24 sps:$4 sm:$0xff]  }
 0x392   :  { %6540 = vmatpush1.bf16.msra.mxu1 %v9319_v30  ;;  %v4586_v30 = vpop.f32.mrf.mxu0 }
 0x393   :  { %6541 = vmatprep.subr.bf16.mxu1 %v9324_v33  ;;  %v9438_v33 = vld [vmem:[#allocation9 + $0x7ec] ss:$24 sps:$4 sm:$0xff]  }
 0x396   :  { %6542 = vmatpush1.bf16.msra.mxu1 %v9322_v31  ;;  %v2802_v31 = vrot.slane %v10102_v9, %v10080_v27 }
 0x397   :  { %6543 = vmatprep.subr.bf16.mxu1 %v9327_v32  ;;  %v2798_v32 = vrot.slane %v10102_v9, %v10083_v23 }
 0x39a   :  { %6544 = vmatpush1.bf16.msra.mxu1 %v9325_v34 }
 0x39b   :  { %6545 = vmatprep.subr.bf16.mxu1 %v9330_v35  ;;  %v9436_v35 = vld [vmem:[#allocation9 + $0x7e8] ss:$24 sps:$4 sm:$0xff]  }
 0x39e   :  { %6546 = vmatpush1.bf16.msra.mxu1 %v9328_v37  ;;  %v4588_v37 = vpop.f32.mrf.mxu0 }
 0x39f   :  { %6547 = vmatprep.subr.bf16.mxu1 %v9333_v36 }
 0x3a2   :  { %6548 = vmatpush2.bf16.msra.mxu1 %v9331_v40 }
 0x3a3   :  { %6549 = vmatprep.subr.bf16.mxu1 %v9336_v42  ;;  %v9444_v42 = vld [vmem:[#allocation9 + $0x7bc] ss:$24 sps:$4 sm:$0xff]  }
 0x3a6   :  { %6550 = vmatpush2.bf16.msra.mxu1 %v9334_v54 }
 0x3a7   :  { %6551 = vmatprep.subr.bf16.mxu1 %v9339_v43 }
 0x3aa   :  { %6552 = vmatpush2.bf16.msra.mxu1 %v9337_v15 }
 0x3ab   :  { %6553 = vmatprep.subr.bf16.mxu1 %v9342_v45 }
 0x3ae   :  { %6554 = vmatpush2.bf16.msra.mxu1 %v9340_v50  ;;  %v9442_v50 = vld [vmem:[#allocation9 + $0x7b8] ss:$24 sps:$4 sm:$0xff]  }
 0x3af   :  { %6555 = vmatprep.subr.bf16.mxu1 %v9345_v13  ;;  %v4590_v13 = vpop.f32.mrf.mxu0 }
 0x3b2   :  { %6556 = vmatpush2.bf16.msra.mxu1 %v9343_v48 }
 0x3b3   :  { %6557 = vmatprep.subr.bf16.mxu1 %v9348_v49  ;;  %v4541_v14 = vpop.f32.mrf.mxu1 }
 0x3b4   :  { %v4542_v15 = vadd.f32 %v4541_v14, %v2798_v32  ;;  %v9472_v14 = vld [vmem:[#allocation9 + $0x3d0] ss:$24 sps:$4 sm:$0xff]  }
 0x3b5   :  { %v4543_v20 = vpop.f32.mrf.mxu1 }
 0x3b6   :  { %6558 = vmatpush2.bf16.msra.mxu1 %v9346_v51  ;;  %v4544_v54 = vadd.f32 %v4543_v20, %v2802_v31  ;;  %v9450_v51 = vld [vmem:[#allocation9 + $0x78c] ss:$24 sps:$4 sm:$0xff]   ;;  %v9478_v20 = vld [vmem:[#allocation9 + $0x3a0] ss:$24 sps:$4 sm:$0xff]  }
 0x3b7   :  { %6559 = vmatprep.subr.bf16.mxu1 %v9351_v53  ;;  %v4545_v26 = vpop.f32.mrf.mxu1 }
 0x3b8   :  { %v4546_v36 = vadd.f32 %v4545_v26, %v2798_v32  ;;  %v4587_v9 = vadd.f32 %v4586_v30, %v4544_v54  ;;  %v9484_v26 = vld [vmem:[#allocation9 + $0x370] ss:$24 sps:$4 sm:$0xff]   ;;  %v9498_v32 = vld [vmem:[#allocation9 + $0x314] ss:$24 sps:$4 sm:$0xff]   ;;  %v9502_v54 = vld [vmem:[#allocation9 + $0x5e0] ss:$24 sps:$4 sm:$0xff]  }
 0x3b9   :  { %v4547_v34 = vpop.f32.mrf.mxu1  ;;  %v9487_v30 = vld [vmem:[#allocation9 + $0x338] ss:$24 sps:$4 sm:$0xff]  }
 0x3ba   :  { %6560 = vmatpush2.bf16.msra.mxu1 %v9349_v16  ;;  %v4548_v43 = vadd.f32 %v4547_v34, %v2802_v31  ;;  %v4589_v48 = vadd.f32 %v4588_v37, %v4546_v36  ;;  %v4585_v16 = vadd.f32 %v4584_v24, %v4542_v15  ;;  %v9481_v24 = vld [vmem:[#allocation9 + $0x368] ss:$24 sps:$4 sm:$0xff]   ;;  %v9504_v36 = vld [vmem:[#allocation9 + $0x5e4] ss:$24 sps:$4 sm:$0xff]  }
 0x3bb   :  { %6561 = vmatprep.subr.bf16.mxu1 %v9354_v52  ;;  %v9490_v31 = vld [vmem:[#allocation9 + $0x340] ss:$24 sps:$4 sm:$0xff]   ;;  %v9496_v37 = vld [vmem:[#allocation9 + $0x310] ss:$24 sps:$4 sm:$0xff]  }
 0x3bc   :  { %v4591_v53 = vadd.f32 %v4590_v13, %v4548_v43  ;;  %v9493_v34 = vld [vmem:[#allocation9 + $0x308] ss:$24 sps:$4 sm:$0xff]   ;;  %v9510_v43 = vld [vmem:[#allocation9 + $0x5b4] ss:$24 sps:$4 sm:$0xff]   ;;  %v9516_v13 = vld [vmem:[#allocation9 + $0x584] ss:$24 sps:$4 sm:$0xff]  }
 0x3bd   :  { %v9505_v15 = vld [vmem:[#allocation9 + $0x5a8] ss:$24 sps:$4 sm:$0xff]  }
 0x3be   :  { %6562 = vmatpush2.bf16.msra.mxu1 %v9352_v55 }
 0x3bf   :  { %6617 = vmatprep.subr.bf16.mxu1 %v9360_v12 }
 0x3c1   :  { %6564 = vmatmul.mubr.bf16.vlgmr.msra.gmra.mxu1 %v10111_v47 }
 0x3c2   :  { %6618 = vmatpush1.bf16.msra.mxu1 %v9358_v56 }
 0x3c3   :  { %6619 = vmatprep.subr.bf16.mxu1 %v9366_v57  ;;  %v9448_v57 = vld [vmem:[#allocation9 + $0x788] ss:$24 sps:$4 sm:$0xff]  }
 0x3c6   :  { %6620 = vmatpush1.bf16.msra.mxu1 %v9364_v59 }
 0x3c7   :  { %6621 = vmatprep.subr.bf16.mxu1 %v9372_v44 }
 0x3ca   :  { %6622 = vmatpush1.bf16.msra.mxu1 %v9370_v60  ;;  %v9451_v60 = vld [vmem:[#allocation9 + $0x458] ss:$24 sps:$4 sm:$0xff]  }
 0x3cb   :  { %6623 = vmatprep.subr.bf16.mxu1 %v9378_v61 }
 0x3ce   :  { %6624 = vmatpush1.bf16.msra.mxu1 %v9376_v62  ;;  %v9456_v62 = vld [vmem:[#allocation9 + $0x464] ss:$24 sps:$4 sm:$0xff]  }
 0x3cf   :  { %6625 = vmatprep.subr.bf16.mxu1 %v9384_v63  ;;  %v9454_v63 = vld [vmem:[#allocation9 + $0x460] ss:$24 sps:$4 sm:$0xff]  }
 0x3d2   :  { %6626 = vmatpush1.bf16.msra.mxu1 %v9382_v0  ;;  %v9459_v0 = vld [vmem:[#allocation9 + $0x42c] ss:$24 sps:$4 sm:$0xff]  }
 0x3d3   :  { %6627 = vmatprep.subr.bf16.mxu1 %v9390_v1  ;;  %v9462_v1 = vld [vmem:[#allocation9 + $0x434] ss:$24 sps:$4 sm:$0xff]  }
 0x3d6   :  { %6628 = vmatpush1.bf16.msra.mxu1 %v9388_v38  ;;  %v9457_v38 = vld [vmem:[#allocation9 + $0x428] ss:$24 sps:$4 sm:$0xff]  }
 0x3d7   :  { %6629 = vmatprep.subr.bf16.mxu1 %v9396_v2  ;;  %v9465_v2 = vld [vmem:[#allocation9 + $0x3fc] ss:$24 sps:$4 sm:$0xff]  }
 0x3da   :  { %6630 = vmatpush1.bf16.msra.mxu1 %v9394_v3  ;;  %v9460_v3 = vld [vmem:[#allocation9 + $0x430] ss:$24 sps:$4 sm:$0xff]  }
 0x3db   :  { %6631 = vmatprep.subr.bf16.mxu1 %v9402_v4  ;;  %v9468_v4 = vld [vmem:[#allocation9 + $0x404] ss:$24 sps:$4 sm:$0xff]  }
 0x3de   :  { %6632 = vmatpush1.bf16.msra.mxu1 %v9400_v21  ;;  %v9463_v21 = vld [vmem:[#allocation9 + $0x3f8] ss:$24 sps:$4 sm:$0xff]  }
 0x3df   :  { %6633 = vmatprep.subr.bf16.mxu1 %v9408_v5  ;;  %v9471_v5 = vld [vmem:[#allocation9 + $0x3cc] ss:$24 sps:$4 sm:$0xff]  }
 0x3e2   :  { %6634 = vmatpush2.bf16.msra.mxu1 %v9406_v6  ;;  %v9466_v6 = vld [vmem:[#allocation9 + $0x400] ss:$24 sps:$4 sm:$0xff]  }
 0x3e3   :  { %6635 = vmatprep.subr.bf16.mxu1 %v9414_v7  ;;  %v9474_v7 = vld [vmem:[#allocation9 + $0x3d4] ss:$24 sps:$4 sm:$0xff]  }
 0x3e6   :  { %6636 = vmatpush2.bf16.msra.mxu1 %v9412_v8  ;;  %v9469_v8 = vld [vmem:[#allocation9 + $0x3c8] ss:$24 sps:$4 sm:$0xff]  }
 0x3e7   :  { %6637 = vmatprep.subr.bf16.mxu1 %v9420_v10  ;;  %v9477_v10 = vld [vmem:[#allocation9 + $0x39c] ss:$24 sps:$4 sm:$0xff]  }
 0x3ea   :  { %6638 = vmatpush2.bf16.msra.mxu1 %v9418_v17  ;;  %v9475_v17 = vld [vmem:[#allocation9 + $0x398] ss:$24 sps:$4 sm:$0xff]  }
 0x3eb   :  { %6639 = vmatprep.subr.bf16.mxu1 %v9426_v19  ;;  %v9483_v19 = vld [vmem:[#allocation9 + $0x36c] ss:$24 sps:$4 sm:$0xff]  }
 0x3ee   :  { %6640 = vmatpush2.bf16.msra.mxu1 %v9424_v22  ;;  %v9486_v22 = vld [vmem:[#allocation9 + $0x374] ss:$24 sps:$4 sm:$0xff]  }
 0x3ef   :  { %6641 = vmatprep.subr.bf16.mxu1 %v9432_v25  ;;  %v9489_v25 = vld [vmem:[#allocation9 + $0x33c] ss:$24 sps:$4 sm:$0xff]  }
 0x3f2   :  { %6642 = vmatpush2.bf16.msra.mxu1 %v9430_v29  ;;  %v9492_v29 = vld [vmem:[#allocation9 + $0x344] ss:$24 sps:$4 sm:$0xff]  }
 0x3f3   :  { %v4627_v40 = vpop.f32.mrf.mxu1  ;;  %6643 = vmatprep.subr.bf16.mxu1 %v9438_v33  ;;  %v9495_v33 = vld [vmem:[#allocation9 + $0x30c] ss:$24 sps:$4 sm:$0xff]  }
 0x3f4   :  { %v4628_v59 = vadd.f32 %v4627_v40, %v4585_v16  ;;  %v9499_v40 = vld [vmem:[#allocation9 + $0x5d8] ss:$24 sps:$4 sm:$0xff]   ;;  %v9525_v16 = vld [vmem:[#allocation9 + $0x51c] ss:$24 sps:$4 sm:$0xff]  }
 0x3f5   :  { %v4629_v45 = vpop.f32.mrf.mxu1 }
 0x3f6   :  { %6644 = vmatpush2.bf16.msra.mxu1 %v9436_v35  ;;  %v4630_v12 = vadd.f32 %v4629_v45, %v4587_v9  ;;  %v9501_v35 = vld [vmem:[#allocation9 + $0x5dc] ss:$24 sps:$4 sm:$0xff]  }
 0x3f7   :  { %v4631_v49 = vpop.f32.mrf.mxu1  ;;  %6645 = vmatprep.subr.bf16.mxu1 %v9444_v42  ;;  %v9507_v42 = vld [vmem:[#allocation9 + $0x5ac] ss:$24 sps:$4 sm:$0xff]   ;;  %v9513_v45 = vld [vmem:[#allocation9 + $0x57c] ss:$24 sps:$4 sm:$0xff]  }
 0x3f8   :  { %v4632_v52 = vadd.f32 %v4631_v49, %v4589_v48  ;;  %v9511_v48 = vld [vmem:[#allocation9 + $0x578] ss:$24 sps:$4 sm:$0xff]   ;;  %v9519_v49 = vld [vmem:[#allocation9 + $0x54c] ss:$24 sps:$4 sm:$0xff]  }
 0x3f9   :  { %v4633_v55 = vpop.f32.mrf.mxu1  ;;  %v9522_v9 = vld [vmem:[#allocation9 + $0x554] ss:$24 sps:$4 sm:$0xff]  }
 0x3fa   :  { %v4634_v56 = vadd.f32 %v4633_v55, %v4591_v53  ;;  %6646 = vmatpush2.bf16.msra.mxu1 %v9442_v50  ;;  %v10133_v61 = vpack.c.bf16 %v4632_v52, %v4628_v59  ;;  %v9508_v50 = vld [vmem:[#allocation9 + $0x5b0] ss:$24 sps:$4 sm:$0xff]   ;;  %v9528_v55 = vld [vmem:[#allocation9 + $0x524] ss:$24 sps:$4 sm:$0xff]   ;;  %v9534_v59 = vld [vmem:[#allocation9 + $0x4f4] ss:$24 sps:$4 sm:$0xff]  }
 0x3fb   :  { %6647 = vmatprep.subr.bf16.mxu1 %v9450_v51  ;;  %v9514_v51 = vld [vmem:[#allocation9 + $0x580] ss:$24 sps:$4 sm:$0xff]   ;;  %v9520_v52 = vld [vmem:[#allocation9 + $0x550] ss:$24 sps:$4 sm:$0xff]  }
 0x3fc   :  { %v10131_v44 = vpack.c.bf16 %v4634_v56, %v4630_v12  ;;  %v9517_v53 = vld [vmem:[#allocation9 + $0x548] ss:$24 sps:$4 sm:$0xff]   ;;  %v9523_v12 = vld [vmem:[#allocation9 + $0x518] ss:$24 sps:$4 sm:$0xff]   ;;  %v9531_v56 = vld [vmem:[#allocation9 + $0x4ec] ss:$24 sps:$4 sm:$0xff]  }
 0x3fe   :  { %6648 = vmatpush2.bf16.msra.mxu1 %v9448_v57  ;;  %6520 = vmatprep.mubr.bf16.mxu0 %v10131_v44  ;;  %v9526_v57 = vld [vmem:[#allocation9 + $0x520] ss:$24 sps:$4 sm:$0xff]  }
 0x3ff   :  { %6649 = vmatprep.mubr.bf16.mxu1 %v10131_v44  ;;  %6521 = vmatmul.mubr.bf16.vlgmr.msra.gmra.mxu0 %v10133_v61 }
 0x400   :  { %6575 = vmatpush1.bf16.msra.mxu0 %v9451_v60  ;;  %6606 = vmatprep.mubr.bf16.mxu0 %v10119_v11  ;;  %v9529_v60 = vld [vmem:[#allocation9 + $0x4e8] ss:$24 sps:$4 sm:$0xff]  }
 0x401   :  { %6650 = vmatmul.mubr.bf16.vlgmr.msra.gmra.mxu1 %v10133_v61  ;;  %6703 = vmatprep.subr.bf16.mxu1 %v9456_v62  ;;  %v9537_v62 = vld [vmem:[#allocation9 + $0x4bc] ss:$24 sps:$4 sm:$0xff]  }
 0x402   :  { %6704 = vmatpush1.bf16.msra.mxu1 %v9454_v63  ;;  %6735 = vmatprep.mubr.bf16.mxu1 %v10119_v11  ;;  %v9480_v11 = vld [vmem:[#allocation9 + $0x3a4] ss:$24 sps:$4 sm:$0xff]   ;;  %v9532_v63 = vld [vmem:[#allocation9 + $0x4f0] ss:$24 sps:$4 sm:$0xff]  }
 0x403   :  { %6576 = vmatprep.subr.bf16.mxu0 %v9459_v0  ;;  %6705 = vmatprep.subr.bf16.mxu1 %v9462_v1  ;;  %v9540_v0 = vld [vmem:[#allocation9 + $0x4c4] ss:$24 sps:$4 sm:$0xff]   ;;  %v9535_v1 = vld [vmem:[#allocation9 + $0x4b8] ss:$24 sps:$4 sm:$0xff]  }
 0x404   :  { %6577 = vmatpush1.bf16.msra.mxu0 %v9457_v38  ;;  %v9543_v38 = vld [vmem:[#allocation9 + $0x48c] ss:$24 sps:$4 sm:$0xff]  }
 0x405   :  { %6578 = vmatprep.subr.bf16.mxu0 %v9465_v2  ;;  %v9538_v2 = vld [vmem:[#allocation9 + $0x4c0] ss:$24 sps:$4 sm:$0xff]  }
 0x406   :  { %6706 = vmatpush1.bf16.msra.mxu1 %v9460_v3  ;;  %v9546_v3 = vld [vmem:[#allocation9 + $0x494] ss:$24 sps:$4 sm:$0xff]  }
 0x407   :  { %6707 = vmatprep.subr.bf16.mxu1 %v9468_v4  ;;  %v9541_v4 = vld [vmem:[#allocation9 + $0x488] ss:$24 sps:$4 sm:$0xff]  }
 0x408   :  { %6579 = vmatpush1.bf16.msra.mxu0 %v9463_v21  ;;  %v9549_v21 = vld [vmem:[#allocation9 + $0x164] ss:$24 sps:$4 sm:$0xff]  }
 0x409   :  { %6580 = vmatprep.subr.bf16.mxu0 %v9471_v5  ;;  %v9544_v5 = vld [vmem:[#allocation9 + $0x490] ss:$24 sps:$4 sm:$0xff]  }
 0x40a   :  { %6708 = vmatpush1.bf16.msra.mxu1 %v9466_v6  ;;  %v9631_v6 = vld [vmem:[#allocation12 + $0x78] sm:$0xff]  }
 0x40b   :  { %6709 = vmatprep.subr.bf16.mxu1 %v9474_v7  ;;  %v9547_v7 = vld [vmem:[#allocation9 + $0x160] ss:$24 sps:$4 sm:$0xff]  }
 0x40c   :  { %6581 = vmatpush1.bf16.msra.mxu0 %v9469_v8  ;;  %v9552_v8 = vld [vmem:[#allocation9 + $0x134] ss:$24 sps:$4 sm:$0xff]  }
 0x40d   :  { %6582 = vmatprep.subr.bf16.mxu0 %v9477_v10  ;;  %v9632_v10 = vld [vmem:[#allocation12 + $0x38] sm:$0xff]  }
 0x40e   :  { %6710 = vmatpush1.bf16.msra.mxu1 %v9472_v14  ;;  %v9636_v14 = vld [vmem:[#allocation12 + $0x70] sm:$0xff]  }
 0x40f   :  { %6711 = vmatprep.subr.bf16.mxu1 %v9480_v11  ;;  %v9550_v11 = vld [vmem:[#allocation9 + $0x130] ss:$24 sps:$4 sm:$0xff]  }
 0x410   :  { %6583 = vmatpush1.bf16.msra.mxu0 %v9475_v17  ;;  %v9555_v17 = vld [vmem:[#allocation9 + $0x104] ss:$24 sps:$4 sm:$0xff]  }
 0x411   :  { %6584 = vmatprep.subr.bf16.mxu0 %v9483_v19  ;;  %v9637_v19 = vld [vmem:[#allocation12 + $0x30] sm:$0xff]  }
 0x412   :  { %6712 = vmatpush1.bf16.msra.mxu1 %v9478_v20  ;;  %v9641_v20 = vld [vmem:[#allocation12 + $0x68] sm:$0xff]  }
 0x413   :  { %6713 = vmatprep.subr.bf16.mxu1 %v9486_v22  ;;  %v9553_v22 = vld [vmem:[#allocation9 + $0x100] ss:$24 sps:$4 sm:$0xff]  }
 0x414   :  { %6585 = vmatpush1.bf16.msra.mxu0 %v9481_v24  ;;  %v9558_v24 = vld [vmem:[#allocation9 + $0xd4] ss:$24 sps:$4 sm:$0xff]  }
 0x415   :  { %6586 = vmatprep.subr.bf16.mxu0 %v9489_v25  ;;  %v9642_v25 = vld [vmem:[#allocation12 + $0x28] sm:$0xff]  }
 0x416   :  { %6714 = vmatpush1.bf16.msra.mxu1 %v9484_v26  ;;  %v9646_v26 = vld [vmem:[#allocation12 + $0x60] sm:$0xff]  }
 0x417   :  { %6715 = vmatprep.subr.bf16.mxu1 %v9492_v29  ;;  %v9556_v29 = vld [vmem:[#allocation9 + $0xd0] ss:$24 sps:$4 sm:$0xff]  }
 0x418   :  { %6587 = vmatpush1.bf16.msra.mxu0 %v9487_v30  ;;  %v9651_v30 = vld [vmem:[#allocation12 + $0x58] sm:$0xff]  }
 0x419   :  { %6588 = vmatprep.subr.bf16.mxu0 %v9495_v33  ;;  %v9559_v33 = vld [vmem:[#allocation9 + $0xa0] ss:$24 sps:$4 sm:$0xff]  }
 0x41a   :  { %6716 = vmatpush1.bf16.msra.mxu1 %v9490_v31  ;;  %v9564_v31 = vld [vmem:[#allocation9 + $0x74] ss:$24 sps:$4 sm:$0xff]  }
 0x41b   :  { %6717 = vmatprep.subr.bf16.mxu1 %v9498_v32  ;;  %v9652_v32 = vld [vmem:[#allocation12 + $0x18] sm:$0xff]  }
 0x41c   :  { %6589 = vmatpush1.bf16.msra.mxu0 %v9493_v34  ;;  %v9653_v34 = vld [vmem:[#allocation12 + $0x50] sm:$0xff]  }
 0x41d   :  { %6590 = vmatprep.subr.bf16.mxu0 %v9501_v35  ;;  %v9562_v35 = vld [vmem:[#allocation9 + $0x70] ss:$24 sps:$4 sm:$0xff]  }
 0x41e   :  { %6718 = vmatpush1.bf16.msra.mxu1 %v9496_v37  ;;  %v9567_v37 = vld [vmem:[#allocation9 + $0x44] ss:$24 sps:$4 sm:$0xff]  }
 0x41f   :  { %6719 = vmatprep.subr.bf16.mxu1 %v9504_v36  ;;  %v9654_v36 = vld [vmem:[#allocation12 + $0x10] sm:$0xff]  }
 0x420   :  { %6591 = vmatpush2.bf16.msra.mxu0 %v9499_v40  ;;  %v9655_v40 = vld [vmem:[#allocation12 + $0x48] sm:$0xff]  }
 0x421   :  { %6592 = vmatprep.subr.bf16.mxu0 %v9507_v42  ;;  %v9565_v42 = vld [vmem:[#allocation9 + $0x40] ss:$24 sps:$4 sm:$0xff]  }
 0x422   :  { %6720 = vmatpush2.bf16.msra.mxu1 %v9502_v54  ;;  %v9570_v54 = vld [vmem:[#allocation9 + $0x14] ss:$24 sps:$4 sm:$0xff]  }
 0x423   :  { %6721 = vmatprep.subr.bf16.mxu1 %v9510_v43  ;;  %v9656_v43 = vld [vmem:[#allocation12 + $0x8] sm:$0xff]  }
 0x424   :  { %6593 = vmatpush2.bf16.msra.mxu0 %v9505_v15  ;;  %v9657_v15 = vld [vmem:[#allocation12 + $0x40] sm:$0xff]  }
 0x425   :  { %6594 = vmatprep.subr.bf16.mxu0 %v9513_v45  ;;  %v9568_v45 = vld [vmem:[#allocation9 + $0x10] ss:$24 sps:$4 sm:$0xff]  }
 0x426   :  { %6722 = vmatpush2.bf16.msra.mxu1 %v9508_v50  ;;  %v9573_v50 = vld [vmem:[#allocation9 + $0x2e4] ss:$24 sps:$4 sm:$0xff]  }
 0x427   :  { %6723 = vmatprep.subr.bf16.mxu1 %v9516_v13  ;;  %v9658_v13 = vld [vmem:[#allocation12] sm:$0xff]  }
 0x428   :  { %6595 = vmatpush2.bf16.msra.mxu0 %v9511_v48  ;;  %v9659_v48 = vld [vmem:[#allocation12 + $0xf8] sm:$0xff]  }
 0x429   :  { %6596 = vmatprep.subr.bf16.mxu0 %v9519_v49  ;;  %v9571_v49 = vld [vmem:[#allocation9 + $0x2e0] ss:$24 sps:$4 sm:$0xff]  }
 0x42a   :  { %6724 = vmatpush2.bf16.msra.mxu1 %v9514_v51  ;;  %v9576_v51 = vld [vmem:[#allocation9 + $0x2b4] ss:$24 sps:$4 sm:$0xff]  }
 0x42b   :  { %6725 = vmatprep.subr.bf16.mxu1 %v9522_v9  ;;  %v9574_v9 = vld [vmem:[#allocation9 + $0x2b0] ss:$24 sps:$4 sm:$0xff]  }
 0x42c   :  { %6597 = vmatpush2.bf16.msra.mxu0 %v9517_v53  ;;  %v9579_v53 = vld [vmem:[#allocation9 + $0x284] ss:$24 sps:$4 sm:$0xff]  }
 0x42d   :  { %6598 = vmatprep.subr.bf16.mxu0 %v9525_v16  ;;  %v9577_v16 = vld [vmem:[#allocation9 + $0x280] ss:$24 sps:$4 sm:$0xff]  }
 0x42e   :  { %6726 = vmatpush2.bf16.msra.mxu1 %v9520_v52  ;;  %v9582_v52 = vld [vmem:[#allocation9 + $0x254] ss:$24 sps:$4 sm:$0xff]  }
 0x42f   :  { %6727 = vmatprep.subr.bf16.mxu1 %v9528_v55  ;;  %v9580_v55 = vld [vmem:[#allocation9 + $0x250] ss:$24 sps:$4 sm:$0xff]  }
 0x430   :  { %6599 = vmatpush2.bf16.msra.mxu0 %v9523_v12  ;;  %v9585_v12 = vld [vmem:[#allocation9 + $0x224] ss:$24 sps:$4 sm:$0xff]  }
 0x431   :  { %6600 = vmatprep.subr.bf16.mxu0 %v9531_v56  ;;  %v9583_v56 = vld [vmem:[#allocation9 + $0x220] ss:$24 sps:$4 sm:$0xff]  }
 0x432   :  { %6728 = vmatpush2.bf16.msra.mxu1 %v9526_v57  ;;  %v9588_v57 = vld [vmem:[#allocation9 + $0x1f4] ss:$24 sps:$4 sm:$0xff]  }
 0x433   :  { %6729 = vmatprep.subr.bf16.mxu1 %v9534_v59  ;;  %v9586_v59 = vld [vmem:[#allocation9 + $0x1f0] ss:$24 sps:$4 sm:$0xff]  }
 0x434   :  { %6601 = vmatpush2.bf16.msra.mxu0 %v9529_v60  ;;  %v9591_v60 = vld [vmem:[#allocation9 + $0x1c4] ss:$24 sps:$4 sm:$0xff]  }
 0x435   :  { %6602 = vmatprep.subr.bf16.mxu0 %v9537_v62  ;;  %v9589_v62 = vld [vmem:[#allocation9 + $0x1c0] ss:$24 sps:$4 sm:$0xff]  }
 0x436   :  { %6730 = vmatpush2.bf16.msra.mxu1 %v9532_v63  ;;  %v9594_v63 = vld [vmem:[#allocation9 + $0x194] ss:$24 sps:$4 sm:$0xff]  }
 0x437   :  { %6731 = vmatprep.subr.bf16.mxu1 %v9540_v0  ;;  %v9592_v0 = vld [vmem:[#allocation9 + $0x190] ss:$24 sps:$4 sm:$0xff]  }
 0x438   :  { %6603 = vmatpush2.bf16.msra.mxu0 %v9535_v1  ;;  %v9597_v1 = vld [vmem:[#allocation9 + $0x764] ss:$24 sps:$4 sm:$0xff]  }
 0x439   :  { %6604 = vmatprep.subr.bf16.mxu0 %v9543_v38  ;;  %v9595_v38 = vld [vmem:[#allocation9 + $0x760] ss:$24 sps:$4 sm:$0xff]  }
 0x43a   :  { %6732 = vmatpush2.bf16.msra.mxu1 %v9538_v2  ;;  %v9600_v2 = vld [vmem:[#allocation9 + $0x734] ss:$24 sps:$4 sm:$0xff]  }
 0x43b   :  { %6733 = vmatprep.subr.bf16.mxu1 %v9546_v3  ;;  %v9598_v3 = vld [vmem:[#allocation9 + $0x730] ss:$24 sps:$4 sm:$0xff]  }
 0x43c   :  { %6605 = vmatpush2.bf16.msra.mxu0 %v9541_v4  ;;  %v9603_v4 = vld [vmem:[#allocation9 + $0x704] ss:$24 sps:$4 sm:$0xff]  }
 0x43d   :  { %6660 = vmatprep.subr.bf16.mxu0 %v9549_v21  ;;  %v9601_v21 = vld [vmem:[#allocation9 + $0x700] ss:$24 sps:$4 sm:$0xff]  }
 0x43e   :  { %6734 = vmatpush2.bf16.msra.mxu1 %v9544_v5  ;;  %v9606_v5 = vld [vmem:[#allocation9 + $0x6d4] ss:$24 sps:$4 sm:$0xff]  }
 0x43f   :  { %6607 = vmatmul.mubr.bf16.vlgmr.msra.gmra.mxu0 %v10121_v18  ;;  %8259 = vmatprep.subr.bf16.mxu1 %v9631_v6  ;;  %v9604_v6 = vld [vmem:[#allocation9 + $0x6d0] ss:$24 sps:$4 sm:$0xff]  }
 0x440   :  { %6661 = vmatpush1.bf16.msra.mxu0 %v9547_v7  ;;  %6692 = vmatprep.mubr.bf16.mxu0 %v10109_v46  ;;  %v9561_v46 = vld [vmem:[#allocation9 + $0xa4] ss:$24 sps:$4 sm:$0xff]  }
 0x441   :  { %6736 = vmatmul.mubr.bf16.vlgmr.msra.gmra.mxu1 %v10121_v18  ;;  %6662 = vmatprep.subr.bf16.mxu0 %v9552_v8  ;;  %v9647_v18 = vld [vmem:[#allocation12 + $0x20] sm:$0xff]   ;;  %v9607_v8 = vld [vmem:[#allocation9 + $0x6a0] ss:$24 sps:$4 sm:$0xff]  }
 0x442   :  { %8260 = vmatpush3.bf16.msra.mxu1 %v9632_v10  ;;  %v9609_v7 = vld [vmem:[#allocation9 + $0x6a4] ss:$24 sps:$4 sm:$0xff]   ;;  %v9612_v10 = vld [vmem:[#allocation9 + $0x674] ss:$24 sps:$4 sm:$0xff]  }
 0x443   :  { %8261 = vmatprep.subr.bf16.mxu1 %v9636_v14  ;;  %v9615_v14 = vld [vmem:[#allocation9 + $0x644] ss:$24 sps:$4 sm:$0xff]  }
 0x444   :  { %6663 = vmatpush1.bf16.msra.mxu0 %v9550_v11  ;;  %v9618_v11 = vld [vmem:[#allocation9 + $0x614] ss:$24 sps:$4 sm:$0xff]  }
 0x445   :  { %6664 = vmatprep.subr.bf16.mxu0 %v9555_v17  ;;  %v9616_v17 = vld [vmem:[#allocation9 + $0x610] ss:$24 sps:$4 sm:$0xff]  }
 0x446   :  { %8262 = vmatpush3.bf16.msra.mxu1 %v9637_v19  ;;  %v9621_v19 = vld [vmem:[#allocation9 + $0x8e4] ss:$24 sps:$4 sm:$0xff]  }
 0x447   :  { %8263 = vmatprep.subr.bf16.mxu1 %v9641_v20  ;;  %v9619_v20 = vld [vmem:[#allocation9 + $0x8e0] ss:$24 sps:$4 sm:$0xff]  }
 0x448   :  { %6665 = vmatpush1.bf16.msra.mxu0 %v9553_v22  ;;  %v9624_v22 = vld [vmem:[#allocation9 + $0x8b4] ss:$24 sps:$4 sm:$0xff]  }
 0x449   :  { %6666 = vmatprep.subr.bf16.mxu0 %v9558_v24  ;;  %v9622_v24 = vld [vmem:[#allocation9 + $0x8b0] ss:$24 sps:$4 sm:$0xff]  }
 0x44a   :  { %8264 = vmatpush3.bf16.msra.mxu1 %v9642_v25  ;;  %v9627_v25 = vld [vmem:[#allocation9 + $0x884] ss:$24 sps:$4 sm:$0xff]  }
 0x44b   :  { %8265 = vmatprep.subr.bf16.mxu1 %v9646_v26  ;;  %v9625_v26 = vld [vmem:[#allocation9 + $0x880] ss:$24 sps:$4 sm:$0xff]  }
 0x44c   :  { %6667 = vmatpush1.bf16.msra.mxu0 %v9556_v29  ;;  %v9630_v29 = vld [vmem:[#allocation9 + $0x854] ss:$24 sps:$4 sm:$0xff]  }
 0x44d   :  { %6668 = vmatprep.subr.bf16.mxu0 %v9561_v46  ;;  %v9628_v46 = vld [vmem:[#allocation9 + $0x850] ss:$24 sps:$4 sm:$0xff]  }
 0x44e   :  { %8266 = vmatpush3.bf16.msra.mxu1 %v9647_v18  ;;  %v9635_v18 = vld [vmem:[#allocation9 + $0x824] ss:$24 sps:$4 sm:$0xff]  }
 0x44f   :  { %8267 = vmatprep.subr.bf16.mxu1 %v9651_v30  ;;  %v9633_v30 = vld [vmem:[#allocation9 + $0x820] ss:$24 sps:$4 sm:$0xff]  }
 0x450   :  { %6669 = vmatpush1.bf16.msra.mxu0 %v9559_v33  ;;  %v9640_v33 = vld [vmem:[#allocation9 + $0x7f4] ss:$24 sps:$4 sm:$0xff]  }
 0x451   :  { %6670 = vmatprep.subr.bf16.mxu0 %v9564_v31  ;;  %v9638_v31 = vld [vmem:[#allocation9 + $0x7f0] ss:$24 sps:$4 sm:$0xff]  }
 0x452   :  { %8268 = vmatpush3.bf16.msra.mxu1 %v9652_v32  ;;  %v6436_v32 = vpop.f32.mrf.mxu0 }
 0x453   :  { %8269 = vmatprep.subr.bf16.mxu1 %v9653_v34  ;;  %v9645_v34 = vld [vmem:[#allocation9 + $0x7c4] ss:$24 sps:$4 sm:$0xff]  }
 0x454   :  { %6671 = vmatpush1.bf16.msra.mxu0 %v9562_v35  ;;  %v9643_v35 = vld [vmem:[#allocation9 + $0x7c0] ss:$24 sps:$4 sm:$0xff]  }
 0x455   :  { %6672 = vmatprep.subr.bf16.mxu0 %v9567_v37  ;;  %v6438_v37 = vpop.f32.mrf.mxu0 }
 0x456   :  { %8270 = vmatpush3.bf16.msra.mxu1 %v9654_v36  ;;  %v6479_v36 = vpop.f32.mrf.mxu1 }
 0x457   :  { %8271 = vmatprep.subr.bf16.mxu1 %v9655_v40  ;;  %v9650_v40 = vld [vmem:[#allocation9 + $0x794] ss:$24 sps:$4 sm:$0xff]  }
 0x458   :  { %6673 = vmatpush1.bf16.msra.mxu0 %v9565_v42  ;;  %v9648_v42 = vld [vmem:[#allocation9 + $0x790] ss:$24 sps:$4 sm:$0xff]  }
 0x459   :  { %6674 = vmatprep.subr.bf16.mxu0 %v9570_v54  ;;  %v6440_v54 = vpop.f32.mrf.mxu0 }
 0x45a   :  { %8272 = vmatpush3.bf16.msra.mxu1 %v9656_v43  ;;  %v6481_v43 = vpop.f32.mrf.mxu1 }
 0x45b   :  { %8273 = vmatprep.subr.bf16.mxu1 %v9657_v15  ;;  %v10146_v15 = vld [vmem:[#allocation10] sm:$0x3f] }
 0x45c   :  { %6675 = vmatpush1.bf16.msra.mxu0 %v9568_v45  ;;  %v6442_v45 = vpop.f32.mrf.mxu0 }
 0x45d   :  { %6676 = vmatprep.subr.bf16.mxu0 %v9573_v50  ;;  %v6483_v50 = vpop.f32.mrf.mxu1 }
 0x45e   :  { %8274 = vmatpush3.bf16.msra.mxu1 %v9658_v13  ;;  %v4939_v13 = vrot.slane %v10146_v15, %v10040_v41 }
 0x45f   :  { %8281 = vmatprep.subr.bf16.mxu1 %v9659_v48  ;;  %v4935_v48 = vrot.slane %v10146_v15, %v10047_v58  ;;  %v9676_v58 = vld [vmem:[#allocation12 + $0x138] sm:$0xff]  }
 0x460   :  { %6677 = vmatpush2.bf16.msra.mxu0 %v9571_v49 }
 0x461   :  { %6678 = vmatprep.subr.bf16.mxu0 %v9576_v51  ;;  %v6441_v51 = vadd.f32 %v6440_v54, %v4935_v48 }
 0x464   :  { %6679 = vmatpush2.bf16.msra.mxu0 %v9574_v9  ;;  %v6485_v9 = vpop.f32.mrf.mxu1 }
 0x465   :  { %6680 = vmatprep.subr.bf16.mxu0 %v9579_v53 }
 0x468   :  { %6681 = vmatpush2.bf16.msra.mxu0 %v9577_v16  ;;  %v6439_v16 = vadd.f32 %v6438_v37, %v4939_v13  ;;  %v4947_v37 = vrot.slane %v10146_v15, %v10065_v39 }
 0x469   :  { %6682 = vmatprep.subr.bf16.mxu0 %v9582_v52  ;;  %v6443_v52 = vadd.f32 %v6442_v45, %v4939_v13 }
 0x46c   :  { %6683 = vmatpush2.bf16.msra.mxu0 %v9580_v55  ;;  %v6437_v55 = vadd.f32 %v6436_v32, %v4935_v48  ;;  %v9687_v48 = vld [vmem:[#allocation12 + $0x148] sm:$0xff]  }
 0x46d   :  { %6684 = vmatprep.subr.bf16.mxu0 %v9585_v12  ;;  %v6484_v12 = vadd.f32 %v6483_v50, %v6441_v51 }
 0x470   :  { %6685 = vmatpush2.bf16.msra.mxu0 %v9583_v56 }
 0x471   :  { %6686 = vmatprep.subr.bf16.mxu0 %v9588_v57  ;;  %v6482_v57 = vadd.f32 %v6481_v43, %v6439_v16  ;;  %v9686_v43 = vld [vmem:[#allocation12 + $0x110] sm:$0xff]  }
 0x474   :  { %6687 = vmatpush2.bf16.msra.mxu0 %v9586_v59  ;;  %v6486_v59 = vadd.f32 %v6485_v9, %v6443_v52 }
 0x475   :  { %6688 = vmatprep.subr.bf16.mxu0 %v9591_v60  ;;  %v6480_v60 = vadd.f32 %v6479_v36, %v6437_v55  ;;  %v9685_v36 = vld [vmem:[#allocation12 + $0x150] sm:$0xff]  }
 0x478   :  { %6689 = vmatpush2.bf16.msra.mxu0 %v9589_v62 }
 0x479   :  { %6690 = vmatprep.subr.bf16.mxu0 %v9594_v63 }
 0x47c   :  { %6691 = vmatpush2.bf16.msra.mxu0 %v9592_v0 }
 0x47d   :  { %6746 = vmatprep.subr.bf16.mxu0 %v9597_v1  ;;  %v9675_v1 = vld [vmem:[#allocation12 + $0x178] sm:$0xff]  }
 0x47f   :  { %6693 = vmatmul.mubr.bf16.vlgmr.msra.gmra.mxu0 %v10111_v47  ;;  %v9610_v47 = vld [vmem:[#allocation9 + $0x670] ss:$24 sps:$4 sm:$0xff]  }
 0x480   :  { %6747 = vmatpush1.bf16.msra.mxu0 %v9595_v38  ;;  %6778 = vmatprep.mubr.bf16.mxu0 %v10131_v44  ;;  %v9613_v44 = vld [vmem:[#allocation9 + $0x640] ss:$24 sps:$4 sm:$0xff]  }
 0x481   :  { %6748 = vmatprep.subr.bf16.mxu0 %v9600_v2  ;;  %v9677_v38 = vld [vmem:[#allocation12 + $0x170] sm:$0xff]  }
 0x484   :  { %6749 = vmatpush1.bf16.msra.mxu0 %v9598_v3  ;;  %v9660_v3 = vld [vmem:[#allocation12 + $0xb8] sm:$0xff]  }
 0x485   :  { %6750 = vmatprep.subr.bf16.mxu0 %v9603_v4 }
 0x488   :  { %6751 = vmatpush1.bf16.msra.mxu0 %v9601_v21  ;;  %v9661_v21 = vld [vmem:[#allocation12 + $0xf0] sm:$0xff]  }
 0x489   :  { %6752 = vmatprep.subr.bf16.mxu0 %v9606_v5  ;;  %v9678_v5 = vld [vmem:[#allocation12 + $0x130] sm:$0xff]  }
 0x48c   :  { %6753 = vmatpush1.bf16.msra.mxu0 %v9604_v6  ;;  %v9679_v6 = vld [vmem:[#allocation12 + $0x168] sm:$0xff]  }
 0x48d   :  { %6754 = vmatprep.subr.bf16.mxu0 %v9609_v7  ;;  %v9662_v7 = vld [vmem:[#allocation12 + $0xb0] sm:$0xff]  }
 0x490   :  { %6755 = vmatpush1.bf16.msra.mxu0 %v9607_v8  ;;  %v9663_v8 = vld [vmem:[#allocation12 + $0xe8] sm:$0xff]  }
 0x491   :  { %6756 = vmatprep.subr.bf16.mxu0 %v9612_v10  ;;  %v9680_v10 = vld [vmem:[#allocation12 + $0x128] sm:$0xff]  }
 0x494   :  { %6757 = vmatpush1.bf16.msra.mxu0 %v9610_v47  ;;  %v9681_v47 = vld [vmem:[#allocation12 + $0x160] sm:$0xff]  }
 0x495   :  { %6758 = vmatprep.subr.bf16.mxu0 %v9615_v14  ;;  %v9664_v14 = vld [vmem:[#allocation12 + $0xa8] sm:$0xff]  }
 0x498   :  { %6759 = vmatpush1.bf16.msra.mxu0 %v9613_v44  ;;  %v9665_v44 = vld [vmem:[#allocation12 + $0xe0] sm:$0xff]  }
 0x499   :  { %6760 = vmatprep.subr.bf16.mxu0 %v9618_v11  ;;  %v9682_v11 = vld [vmem:[#allocation12 + $0x120] sm:$0xff]  }
 0x49c   :  { %6761 = vmatpush1.bf16.msra.mxu0 %v9616_v17  ;;  %v9683_v17 = vld [vmem:[#allocation12 + $0x158] sm:$0xff]  }
 0x49d   :  { %6762 = vmatprep.subr.bf16.mxu0 %v9621_v19  ;;  %v9666_v19 = vld [vmem:[#allocation12 + $0xa0] sm:$0xff]  }
 0x4a0   :  { %6763 = vmatpush2.bf16.msra.mxu0 %v9619_v20  ;;  %v9667_v20 = vld [vmem:[#allocation12 + $0xd8] sm:$0xff]  }
 0x4a1   :  { %6764 = vmatprep.subr.bf16.mxu0 %v9624_v22  ;;  %v9684_v22 = vld [vmem:[#allocation12 + $0x118] sm:$0xff]  }
 0x4a4   :  { %6765 = vmatpush2.bf16.msra.mxu0 %v9622_v24  ;;  %v9668_v24 = vld [vmem:[#allocation12 + $0x98] sm:$0xff]  }
 0x4a5   :  { %6766 = vmatprep.subr.bf16.mxu0 %v9627_v25  ;;  %v9669_v25 = vld [vmem:[#allocation12 + $0xd0] sm:$0xff]  }
 0x4a8   :  { %6767 = vmatpush2.bf16.msra.mxu0 %v9625_v26  ;;  %v9670_v26 = vld [vmem:[#allocation12 + $0x90] sm:$0xff]  }
 0x4a9   :  { %6768 = vmatprep.subr.bf16.mxu0 %v9630_v29  ;;  %v9671_v29 = vld [vmem:[#allocation12 + $0xc8] sm:$0xff]  }
 0x4ac   :  { %6769 = vmatpush2.bf16.msra.mxu0 %v9628_v46  ;;  %v9672_v46 = vld [vmem:[#allocation12 + $0x88] sm:$0xff]  }
 0x4ad   :  { %6770 = vmatprep.subr.bf16.mxu0 %v9635_v18  ;;  %v9673_v18 = vld [vmem:[#allocation12 + $0xc0] sm:$0xff]  }
 0x4b0   :  { %6771 = vmatpush2.bf16.msra.mxu0 %v9633_v30  ;;  %v9674_v30 = vld [vmem:[#allocation12 + $0x80] sm:$0xff]  }
 0x4b1   :  { %6772 = vmatprep.subr.bf16.mxu0 %v9640_v33  ;;  %v6565_v33 = vpop.f32.mrf.mxu1 }
 0x4b4   :  { %6773 = vmatpush2.bf16.msra.mxu0 %v9638_v31  ;;  %v6567_v31 = vpop.f32.mrf.mxu1 }
 0x4b5   :  { %6774 = vmatprep.subr.bf16.mxu0 %v9645_v34  ;;  %v6568_v50 = vadd.f32 %v6567_v31, %v4947_v37 }
 0x4b6   :  { %v6569_v32 = vpop.f32.mrf.mxu1 }
 0x4b8   :  { %6775 = vmatpush2.bf16.msra.mxu0 %v9643_v35  ;;  %v6571_v34 = vpop.f32.mrf.mxu1 }
 0x4b9   :  { %6776 = vmatprep.subr.bf16.mxu0 %v9650_v40  ;;  %v4943_v40 = vrot.slane %v10146_v15, %v10062_v28  ;;  %v6572_v16 = vadd.f32 %v6571_v34, %v4947_v37 }
 0x4bb   :  { %v6570_v13 = vadd.f32 %v6569_v32, %v4943_v40 }
 0x4bc   :  { %6777 = vmatpush2.bf16.msra.mxu0 %v9648_v42 }
 0x4bd   :  { %8303 = vmatprep.subr.bf16.mxu0 %v9675_v1 }
 0x4bf   :  { %6779 = vmatmul.mubr.bf16.vlgmr.msra.gmra.mxu0 %v10133_v61  ;;  %v6522_v49 = vpop.f32.mrf.mxu0 }
 0x4c0   :  { %v6523_v61 = vadd.f32 %v6522_v49, %v6480_v60  ;;  %8304 = vmatpush3.bf16.msra.mxu0 %v9676_v58  ;;  %v6566_v49 = vadd.f32 %v6565_v33, %v4943_v40  ;;  %v9690_v60 = vld [vmem:[#allocation12 + $0x100] sm:$0xff]  }
 0x4c1   :  { %v6524_v53 = vpop.f32.mrf.mxu0  ;;  %8305 = vmatprep.subr.bf16.mxu0 %v9677_v38  ;;  %v6651_v35 = vpop.f32.mrf.mxu1 }
 0x4c2   :  { %v6525_v41 = vadd.f32 %v6524_v53, %v6482_v57  ;;  %v9688_v53 = vld [vmem:[#allocation12 + $0x108] sm:$0xff]  }
 0x4c3   :  { %v6526_v56 = vpop.f32.mrf.mxu0  ;;  %v6653_v42 = vpop.f32.mrf.mxu1 }
 0x4c4   :  { %v6527_v62 = vadd.f32 %v6526_v56, %v6484_v12  ;;  %8306 = vmatpush3.bf16.msra.mxu0 %v9678_v5  ;;  %v9689_v56 = vld [vmem:[#allocation12 + $0x140] sm:$0xff]  }
 0x4c5   :  { %v6528_v63 = vpop.f32.mrf.mxu0  ;;  %8307 = vmatprep.subr.bf16.mxu0 %v9679_v6  ;;  %v6655_v51 = vpop.f32.mrf.mxu1 }
 0x4c6   :  { %v6529_v0 = vadd.f32 %v6528_v63, %v6486_v59  ;;  %v6789_v4 = vpack.c.bf16 %v6527_v62, %v6523_v61 }
 0x4c7   :  { %v6657_v57 = vpop.f32.mrf.mxu1 }
 0x4c8   :  { %v6790_v2 = vpack.c.bf16 %v6529_v0, %v6525_v41  ;;  %8308 = vmatpush3.bf16.msra.mxu0 %v9680_v10 }
 0x4c9   :  { %8309 = vmatprep.subr.bf16.mxu0 %v9681_v47 }
 0x4ca   :  { %7218 = vmatprep.mubr.bf16.mxu1 %v6790_v2 }
 0x4cb   :  { %7219 = vmatmul.mubr.bf16.vlgmr.msra.gmra.mxu1 %v6789_v4  ;;  %v4955_v4 = vrot.slane %v10146_v15, %v10080_v27 }
 0x4cc   :  { %8282 = vmatpush3.bf16.msra.mxu1 %v9660_v3  ;;  %8310 = vmatpush3.bf16.msra.mxu0 %v9682_v11 }
 0x4cd   :  { %8283 = vmatprep.subr.bf16.mxu1 %v9661_v21  ;;  %8311 = vmatprep.subr.bf16.mxu0 %v9683_v17  ;;  %v4951_v21 = vrot.slane %v10146_v15, %v10083_v23 }
 0x4d0   :  { %8284 = vmatpush3.bf16.msra.mxu1 %v9662_v7  ;;  %8312 = vmatpush3.bf16.msra.mxu0 %v9684_v22 }
 0x4d1   :  { %8285 = vmatprep.subr.bf16.mxu1 %v9663_v8  ;;  %8313 = vmatprep.subr.bf16.mxu0 %v9685_v36 }
 0x4d4   :  { %8286 = vmatpush3.bf16.msra.mxu1 %v9664_v14  ;;  %8314 = vmatpush3.bf16.msra.mxu0 %v9686_v43 }
 0x4d5   :  { %8287 = vmatprep.subr.bf16.mxu1 %v9665_v44  ;;  %8315 = vmatprep.subr.bf16.mxu0 %v9687_v48 }
 0x4d8   :  { %8288 = vmatpush3.bf16.msra.mxu1 %v9666_v19  ;;  %8316 = vmatpush3.bf16.msra.mxu0 %v9688_v53 }
 0x4d9   :  { %8289 = vmatprep.subr.bf16.mxu1 %v9667_v20  ;;  %8317 = vmatprep.subr.bf16.mxu0 %v9689_v56 }
 0x4dc   :  { %8290 = vmatpush3.bf16.msra.mxu1 %v9668_v24  ;;  %8318 = vmatpush3.bf16.msra.mxu0 %v9690_v60 }
 0x4dd   :  { %8291 = vmatprep.subr.bf16.mxu1 %v9669_v25 }
 0x4e0   :  { %8292 = vmatpush3.bf16.msra.mxu1 %v9670_v26 }
 0x4e1   :  { %8293 = vmatprep.subr.bf16.mxu1 %v9671_v29 }
 0x4e4   :  { %8294 = vmatpush3.bf16.msra.mxu1 %v9672_v46 }
 0x4e5   :  { %8295 = vmatprep.subr.bf16.mxu1 %v9673_v18 }
 0x4e8   :  { %8296 = vmatpush3.bf16.msra.mxu1 %v9674_v30 }
 0x4ff   :  { %v6608_v54 = vpop.f32.mrf.mxu0 }
 0x500   :  { %v6609_v55 = vadd.f32 %v6608_v54, %v6566_v49  ;;  %v8201_v54 = vld [vmem:[#allocation13] ss:$0 sm:$0xff] }
 0x501   :  { %v6610_v45 = vpop.f32.mrf.mxu0  ;;  %v6737_v61 = vpop.f32.mrf.mxu1 }
 0x502   :  { %v6611_v52 = vadd.f32 %v6610_v45, %v6568_v50  ;;  %v6652_v41 = vadd.f32 %v6651_v35, %v6609_v55 }
 0x503   :  { %v6612_v9 = vpop.f32.mrf.mxu0  ;;  %v6739_v3 = vpop.f32.mrf.mxu1 }
 0x504   :  { %v6613_v39 = vadd.f32 %v6612_v9, %v6570_v13  ;;  %v6654_v62 = vadd.f32 %v6653_v42, %v6611_v52 }
 0x505   :  { %v6614_v12 = vpop.f32.mrf.mxu0  ;;  %v6741_v6 = vpop.f32.mrf.mxu1 }
 0x506   :  { %v6615_v28 = vadd.f32 %v6614_v12, %v6572_v16  ;;  %v6656_v59 = vadd.f32 %v6655_v51, %v6613_v39 }
 0x507   :  { %v6743_v11 = vpop.f32.mrf.mxu1 }
 0x508   :  { %v6658_v63 = vadd.f32 %v6657_v57, %v6615_v28  ;;  %v6791_v1 = vpack.c.bf16 %v6656_v59, %v6652_v41 }
 0x50a   :  { %v6792_v0 = vpack.c.bf16 %v6658_v63, %v6654_v62 }
 0x50c   :  { %7259 = vmatprep.mubr.bf16.mxu1 %v6792_v0 }
 0x50d   :  { %7260 = vmatmul.mubr.bf16.vlgmr.msra.gmra.mxu1 %v6791_v1 }
 0x53f   :  { %v6694_v58 = vpop.f32.mrf.mxu0 }
 0x540   :  { %v6695_v14 = vadd.f32 %v6694_v58, %v4951_v21 }
 0x541   :  { %v6696_v38 = vpop.f32.mrf.mxu0 }
 0x542   :  { %v6697_v10 = vadd.f32 %v6696_v38, %v4955_v4  ;;  %v6738_v24 = vadd.f32 %v6737_v61, %v6695_v14 }
 0x543   :  { %v6698_v2 = vpop.f32.mrf.mxu0 }
 0x544   :  { %v6699_v7 = vadd.f32 %v6698_v2, %v4951_v21  ;;  %v6740_v20 = vadd.f32 %v6739_v3, %v6697_v10 }
 0x545   :  { %v6700_v5 = vpop.f32.mrf.mxu0 }
 0x546   :  { %v6701_v47 = vadd.f32 %v6700_v5, %v4955_v4  ;;  %v6742_v17 = vadd.f32 %v6741_v6, %v6699_v7 }
 0x548   :  { %v6744_v22 = vadd.f32 %v6743_v11, %v6701_v47 }
 0x57f   :  { %v6780_v8 = vpop.f32.mrf.mxu0 }
 0x580   :  { %v6781_v46 = vadd.f32 %v6780_v8, %v6738_v24 }
 0x581   :  { %v6782_v44 = vpop.f32.mrf.mxu0 }
 0x582   :  { %v6783_v27 = vadd.f32 %v6782_v44, %v6740_v20 }
 0x583   :  { %v6784_v19 = vpop.f32.mrf.mxu0 }
 0x584   :  { %v6785_v25 = vadd.f32 %v6784_v19, %v6742_v17 }
 0x585   :  { %v6786_v26 = vpop.f32.mrf.mxu0 }
 0x586   :  { %v6787_v29 = vadd.f32 %v6786_v26, %v6744_v22  ;;  %v6793_v15 = vpack.c.bf16 %v6785_v25, %v6781_v46 }
 0x588   :  { %v6794_v23 = vpack.c.bf16 %v6787_v29, %v6783_v27 }
 0x58a   :  { %7300 = vmatprep.mubr.bf16.mxu0 %v6794_v23 }
 0x58b   :  { %7301 = vmatmul.mubr.bf16.vlgmr.msra.gmra.mxu0 %v6793_v15  ;;  %v8275_v18 = vpop.f32.mrf.mxu1 }
 0x58d   :  { %v8276_v30 = vpop.f32.mrf.mxu1 }
 0x58e   :  { %v8277_v40 = vadd.f32 %v8276_v30, %v8275_v18 }
 0x58f   :  { %v8278_v33 = vpop.f32.mrf.mxu1 }
 0x590   :  { %v7221_v48 = vadd.f32 %v8277_v40, %v8201_v54 }
 0x591   :  { %v8279_v31 = vpop.f32.mrf.mxu1 }
 0x592   :  { %v8280_v42 = vadd.f32 %v8279_v31, %v8278_v33 }
 0x594   :  { %v7224_v49 = vadd.f32 %v8280_v42, %v8201_v54 }
 0x5cd   :  { %v8297_v32 = vpop.f32.mrf.mxu1 }
 0x5cf   :  { %v8298_v34 = vpop.f32.mrf.mxu1 }
 0x5d0   :  { %v8299_v45 = vadd.f32 %v8298_v34, %v8297_v32 }
 0x5d1   :  { %v8300_v35 = vpop.f32.mrf.mxu1 }
 0x5d2   :  { %v7262_v53 = vadd.f32 %v8299_v45, %v7221_v48 }
 0x5d3   :  { %v8301_v37 = vpop.f32.mrf.mxu1 }
 0x5d4   :  { %v8302_v50 = vadd.f32 %v8301_v37, %v8300_v35 }
 0x5d6   :  { %v7265_v16 = vadd.f32 %v8302_v50, %v7224_v49 }
 0x64b   :  { %v8319_v36 = vpop.f32.mrf.mxu0 }
 0x64d   :  { %v8320_v43 = vpop.f32.mrf.mxu0 }
 0x64e   :  { %v8321_v51 = vadd.f32 %v8320_v43, %v8319_v36 }
 0x64f   :  { %v8322_v13 = vpop.f32.mrf.mxu0 }
 0x650   :  { %v7303_v39 = vadd.f32 %v8321_v51, %v7262_v53 }
 0x651   :  { %v8323_v9 = vpop.f32.mrf.mxu0 }
 0x652   :  { %v8324_v52 = vadd.f32 %v8323_v9, %v8322_v13 }
 0x654   :  { %v7306_v55 = vadd.f32 %v8324_v52, %v7265_v16 }
 0x656   :  { %v8257_v12 = vpack.c.bf16 %v7306_v55, %v7303_v39 }
 0x658   :  { %8258 = vst [vmem:[%s10173_s9] sm:$0xff] %v8257_v12  }
 0x659   :  { %7323 = vsyncpa [#allocation3], 1 }
 0x65a   :  { %7324 = vsyncpa [#allocation5], 1 }
 0x65b   :  { %7325 = vsyncpa [#allocation8], 1 }
 0x65c   :  { %7326 = vsyncpa [#allocation11], 1 }
 0x65d   :  { %7327 = vsyncpa [#allocation14], 1 }

</bundles_post_ra>
